<compile_context>
chip_gen: v6e
topology: v6e:2x2x1
jax: 0.10.0
libtpu: 0.0.40
codegen_flags: <defaults>
</compile_context>

<pallas_src>
import jax
import jax.numpy as jnp
from jax.experimental import pallas as pl
from jax.experimental.pallas import tpu as pltpu


def _round_up(x, m):
    return ((x + m - 1) // m) * m


def _combine_embedding_kernel(word_ref, pos_ref, lf_ref, charf_ref,
                              wtab_ref, ptab_ref, ltab_ref, ctab_ref,
                              cw_ref, cb_ref, out_ref):
    """One token-block: all embedding branches fused, single 128-lane-wide store."""
    TN = word_ref.shape[0]                      # tokens in this block

    def embed(ids_ref, tab_ref):
        # one-hot (rows, V) built from an iota/compare, then an MXU matmul.
        n = ids_ref.shape[0]
        V = tab_ref.shape[0]
        ids = ids_ref[...]                                           # (n, 1) int32
        oh = (jax.lax.broadcasted_iota(jnp.int32, (n, V), 1) == ids)
        return jnp.dot(oh.astype(jnp.float32), tab_ref[...],
                       preferred_element_type=jnp.float32)           # (n, E)

    w_emb = embed(word_ref, wtab_ref)            # (TN, Ew)
    p_emb = embed(pos_ref, ptab_ref)             # (TN, Ep)
    l_emb = embed(lf_ref, ltab_ref)              # (TN, El)

    # ---- char branch: embed (already char-padded) ids, Conv1d as K tap matmuls,
    #      then max-pool over the char axis. ----
    ce_flat = embed(charf_ref, ctab_ref)         # (TN*C2, Ec), C2 = C + 2*pad
    K, Ec, Eo = cw_ref.shape
    C2 = charf_ref.shape[0] // TN
    C = C2 - (K - 1)
    ce = ce_flat.reshape(TN, C2, Ec)

    acc = jnp.zeros((TN, C, Eo), jnp.float32)
    for k in range(K):                           # static, tiny (K=3)
        win = ce[:, k:k + C, :].reshape(TN * C, Ec)
        acc = acc + jnp.dot(win, cw_ref[k],
                            preferred_element_type=jnp.float32).reshape(TN, C, Eo)
    # bias is constant across char positions -> commutes with the max-pool
    char_feat = jnp.max(acc, axis=1) + cb_ref[...]                   # (TN, Eo)

    # concat order matches the PyTorch module: [word, char, pos, local_feat]
    out_ref[...] = jnp.concatenate([w_emb, char_feat, p_emb, l_emb],
                                   axis=-1).astype(out_ref.dtype)


def combine_embedding_forward(word_ids, char_ids, pos_ids, lf_ids, params,
                              *, block_tokens=256):
    """word_ids/pos_ids/lf_ids: (B, T) int; char_ids: (B, T, C) int."""
    B, T = word_ids.shape
    C = char_ids.shape[-1]

    wtab = params["word_emb"]                    # (Vw, Ew)
    ctab = params["char_emb"]                    # (Vc, Ec)
    ptab = params["pos_emb"]                     # (Vp, Ep)
    ltab = params["lf_emb"]                      # (Vl, El)
    conv_w = params["char_conv_w"]               # (Eo, Ec, K)  (PyTorch Conv1d layout)
    conv_b = params["char_conv_b"]               # (Eo,)

    Eo, Ec, K = conv_w.shape
    assert K % 2 == 1, "only odd char kernel sizes supported"
    pad = (K - 1) // 2
    Vc = ctab.shape[0]
    Ew, Ep, El = wtab.shape[1], ptab.shape[1], ltab.shape[1]
    E_total = Ew + Eo + Ep + El

    # flatten tokens, pad to a sublane-friendly block size
    N = B * T
    TN = _round_up(min(block_tokens, _round_up(N, 8)), 8)
    N_pad = _round_up(N, TN)
    grid = (N_pad // TN,)

    def flat_pad(x):                             # (B,T) -> (N_pad, 1) int32
        x = x.reshape(N, 1).astype(jnp.int32)
        return jnp.pad(x, ((0, N_pad - N), (0, 0)))

    word_flat = flat_pad(word_ids)
    pos_flat = flat_pad(pos_ids)
    lf_flat = flat_pad(lf_ids)

    # Conv1d zero-padding folded into the lookup: pad the char axis with an
    # out-of-vocab sentinel id (one-hot row is all zeros -> exact zero embedding).
    char2d = char_ids.reshape(N, C).astype(jnp.int32)
    char2d = jnp.pad(char2d, ((0, 0), (pad, pad)), constant_values=Vc)
    char2d = jnp.pad(char2d, ((0, N_pad - N), (0, 0)))
    C2 = C + 2 * pad
    char_flat = char2d.reshape(N_pad * C2, 1)

    cw = jnp.transpose(conv_w, (2, 1, 0))        # (K, Ec_in, Eo) for per-tap x @ W_k
    cb = conv_b.reshape(1, Eo)

    out = pl.pallas_call(
        _combine_embedding_kernel,
        out_shape=jax.ShapeDtypeStruct((N_pad, E_total), jnp.float32),
        grid_spec=pltpu.PrefetchScalarGridSpec(
            num_scalar_prefetch=0,
            grid=grid,
            in_specs=[
                pl.BlockSpec((TN, 1), lambda i: (i, 0)),            # word ids
                pl.BlockSpec((TN, 1), lambda i: (i, 0)),            # pos ids
                pl.BlockSpec((TN, 1), lambda i: (i, 0)),            # local-feat ids
                pl.BlockSpec((TN * C2, 1), lambda i: (i, 0)),       # padded char ids
                pl.BlockSpec(wtab.shape, lambda i: (0, 0)),         # word table
                pl.BlockSpec(ptab.shape, lambda i: (0, 0)),         # pos table
                pl.BlockSpec(ltab.shape, lambda i: (0, 0)),         # local-feat table
                pl.BlockSpec(ctab.shape, lambda i: (0, 0)),         # char table
                pl.BlockSpec(cw.shape, lambda i: (0, 0, 0)),        # conv taps
                pl.BlockSpec(cb.shape, lambda i: (0, 0)),           # conv bias
            ],
            out_specs=pl.BlockSpec((TN, E_total), lambda i: (i, 0)),
        ),
        compiler_params=pltpu.CompilerParams(
            dimension_semantics=("parallel",)),                     # token blocks independent
    )(word_flat, pos_flat, lf_flat, char_flat, wtab, ptab, ltab, ctab, cw, cb)

    return out[:N].reshape(B, T, E_total)


def _combine_embedding_reference(word_ids, char_ids, pos_ids, lf_ids, params):
    """Pure-JAX reference mirroring the PyTorch forward (for verification)."""
    B, T = word_ids.shape
    C = char_ids.shape[-1]
    wtab, ctab = params["word_emb"], params["char_emb"]
    ptab, ltab = params["pos_emb"], params["lf_emb"]
    conv_w, conv_b = params["char_conv_w"], params["char_conv_b"]
    Eo, Ec, K = conv_w.shape
    pad = (K - 1) // 2

    word = wtab[word_ids]                                        # (B, T, Ew)
    ce = ctab[char_ids].reshape(B * T, C, Ec).transpose(0, 2, 1)  # (N, Ec, C)
    y = jax.lax.conv_general_dilated(
        ce, conv_w, window_strides=(1,), padding=[(pad, pad)],
        dimension_numbers=("NCH", "OIH", "NCH"),
        precision=jax.lax.Precision.HIGHEST)
    y = y + conv_b[None, :, None]
    char_feat = jnp.max(y, axis=-1).reshape(B, T, Eo)            # max_pool1d(char_max)
    pos = ptab[pos_ids]
    lf = ltab[lf_ids]
    return jnp.concatenate([word, char_feat, pos, lf], axis=-1)


if __name__ == "__main__":
    # Small shapes consistent with the module; total embedding width = 128 lanes.
    B, T, C = 2, 8, 16
    Vw, Ew = 128, 64          # word vocab / dim
    Vc, Ec = 64, 32           # char vocab / dim
    Vp, Ep = 32, 16           # pos vocab / dim
    Vl, El = 16, 16           # local-feat vocab / dim
    K = 3                     # char_kernel_size

    key = jax.random.PRNGKey(0)
    ks = jax.random.split(key, 10)

    def make_table(k, V, E):
        t = 0.1 * jax.random.normal(k, (V, E), jnp.float32)
        return t.at[0].set(0.0)                  # padding_idx=0 row is zero

    params = {
        "word_emb": make_table(ks[0], Vw, Ew),
        "char_emb": make_table(ks[1], Vc, Ec),
        "pos_emb": make_table(ks[2], Vp, Ep),
        "lf_emb": make_table(ks[3], Vl, El),
        "char_conv_w": 0.1 * jax.random.normal(ks[4], (Ec, Ec, K), jnp.float32),
        "char_conv_b": 0.1 * jax.random.normal(ks[5], (Ec,), jnp.float32),
    }

    word_ids = jax.random.randint(ks[6], (B, T), 0, Vw)
    char_ids = jax.random.randint(ks[7], (B, T, C), 0, Vc)
    pos_ids = jax.random.randint(ks[8], (B, T), 0, Vp)
    lf_ids = jax.random.randint(ks[9], (B, T), 0, Vl)
    word_ids = word_ids.at[0, -1].set(0)         # exercise the padding_idx row

    out = combine_embedding_forward(word_ids, char_ids, pos_ids, lf_ids, params)
    out = jax.block_until_ready(out)

    ref = _combine_embedding_reference(word_ids, char_ids, pos_ids, lf_ids, params)
    assert out.shape == (B, T, Ew + Ec + Ep + El)
    assert jnp.allclose(out, ref, atol=1e-2, rtol=1e-2), "mismatch vs reference"
    # padding_idx=0 word -> its word-embedding slice must be (near-exactly) zero
    assert float(jnp.max(jnp.abs(out[0, -1, :Ew]))) <= 1e-6

    print("KERNEL_OK")
</pallas_src>

<mosaic_0001>
module attributes {stable_mosaic.version = 11 : i64} {
  func.func @_combine_embedding_kernel(%arg0: i32, %arg1: memref<16x1xi32, #tpu.memory_space<vmem>>, %arg2: memref<16x1xi32, #tpu.memory_space<vmem>>, %arg3: memref<16x1xi32, #tpu.memory_space<vmem>>, %arg4: memref<288x1xi32, #tpu.memory_space<vmem>>, %arg5: memref<128x64xf32, #tpu.memory_space<vmem>>, %arg6: memref<32x16xf32, #tpu.memory_space<vmem>>, %arg7: memref<16x16xf32, #tpu.memory_space<vmem>>, %arg8: memref<64x32xf32, #tpu.memory_space<vmem>>, %arg9: memref<3x32x32xf32, #tpu.memory_space<vmem>>, %arg10: memref<1x32xf32, #tpu.memory_space<vmem>>, %arg11: memref<16x128xf32, #tpu.memory_space<vmem>>) attributes {dimension_semantics = [#tpu.dimension_semantics<parallel>], iteration_bounds = array<i64: 1>, scalar_prefetch = 0 : i64, scratch_operands = 0 : i64, tpu.core_type = #tpu.core_type<tc>, window_params = [{transform_indices = @transform_0, window_bounds = array<i64: 16, 1>}, {transform_indices = @transform_1, window_bounds = array<i64: 16, 1>}, {transform_indices = @transform_2, window_bounds = array<i64: 16, 1>}, {transform_indices = @transform_3, window_bounds = array<i64: 288, 1>}, {pipeline_mode = #tpu.pipeline_mode<synchronous>, transform_indices = @transform_4, window_bounds = array<i64: 128, 64>}, {pipeline_mode = #tpu.pipeline_mode<synchronous>, transform_indices = @transform_5, window_bounds = array<i64: 32, 16>}, {pipeline_mode = #tpu.pipeline_mode<synchronous>, transform_indices = @transform_6, window_bounds = array<i64: 16, 16>}, {pipeline_mode = #tpu.pipeline_mode<synchronous>, transform_indices = @transform_7, window_bounds = array<i64: 64, 32>}, {pipeline_mode = #tpu.pipeline_mode<synchronous>, transform_indices = @transform_8, window_bounds = array<i64: 3, 32, 32>}, {pipeline_mode = #tpu.pipeline_mode<synchronous>, transform_indices = @transform_9, window_bounds = array<i64: 1, 32>}, {transform_indices = @transform_10, window_bounds = array<i64: 16, 128>}]} {
    %c0 = arith.constant 0 : index
    %c0_0 = arith.constant 0 : index
    %0 = vector.load %arg1[%c0, %c0_0] : memref<16x1xi32, #tpu.memory_space<vmem>>, vector<16x1xi32>
    %1 = tpu.iota {dimensions = array<i32: 1>} : vector<16x128xi32>
    %2 = vector.broadcast %0 : vector<16x1xi32> to vector<16x128xi32>
    %3 = arith.cmpi eq, %1, %2 : vector<16x128xi32>
    %4 = arith.extui %3 : vector<16x128xi1> to vector<16x128xi32>
    %5 = arith.sitofp %4 : vector<16x128xi32> to vector<16x128xf32>
    %c0_1 = arith.constant 0 : index
    %c0_2 = arith.constant 0 : index
    %6 = vector.load %arg5[%c0_1, %c0_2] : memref<128x64xf32, #tpu.memory_space<vmem>>, vector<128x64xf32>
    %cst = arith.constant dense<0.000000e+00> : vector<16x64xf32>
    %7 = tpu.matmul %5, %6, %cst {dimension_numbers = #tpu.dot_dimension_numbers<[1], [0], [0], [1], [0, 0, 1, 1], [], []>} : vector<16x128xf32>, vector<128x64xf32>, vector<16x64xf32> -> vector<16x64xf32>
    %c0_3 = arith.constant 0 : index
    %c0_4 = arith.constant 0 : index
    %8 = vector.load %arg2[%c0_3, %c0_4] : memref<16x1xi32, #tpu.memory_space<vmem>>, vector<16x1xi32>
    %9 = tpu.iota {dimensions = array<i32: 1>} : vector<16x32xi32>
    %10 = vector.broadcast %8 : vector<16x1xi32> to vector<16x32xi32>
    %11 = arith.cmpi eq, %9, %10 : vector<16x32xi32>
    %12 = arith.extui %11 : vector<16x32xi1> to vector<16x32xi32>
    %13 = arith.sitofp %12 : vector<16x32xi32> to vector<16x32xf32>
    %c0_5 = arith.constant 0 : index
    %c0_6 = arith.constant 0 : index
    %14 = vector.load %arg6[%c0_5, %c0_6] : memref<32x16xf32, #tpu.memory_space<vmem>>, vector<32x16xf32>
    %cst_7 = arith.constant dense<0.000000e+00> : vector<16x16xf32>
    %15 = tpu.matmul %13, %14, %cst_7 {dimension_numbers = #tpu.dot_dimension_numbers<[1], [0], [0], [1], [0, 0, 1, 1], [], []>} : vector<16x32xf32>, vector<32x16xf32>, vector<16x16xf32> -> vector<16x16xf32>
    %c0_8 = arith.constant 0 : index
    %c0_9 = arith.constant 0 : index
    %16 = vector.load %arg3[%c0_8, %c0_9] : memref<16x1xi32, #tpu.memory_space<vmem>>, vector<16x1xi32>
    %17 = tpu.iota {dimensions = array<i32: 1>} : vector<16x16xi32>
    %18 = vector.broadcast %16 : vector<16x1xi32> to vector<16x16xi32>
    %19 = arith.cmpi eq, %17, %18 : vector<16x16xi32>
    %20 = arith.extui %19 : vector<16x16xi1> to vector<16x16xi32>
    %21 = arith.sitofp %20 : vector<16x16xi32> to vector<16x16xf32>
    %c0_10 = arith.constant 0 : index
    %c0_11 = arith.constant 0 : index
    %22 = vector.load %arg7[%c0_10, %c0_11] : memref<16x16xf32, #tpu.memory_space<vmem>>, vector<16x16xf32>
    %cst_12 = arith.constant dense<0.000000e+00> : vector<16x16xf32>
    %23 = tpu.matmul %21, %22, %cst_12 {dimension_numbers = #tpu.dot_dimension_numbers<[1], [0], [0], [1], [0, 0, 1, 1], [], []>} : vector<16x16xf32>, vector<16x16xf32>, vector<16x16xf32> -> vector<16x16xf32>
    %c0_13 = arith.constant 0 : index
    %c0_14 = arith.constant 0 : index
    %24 = vector.load %arg4[%c0_13, %c0_14] : memref<288x1xi32, #tpu.memory_space<vmem>>, vector<288x1xi32>
    %25 = tpu.iota {dimensions = array<i32: 1>} : vector<288x64xi32>
    %26 = vector.broadcast %24 : vector<288x1xi32> to vector<288x64xi32>
    %27 = arith.cmpi eq, %25, %26 : vector<288x64xi32>
    %28 = arith.extui %27 : vector<288x64xi1> to vector<288x64xi32>
    %29 = arith.sitofp %28 : vector<288x64xi32> to vector<288x64xf32>
    %c0_15 = arith.constant 0 : index
    %c0_16 = arith.constant 0 : index
    %30 = vector.load %arg8[%c0_15, %c0_16] : memref<64x32xf32, #tpu.memory_space<vmem>>, vector<64x32xf32>
    %cst_17 = arith.constant dense<0.000000e+00> : vector<288x32xf32>
    %31 = tpu.matmul %29, %30, %cst_17 {dimension_numbers = #tpu.dot_dimension_numbers<[1], [0], [0], [1], [0, 0, 1, 1], [], []>} : vector<288x64xf32>, vector<64x32xf32>, vector<288x32xf32> -> vector<288x32xf32>
    %32 = vector.shape_cast %31 : vector<288x32xf32> to vector<16x18x32xf32>
    %cst_18 = arith.constant 0.000000e+00 : f32
    %33 = vector.broadcast %cst_18 : f32 to vector<16x16x32xf32>
    %34 = vector.extract_strided_slice %32 {offsets = [0, 0, 0], sizes = [16, 16, 32], strides = [1, 1, 1]} : vector<16x18x32xf32> to vector<16x16x32xf32>
    %35 = vector.shape_cast %34 : vector<16x16x32xf32> to vector<256x32xf32>
    %c0_19 = arith.constant 0 : index
    %c0_20 = arith.constant 0 : index
    %c0_21 = arith.constant 0 : index
    %36 = vector.load %arg9[%c0_19, %c0_20, %c0_21] : memref<3x32x32xf32, #tpu.memory_space<vmem>>, vector<1x32x32xf32>
    %37 = vector.shape_cast %36 : vector<1x32x32xf32> to vector<32x32xf32>
    %cst_22 = arith.constant dense<0.000000e+00> : vector<256x32xf32>
    %38 = tpu.matmul %35, %37, %cst_22 {dimension_numbers = #tpu.dot_dimension_numbers<[1], [0], [0], [1], [0, 0, 1, 1], [], []>} : vector<256x32xf32>, vector<32x32xf32>, vector<256x32xf32> -> vector<256x32xf32>
    %39 = vector.shape_cast %38 : vector<256x32xf32> to vector<16x16x32xf32>
    %40 = arith.addf %33, %39 : vector<16x16x32xf32>
    %41 = vector.extract_strided_slice %32 {offsets = [0, 1, 0], sizes = [16, 16, 32], strides = [1, 1, 1]} : vector<16x18x32xf32> to vector<16x16x32xf32>
    %42 = vector.shape_cast %41 : vector<16x16x32xf32> to vector<256x32xf32>
    %c1 = arith.constant 1 : index
    %c0_23 = arith.constant 0 : index
    %c0_24 = arith.constant 0 : index
    %43 = vector.load %arg9[%c1, %c0_23, %c0_24] : memref<3x32x32xf32, #tpu.memory_space<vmem>>, vector<1x32x32xf32>
    %44 = vector.shape_cast %43 : vector<1x32x32xf32> to vector<32x32xf32>
    %cst_25 = arith.constant dense<0.000000e+00> : vector<256x32xf32>
    %45 = tpu.matmul %42, %44, %cst_25 {dimension_numbers = #tpu.dot_dimension_numbers<[1], [0], [0], [1], [0, 0, 1, 1], [], []>} : vector<256x32xf32>, vector<32x32xf32>, vector<256x32xf32> -> vector<256x32xf32>
    %46 = vector.shape_cast %45 : vector<256x32xf32> to vector<16x16x32xf32>
    %47 = arith.addf %40, %46 : vector<16x16x32xf32>
    %48 = vector.extract_strided_slice %32 {offsets = [0, 2, 0], sizes = [16, 16, 32], strides = [1, 1, 1]} : vector<16x18x32xf32> to vector<16x16x32xf32>
    %49 = vector.shape_cast %48 : vector<16x16x32xf32> to vector<256x32xf32>
    %c2 = arith.constant 2 : index
    %c0_26 = arith.constant 0 : index
    %c0_27 = arith.constant 0 : index
    %50 = vector.load %arg9[%c2, %c0_26, %c0_27] : memref<3x32x32xf32, #tpu.memory_space<vmem>>, vector<1x32x32xf32>
    %51 = vector.shape_cast %50 : vector<1x32x32xf32> to vector<32x32xf32>
    %cst_28 = arith.constant dense<0.000000e+00> : vector<256x32xf32>
    %52 = tpu.matmul %49, %51, %cst_28 {dimension_numbers = #tpu.dot_dimension_numbers<[1], [0], [0], [1], [0, 0, 1, 1], [], []>} : vector<256x32xf32>, vector<32x32xf32>, vector<256x32xf32> -> vector<256x32xf32>
    %53 = vector.shape_cast %52 : vector<256x32xf32> to vector<16x16x32xf32>
    %54 = arith.addf %47, %53 : vector<16x16x32xf32>
    %cst_29 = arith.constant dense<0xFF800000> : vector<16x32xf32>
    %55 = vector.multi_reduction <maximumf>, %54, %cst_29 [1] : vector<16x16x32xf32> to vector<16x32xf32>
    %c0_30 = arith.constant 0 : index
    %c0_31 = arith.constant 0 : index
    %56 = vector.load %arg10[%c0_30, %c0_31] : memref<1x32xf32, #tpu.memory_space<vmem>>, vector<1x32xf32>
    %57 = vector.broadcast %56 : vector<1x32xf32> to vector<16x32xf32>
    %58 = arith.addf %55, %57 : vector<16x32xf32>
    %59 = tpu.concatenate %7, %58, %15, %23 in 1 : vector<16x64xf32>, vector<16x32xf32>, vector<16x16xf32>, vector<16x16xf32> -> vector<16x128xf32>
    %c0_32 = arith.constant 0 : index
    %c0_33 = arith.constant 0 : index
    %60 = vector.load %arg11[%c0_32, %c0_33] : memref<16x128xf32, #tpu.memory_space<vmem>>, vector<16x128xf32>
    tpu.vector_store %arg11[%c0_32, %c0_33], %59 {strides = array<i32>} : memref<16x128xf32, #tpu.memory_space<vmem>>, vector<16x128xf32>,
    return
  }
  func.func @transform_0(%arg0: i32) -> (i32, i32) {
    %c0_i32 = arith.constant 0 : i32
    %c0_i32_0 = arith.constant 0 : i32
    return %arg0, %c0_i32 : i32, i32
  }
  func.func @transform_1(%arg0: i32) -> (i32, i32) {
    %c0_i32 = arith.constant 0 : i32
    %c0_i32_0 = arith.constant 0 : i32
    return %arg0, %c0_i32 : i32, i32
  }
  func.func @transform_2(%arg0: i32) -> (i32, i32) {
    %c0_i32 = arith.constant 0 : i32
    %c0_i32_0 = arith.constant 0 : i32
    return %arg0, %c0_i32 : i32, i32
  }
  func.func @transform_3(%arg0: i32) -> (i32, i32) {
    %c0_i32 = arith.constant 0 : i32
    %c0_i32_0 = arith.constant 0 : i32
    return %arg0, %c0_i32 : i32, i32
  }
  func.func @transform_4(%arg0: i32) -> (i32, i32) {
    %c0_i32 = arith.constant 0 : i32
    %c0_i32_0 = arith.constant 0 : i32
    %c0_i32_1 = arith.constant 0 : i32
    return %c0_i32, %c0_i32_0 : i32, i32
  }
  func.func @transform_5(%arg0: i32) -> (i32, i32) {
    %c0_i32 = arith.constant 0 : i32
    %c0_i32_0 = arith.constant 0 : i32
    %c0_i32_1 = arith.constant 0 : i32
    return %c0_i32, %c0_i32_0 : i32, i32
  }
  func.func @transform_6(%arg0: i32) -> (i32, i32) {
    %c0_i32 = arith.constant 0 : i32
    %c0_i32_0 = arith.constant 0 : i32
    %c0_i32_1 = arith.constant 0 : i32
    return %c0_i32, %c0_i32_0 : i32, i32
  }
  func.func @transform_7(%arg0: i32) -> (i32, i32) {
    %c0_i32 = arith.constant 0 : i32
    %c0_i32_0 = arith.constant 0 : i32
    %c0_i32_1 = arith.constant 0 : i32
    return %c0_i32, %c0_i32_0 : i32, i32
  }
  func.func @transform_8(%arg0: i32) -> (i32, i32, i32) {
    %c0_i32 = arith.constant 0 : i32
    %c0_i32_0 = arith.constant 0 : i32
    %c0_i32_1 = arith.constant 0 : i32
    %c0_i32_2 = arith.constant 0 : i32
    return %c0_i32, %c0_i32_0, %c0_i32_1 : i32, i32, i32
  }
  func.func @transform_9(%arg0: i32) -> (i32, i32) {
    %c0_i32 = arith.constant 0 : i32
    %c0_i32_0 = arith.constant 0 : i32
    %c0_i32_1 = arith.constant 0 : i32
    return %c0_i32, %c0_i32_0 : i32, i32
  }
  func.func @transform_10(%arg0: i32) -> (i32, i32) {
    %c0_i32 = arith.constant 0 : i32
    %c0_i32_0 = arith.constant 0 : i32
    return %arg0, %c0_i32 : i32, i32
  }
}

</mosaic_0001>

<bundles_post_ra>
// kernel: tpu_custom_call.1
= control target key start
LH: loop header
LB: loop body
LE: loop exit
PB: predicated region body
PF: predicated region fallthrough
CT: control target
= control target key end

     0   :  { %v5592_v2 = vmov 0   ;;  %s8663_s0 = inlined_call_operand.vmem [shape: s32[16,1], index: 0, kind: input, shape index: {}]   ;;  %s8664_s1 = inlined_call_operand.vmem [shape: s32[16,1], index: 1, kind: input, shape index: {}]   ;;  %s8665_s2 = inlined_call_operand.vmem [shape: s32[16,1], index: 2, kind: input, shape index: {}]   ;;  %s8666_s3 = inlined_call_operand.vmem [shape: s32[288,1], index: 3, kind: input, shape index: {}]   ;;  %s8667_s4 = inlined_call_operand.vmem [shape: f32[128,64], index: 4, kind: input, shape index: {}]   ;;  %s8668_s5 = inlined_call_operand.vmem [shape: f32[32,16], index: 5, kind: input, shape index: {}]   ;;  %s8669_s6 = inlined_call_operand.vmem [shape: f32[16,16], index: 6, kind: input, shape index: {}]   ;;  %s8670_s7 = inlined_call_operand.vmem [shape: f32[64,32], index: 7, kind: input, shape index: {}]   ;;  %s8671_s8 = inlined_call_operand.vmem [shape: f32[3,32,32], index: 8, kind: input, shape index: {}]   ;;  %s8672_s9 = inlined_call_operand.vmem [shape: f32[1,32], index: 9, kind: input, shape index: {}]   ;;  %s8673_s10 = inlined_call_operand.hbm [shape: f32[16,128], index: 10, kind: output, shape index: {}]  }
   0x1   :  { %v243_v0 = vld [vmem:[%s8665_s2] sm:$0xff]  ;;  %5569 = vset.pattern.permute.xlu1 %v5592_v2  ;;  %5568 = vset.pattern.permute.xlu0 %v5592_v2  ;;  %v244_v3 = vld [vmem:[%s8665_s2 + $0x8] sm:$0xff]  ;;  %v344_v7 = vld [vmem:[%s8666_s3 + $0x18] sm:$0xff] }
   0x2   :  { %v143_v1 = vld [vmem:[%s8664_s1] sm:$0xff]  ;;  %246 = vperm.xlu1 %5569, %v243_v0   ;;  %v144_v4 = vld [vmem:[%s8664_s1 + $0x8] sm:$0xff]  ;;  %v343_v8 = vld [vmem:[%s8666_s3 + $0x10] sm:$0xff] }
   0x3   :  { %146 = vperm.xlu0 %5568, %v143_v1   ;;  %v342_v5 = vld [vmem:[%s8666_s3 + $0x8] sm:$0xff]  ;;  %v341_v6 = vld [vmem:[%s8666_s3] sm:$0xff]  ;;  %v160_v9 = vld [vmem:[%s8668_s5 + $0x18] sm:$0xff] }
   0x4   :  { %v159_v10 = vld [vmem:[%s8668_s5 + $0x10] sm:$0xff]  ;;  %v346_v11 = vld [vmem:[%s8666_s3 + $0x28] sm:$0xff]  ;;  %v345_v12 = vld [vmem:[%s8666_s3 + $0x20] sm:$0xff]  ;;  %5302 = vmatprep.subr.mxu1 %v160_v9 }
   0x5   :  { %5303 = vmatpush3.msra.mxu1 %v160_v9  ;;  %v158_v13 = vld [vmem:[%s8668_s5 + $0x8] sm:$0xff] }
   0x6   :  { %249 = vperm.xlu1 %5569, %v244_v3   ;;  %5304 = vmatprep.subr.mxu1 %v159_v10 }
   0x7   :  { %149 = vperm.xlu0 %5568, %v144_v4  }
   0xa   :  { %381 = vperm.xlu1 %5569, %v342_v5  }
   0xb   :  { %378 = vperm.xlu0 %5568, %v341_v6  }
   0xe   :  { %387 = vperm.xlu1 %5569, %v344_v7  }
   0xf   :  { %384 = vperm.xlu0 %5568, %v343_v8  }
  0x12   :  { %393 = vperm.xlu1 %5569, %v346_v11  }
  0x13   :  { %390 = vperm.xlu0 %5568, %v345_v12  }
  0x14   :  { %15 = vsyncpa [#allocation3], 0  ;;  %v348_v14 = vld [vmem:[%s8666_s3 + $0x38] sm:$0xff]  ;;  %v347_v15 = vld [vmem:[%s8666_s3 + $0x30] sm:$0xff]  ;;  %5305 = vmatpush3.msra.mxu1 %v159_v10  ;;  %v38_v0 = vlaneseq  ;;  %vm161_vm0 = vcmask 261120   ;;  %v5593_v4 = vmov 0.0  }
  0x15   :  { %5306 = vmatprep.subr.mxu1 %v158_v13  ;;  %v157_v16 = vld [vmem:[%s8668_s5] sm:$0xff]  ;;  %v5708_v17 = vld [vmem:[%s8669_s6 + $0x8] sm:$0xff]  ;;  %v352_v20 = vld [vmem:[%s8666_s3 + $0x58] sm:$0xff]  ;;  %vm259_vm4 = vcmask 130048   ;;  %vm601_vm7 = vcmask 523264   ;;  %s5595_s5 = smov 96  }
  0x16   :  { %5307 = vmatpush3.msra.mxu1 %v158_v13  ;;  %399 = vperm.xlu1 %5569, %v348_v14   ;;  %v350_v18 = vld [vmem:[%s8666_s3 + $0x48] sm:$0xff]  ;;  %v349_v19 = vld [vmem:[%s8666_s3 + $0x40] sm:$0xff]  ;;  %v351_v21 = vld [vmem:[%s8666_s3 + $0x50] sm:$0xff]  ;;  %v5850_v1 = vand.u32 127, %v38_v0  ;;  %s5598_s14 = smov 112   ;;  %s5599_s15 = smov [#allocation2]  }
  0x17   :  { %396 = vperm.xlu0 %5568, %v347_v15   ;;  %5308 = vmatprep.subr.mxu1 %v157_v16  ;;  %v354_v22 = vld [vmem:[%s8666_s3 + $0x68] sm:$0xff]  ;;  %v353_v23 = vld [vmem:[%s8666_s3 + $0x60] sm:$0xff]  ;;  %v356_v24 = vld [vmem:[%s8666_s3 + $0x78] sm:$0xff] }
  0x18   :  { %5309 = vmatpush3.msra.mxu1 %v157_v16  ;;  %v355_v25 = vld [vmem:[%s8666_s3 + $0x70] sm:$0xff]  ;;  %v358_v26 = vld [vmem:[%s8666_s3 + $0x88] sm:$0xff]  ;;  %v357_v27 = vld [vmem:[%s8666_s3 + $0x80] sm:$0xff] }
  0x19   :  { %5313 = vmatprep.subr.mxu1 %v5708_v17  ;;  %v360_v28 = vld [vmem:[%s8666_s3 + $0x98] sm:$0xff]  ;;  %v359_v29 = vld [vmem:[%s8666_s3 + $0x90] sm:$0xff]  ;;  %v362_v30 = vld [vmem:[%s8666_s3 + $0xa8] sm:$0xff] }
  0x1a   :  { %405 = vperm.xlu1 %5569, %v350_v18   ;;  %v361_v31 = vld [vmem:[%s8666_s3 + $0xa0] sm:$0xff]  ;;  %v67_v32 = vld [vmem:[%s8667_s4 + $0x78] sm:$0xff]  ;;  %v66_v33 = vld [vmem:[%s8667_s4 + $0x70] sm:$0xff] }
  0x1b   :  { %402 = vperm.xlu0 %5568, %v349_v19   ;;  %5267 = vmatprep.subr.mxu0 %v67_v32  ;;  %v364_v34 = vld [vmem:[%s8666_s3 + $0xb8] sm:$0xff]  ;;  %v363_v35 = vld [vmem:[%s8666_s3 + $0xb0] sm:$0xff]  ;;  %v65_v36 = vld [vmem:[%s8667_s4 + $0x68] sm:$0xff] }
  0x1c   :  { %5268 = vmatpush3.msra.mxu0 %v67_v32  ;;  %v64_v37 = vld [vmem:[%s8667_s4 + $0x60] sm:$0xff]  ;;  %v366_v38 = vld [vmem:[%s8666_s3 + $0xc8] sm:$0xff]  ;;  %v63_v40 = vld [vmem:[%s8667_s4 + $0x58] sm:$0xff] }
  0x1d   :  { %5269 = vmatprep.subr.mxu0 %v66_v33  ;;  %v365_v39 = vld [vmem:[%s8666_s3 + $0xc0] sm:$0xff]  ;;  %v368_v41 = vld [vmem:[%s8666_s3 + $0xd8] sm:$0xff]  ;;  %v367_v42 = vld [vmem:[%s8666_s3 + $0xd0] sm:$0xff] }
  0x1e   :  { %411 = vperm.xlu1 %5569, %v352_v20   ;;  %5270 = vmatpush3.msra.mxu0 %v66_v33  ;;  %v62_v43 = vld [vmem:[%s8667_s4 + $0x50] sm:$0xff]  ;;  %v61_v44 = vld [vmem:[%s8667_s4 + $0x48] sm:$0xff]  ;;  %v369_v46 = vld [vmem:[%s8666_s3 + $0xe0] sm:$0xff] }
  0x1f   :  { %408 = vperm.xlu0 %5568, %v351_v21   ;;  %5271 = vmatprep.subr.mxu0 %v65_v36  ;;  %v370_v45 = vld [vmem:[%s8666_s3 + $0xe8] sm:$0xff]  ;;  %v60_v47 = vld [vmem:[%s8667_s4 + $0x40] sm:$0xff]  ;;  %v372_v48 = vld [vmem:[%s8666_s3 + $0xf8] sm:$0xff] }
  0x20   :  { %5272 = vmatpush3.msra.mxu0 %v65_v36  ;;  %v371_v49 = vld [vmem:[%s8666_s3 + $0xf0] sm:$0xff]  ;;  %v59_v50 = vld [vmem:[%s8667_s4 + $0x38] sm:$0xff]  ;;  %v374_v52 = vld [vmem:[%s8666_s3 + $0x108] sm:$0xff] }
  0x21   :  { %5273 = vmatprep.subr.mxu0 %v64_v37  ;;  %v58_v51 = vld [vmem:[%s8667_s4 + $0x30] sm:$0xff]  ;;  %v373_v53 = vld [vmem:[%s8666_s3 + $0x100] sm:$0xff]  ;;  %v57_v54 = vld [vmem:[%s8667_s4 + $0x28] sm:$0xff] }
  0x22   :  { %417 = vperm.xlu1 %5569, %v354_v22   ;;  %5274 = vmatpush3.msra.mxu0 %v64_v37  ;;  %v376_v55 = vld [vmem:[%s8666_s3 + $0x118] sm:$0xff]  ;;  %v375_v56 = vld [vmem:[%s8666_s3 + $0x110] sm:$0xff]  ;;  %v56_v57 = vld [vmem:[%s8667_s4 + $0x20] sm:$0xff] }
  0x23   :  { %414 = vperm.xlu0 %5568, %v353_v23   ;;  %5275 = vmatprep.subr.mxu0 %v63_v40  ;;  %v55_v58 = vld [vmem:[%s8667_s4 + $0x18] sm:$0xff]  ;;  %v37_v59 = vld [vmem:[%s8663_s0 + $0x8] sm:$0xff]  ;;  %v36_v60 = vld [vmem:[%s8663_s0] sm:$0xff] }
  0x24   :  { %5276 = vmatpush3.msra.mxu0 %v63_v40  ;;  %v54_v61 = vld [vmem:[%s8667_s4 + $0x10] sm:$0xff]  ;;  %v53_v62 = vld [vmem:[%s8667_s4 + $0x8] sm:$0xff]  ;;  %v52_v63 = vld [vmem:[%s8667_s4] sm:$0xff] }
  0x25   :  { %5277 = vmatprep.subr.mxu0 %v62_v43  ;;  %v257_v10 = vld [vmem:[%s8669_s6] sm:$0xff]  ;;  %v600_v13 = vld [vmem:[%s8670_s7 + $0x38] sm:$0xff]  ;;  %v599_v16 = vld [vmem:[%s8670_s7 + $0x30] sm:$0xff] }
  0x26   :  { %423 = vperm.xlu1 %5569, %v356_v24   ;;  %5278 = vmatpush3.msra.mxu0 %v62_v43  ;;  %v598_v19 = vld [vmem:[%s8670_s7 + $0x28] sm:$0xff]  ;;  %v597_v20 = vld [vmem:[%s8670_s7 + $0x20] sm:$0xff]  ;;  %v596_v23 = vld [vmem:[%s8670_s7 + $0x18] sm:$0xff] }
  0x27   :  { %420 = vperm.xlu0 %5568, %v355_v25   ;;  %5279 = vmatprep.subr.mxu0 %v61_v44  ;;  %v595_v24 = vld [vmem:[%s8670_s7 + $0x10] sm:$0xff] }
  0x28   :  { %5280 = vmatpush3.msra.mxu0 %v61_v44 }
  0x29   :  { %5281 = vmatprep.subr.mxu0 %v60_v47 }
  0x2a   :  { %429 = vperm.xlu1 %5569, %v358_v26   ;;  %5282 = vmatpush3.msra.mxu0 %v60_v47 }
  0x2b   :  { %426 = vperm.xlu0 %5568, %v357_v27   ;;  %5283 = vmatprep.subr.mxu0 %v59_v50  ;;  %v594_v27 = vld [vmem:[%s8670_s7 + $0x8] sm:$0xff] }
  0x2c   :  { %5284 = vmatpush3.msra.mxu0 %v59_v50 }
  0x2d   :  { %5285 = vmatprep.subr.mxu0 %v58_v51 }
  0x2e   :  { %435 = vperm.xlu1 %5569, %v360_v28   ;;  %5286 = vmatpush3.msra.mxu0 %v58_v51  ;;  %v593_v28 = vld [vmem:[%s8670_s7] sm:$0xff]  ;;  %s4871_s7 = sshll.u32 %s5599_s15, 4  ;;  %s4872_s7 = int_to_ptr.vmem [resolvable:$true] %s4871_s7 }
  0x2f   :  { %432 = vperm.xlu0 %5568, %v359_v29   ;;  %5287 = vmatprep.subr.mxu0 %v57_v54  ;;  %s5570_s16 = scalar_lea.vmem %s4872_s7, 256  ;;  %p5575_p1 = scmp.lt.s32.totalorder %s4872_s7, %s4872_s7 }
  0x30   :  { %5288 = vmatpush3.msra.mxu0 %v57_v54  ;;  %p5571_p0 = scmp.ne.s32.totalorder %s4872_s7, %s5570_s16  ;;  %p5576_p2 = scmp.lt.s32.totalorder %s5570_s16, %s5570_s16 }
  0x31   :  { %5289 = vmatprep.subr.mxu0 %v56_v57 }
  0x32   :  { %441 = vperm.xlu1 %5569, %v362_v30   ;;  %5290 = vmatpush3.msra.mxu0 %v56_v57  ;;  %p5577_p3 = por %p5576_p2, %p5575_p1 }
  0x33   :  { %438 = vperm.xlu0 %5568, %v361_v31   ;;  %5291 = vmatprep.subr.mxu0 %v55_v58 }
  0x34   :  { %5292 = vmatpush3.msra.mxu0 %v55_v58  ;;  %p5578_p4 = pnand %p5577_p3, %p5571_p0 }
  0x35   :  { %5293 = vmatprep.subr.mxu0 %v54_v61 }
  0x36   :  { %447 = vperm.xlu1 %5569, %v364_v34   ;;  %5294 = vmatpush3.msra.mxu0 %v54_v61 }
  0x37   :  { %444 = vperm.xlu0 %5568, %v363_v35   ;;  %5295 = vmatprep.subr.mxu0 %v53_v62 }
  0x38   :  { %5296 = vmatpush3.msra.mxu0 %v53_v62 }
  0x39   :  { %5297 = vmatprep.subr.mxu0 %v52_v63 }
  0x3a   :  { %453 = vperm.xlu1 %5569, %v366_v38   ;;  %5298 = vmatpush3.msra.mxu0 %v52_v63 }
  0x3b   :  { %450 = vperm.xlu0 %5568, %v365_v39  }
  0x3e   :  { %459 = vperm.xlu1 %5569, %v368_v41  }
  0x3f   :  { %456 = vperm.xlu0 %5568, %v367_v42  }
  0x42   :  { %465 = vperm.xlu1 %5569, %v370_v45  }
  0x43   :  { %462 = vperm.xlu0 %5568, %v369_v46  }
  0x46   :  { %471 = vperm.xlu1 %5569, %v372_v48  }
  0x47   :  { %468 = vperm.xlu0 %5568, %v371_v49  }
  0x4a   :  { %477 = vperm.xlu1 %5569, %v374_v52  }
  0x4b   :  { %474 = vperm.xlu0 %5568, %v373_v53  }
  0x4e   :  { %483 = vperm.xlu1 %5569, %v376_v55  }
  0x4f   :  { %480 = vperm.xlu0 %5568, %v375_v56  }
  0x52   :  { %44 = vperm.xlu1 %5569, %v37_v59  }
  0x53   :  { %41 = vperm.xlu0 %5568, %v36_v60  }
  0x7d   :  { %v247_v2 = vpop.permute.xlu1 %246 }
  0x7e   :  { %v147_v3 = vpop.permute.xlu0 %146  ;;  %vm251_vm2 = vcmp.eq.s32.totalorder %v5850_v1, %v247_v2 }
  0x7f   :  { %vm151_vm1 = vcmp.eq.s32.totalorder %v5850_v1, %v147_v3  ;;  %v4890_v8 = vsel %vm251_vm2, 1.0, %v5593_v4 }
  0x80   :  { %v4886_v5 = vsel %vm151_vm1, 1.0, %v5593_v4 }
  0x81   :  { %5310 = vmatprep.mubr.msk.f32.mxu1 %vm161_vm0, %v4886_v5  ;;  %v250_v6 = vpop.permute.xlu1 %249 }
  0x82   :  { %v150_v7 = vpop.permute.xlu0 %149  ;;  %vm252_vm5 = vcmp.eq.s32.totalorder %v5850_v1, %v250_v6 }
  0x83   :  { %vm152_vm3 = vcmp.eq.s32.totalorder %v5850_v1, %v150_v7  ;;  %v4891_v14 = vsel %vm252_vm5, 1.0, %v5593_v4 }
  0x84   :  { %v4887_v9 = vsel %vm152_vm3, 1.0, %v5593_v4 }
  0x85   :  { %5311 = vmatmul.mubr.msk.f32.vlgmr.msra.gmra.mxu1 %vm161_vm0, %v4887_v9  ;;  %v382_v11 = vpop.permute.xlu1 %381 }
  0x86   :  { %5314 = vmatpush3.msra.mxu1 %v5708_v17  ;;  %v379_v12 = vpop.permute.xlu0 %378  ;;  %5317 = vmatprep.mubr.msk.f32.mxu1 %vm259_vm4, %v4890_v8  ;;  %vm486_vm8 = vcmp.eq.s32.totalorder %v5850_v1, %v382_v11 }
  0x87   :  { %vm485_vm6 = vcmp.eq.s32.totalorder %v5850_v1, %v379_v12  ;;  %5315 = vmatprep.subr.mxu1 %v257_v10  ;;  %v4895_v31 = vsel %vm486_vm8, 1.0, %v5593_v4 }
  0x88   :  { %v4894_v15 = vsel %vm485_vm6, 1.0, %v5593_v4  ;;  %5316 = vmatpush3.msra.mxu1 %v257_v10 }
  0x89   :  { %5320 = vmatprep.subr.mxu1 %v600_v13  ;;  %5318 = vmatmul.mubr.msk.f32.vlgmr.msra.gmra.mxu1 %vm259_vm4, %v4891_v14  ;;  %v388_v17 = vpop.permute.xlu1 %387 }
  0x8a   :  { %5321 = vmatpush3.msra.mxu1 %v600_v13  ;;  %v385_v18 = vpop.permute.xlu0 %384  ;;  %5336 = vmatprep.mubr.msk.f32.mxu1 %vm601_vm7, %v4894_v15  ;;  %vm488_vm10 = vcmp.eq.s32.totalorder %v5850_v1, %v388_v17 }
  0x8b   :  { %5322 = vmatprep.subr.mxu1 %v599_v16  ;;  %vm487_vm9 = vcmp.eq.s32.totalorder %v5850_v1, %v385_v18  ;;  %v4897_v35 = vsel %vm488_vm10, 1.0, %v5593_v4 }
  0x8c   :  { %5323 = vmatpush3.msra.mxu1 %v599_v16  ;;  %v4896_v32 = vsel %vm487_vm9, 1.0, %v5593_v4 }
  0x8d   :  { %5324 = vmatprep.subr.mxu1 %v598_v19  ;;  %v394_v21 = vpop.permute.xlu1 %393 }
  0x8e   :  { %5325 = vmatpush3.msra.mxu1 %v598_v19  ;;  %v391_v22 = vpop.permute.xlu0 %390  ;;  %vm490_vm12 = vcmp.eq.s32.totalorder %v5850_v1, %v394_v21 }
  0x8f   :  { %5326 = vmatprep.subr.mxu1 %v597_v20  ;;  %vm489_vm11 = vcmp.eq.s32.totalorder %v5850_v1, %v391_v22  ;;  %v4899_v39 = vsel %vm490_vm12, 1.0, %v5593_v4 }
  0x90   :  { %5327 = vmatpush3.msra.mxu1 %v597_v20  ;;  %v4898_v36 = vsel %vm489_vm11, 1.0, %v5593_v4 }
  0x91   :  { %5328 = vmatprep.subr.mxu1 %v596_v23  ;;  %v400_v25 = vpop.permute.xlu1 %399 }
  0x92   :  { %5329 = vmatpush3.msra.mxu1 %v596_v23  ;;  %v397_v26 = vpop.permute.xlu0 %396  ;;  %vm492_vm14 = vcmp.eq.s32.totalorder %v5850_v1, %v400_v25 }
  0x93   :  { %5330 = vmatprep.subr.mxu1 %v595_v24  ;;  %vm491_vm13 = vcmp.eq.s32.totalorder %v5850_v1, %v397_v26  ;;  %v4901_v43 = vsel %vm492_vm14, 1.0, %v5593_v4 }
  0x94   :  { %5331 = vmatpush3.msra.mxu1 %v595_v24  ;;  %v4900_v40 = vsel %vm491_vm13, 1.0, %v5593_v4 }
  0x95   :  { %5332 = vmatprep.subr.mxu1 %v594_v27  ;;  %v406_v29 = vpop.permute.xlu1 %405 }
  0x96   :  { %5333 = vmatpush3.msra.mxu1 %v594_v27  ;;  %v403_v30 = vpop.permute.xlu0 %402  ;;  %vm494_vm1 = vcmp.eq.s32.totalorder %v5850_v1, %v406_v29  ;;  %v5594_v27 = vmov 1.0  }
  0x97   :  { %5334 = vmatprep.subr.mxu1 %v593_v28  ;;  %vm493_vm15 = vcmp.eq.s32.totalorder %v5850_v1, %v403_v30  ;;  %v4903_v47 = vsel %vm494_vm1, 1.0, %v5593_v4 }
  0x98   :  { %5335 = vmatpush3.msra.mxu1 %v593_v28  ;;  %v4902_v44 = vsel %vm493_vm15, 1.0, %v5593_v4 }
  0x99   :  { %5337 = vmatmul.mubr.msk.f32.vlgmr.msra.gmra.mxu1 %vm601_vm7, %v4895_v31  ;;  %v412_v33 = vpop.permute.xlu1 %411 }
  0x9a   :  { %5339 = vmatprep.mubr.msk.f32.mxu1 %vm601_vm7, %v4896_v32  ;;  %v409_v34 = vpop.permute.xlu0 %408  ;;  %vm496_vm3 = vcmp.eq.s32.totalorder %v5850_v1, %v412_v33 }
  0x9b   :  { %vm495_vm2 = vcmp.eq.s32.totalorder %v5850_v1, %v409_v34  ;;  %v4905_v51 = vsel %vm496_vm3, 1.0, %v5593_v4  ;;  %v1606_v34 = vld [vmem:[%s8671_s8 + $0x18] sm:$0xff] }
  0x9c   :  { %v4904_v48 = vsel %vm495_vm2, 1.0, %v5593_v4  ;;  %5390 = vmatprep.subr.mxu0 %v1606_v34 }
  0x9d   :  { %5340 = vmatmul.mubr.msk.f32.gmra.mxu1 %vm601_vm7, %v4897_v35  ;;  %v418_v37 = vpop.permute.xlu1 %417  ;;  %v1604_v35 = vld [vmem:[%s8671_s8 + $0x8] sm:$0xff] }
  0x9e   :  { %5342 = vmatprep.mubr.msk.f32.mxu1 %vm601_vm7, %v4898_v36  ;;  %v415_v38 = vpop.permute.xlu0 %414  ;;  %vm498_vm5 = vcmp.eq.s32.totalorder %v5850_v1, %v418_v37  ;;  %v1603_v36 = vld [vmem:[%s8671_s8] sm:$0xff]  ;;  %v5016_v37 = vld [vmem:[%s8671_s8 + $0x30] sm:$0xff] }
  0x9f   :  { %vm497_vm4 = vcmp.eq.s32.totalorder %v5850_v1, %v415_v38  ;;  %v4907_v55 = vsel %vm498_vm5, 1.0, %v5593_v4  ;;  %v5015_v38 = vld [vmem:[%s8671_s8 + $0x28] sm:$0xff] }
  0xa0   :  { %v4906_v52 = vsel %vm497_vm4, 1.0, %v5593_v4 }
  0xa1   :  { %5343 = vmatmul.mubr.msk.f32.gmra.mxu1 %vm601_vm7, %v4899_v39  ;;  %v424_v41 = vpop.permute.xlu1 %423  ;;  %v5014_v39 = vld [vmem:[%s8671_s8 + $0x20] sm:$0xff] }
  0xa2   :  { %5345 = vmatprep.mubr.msk.f32.mxu1 %vm601_vm7, %v4900_v40  ;;  %v421_v42 = vpop.permute.xlu0 %420  ;;  %vm500_vm8 = vcmp.eq.s32.totalorder %v5850_v1, %v424_v41  ;;  %v6029_v40 = vld [vmem:[%s8671_s8 + $0x58] sm:$0xff] }
  0xa3   :  { %vm499_vm6 = vcmp.eq.s32.totalorder %v5850_v1, %v421_v42  ;;  %v4909_v59 = vsel %vm500_vm8, 1.0, %v5593_v4 }
  0xa4   :  { %v4908_v56 = vsel %vm499_vm6, 1.0, %v5593_v4 }
  0xa5   :  { %5346 = vmatmul.mubr.msk.f32.gmra.mxu1 %vm601_vm7, %v4901_v43  ;;  %v430_v45 = vpop.permute.xlu1 %429  ;;  %v5596_v43 = vmov 1983009808  }
  0xa6   :  { %5348 = vmatprep.mubr.msk.f32.mxu1 %vm601_vm7, %v4902_v44  ;;  %v427_v46 = vpop.permute.xlu0 %426  ;;  %vm502_vm10 = vcmp.eq.s32.totalorder %v5850_v1, %v430_v45  ;;  %v993_v44 = vunpack.c.l.s4 %v5596_v43 }
  0xa7   :  { %vm501_vm9 = vcmp.eq.s32.totalorder %v5850_v1, %v427_v46  ;;  %v4911_v63 = vsel %vm502_vm10, 1.0, %v5593_v4  ;;  %v996_v46 = vshrl.u32 %v38_v0, 7 }
  0xa8   :  { %v4910_v60 = vsel %vm501_vm9, 1.0, %v5593_v4  ;;  %v994_v45 = vunpack.c.0.s8 %v993_v44 }
  0xa9   :  { %5349 = vmatmul.mubr.msk.f32.gmra.mxu1 %vm601_vm7, %v4903_v47  ;;  %v436_v49 = vpop.permute.xlu1 %435 }
  0xaa   :  { %5351 = vmatprep.mubr.msk.f32.mxu1 %vm601_vm7, %v4904_v48  ;;  %v433_v50 = vpop.permute.xlu0 %432  ;;  %vm504_vm12 = vcmp.eq.s32.totalorder %v5850_v1, %v436_v49  ;;  %v6035_v48 = vsub.s32 %v994_v45, %v996_v46 }
  0xab   :  { %vm503_vm11 = vcmp.eq.s32.totalorder %v5850_v1, %v433_v50  ;;  %v4913_v6 = vsel %vm504_vm12, 1.0, %v5593_v4 }
  0xac   :  { %v4912_v2 = vsel %vm503_vm11, 1.0, %v5593_v4 }
  0xad   :  { %5352 = vmatmul.mubr.msk.f32.gmra.mxu1 %vm601_vm7, %v4905_v51  ;;  %v442_v53 = vpop.permute.xlu1 %441 }
  0xae   :  { %5354 = vmatprep.mubr.msk.f32.mxu1 %vm601_vm7, %v4906_v52  ;;  %v439_v54 = vpop.permute.xlu0 %438  ;;  %vm506_vm14 = vcmp.eq.s32.totalorder %v5850_v1, %v442_v53 }
  0xaf   :  { %vm505_vm13 = vcmp.eq.s32.totalorder %v5850_v1, %v439_v54  ;;  %v4915_v10 = vsel %vm506_vm14, 1.0, %v5593_v4 }
  0xb0   :  { %v4914_v7 = vsel %vm505_vm13, 1.0, %v5593_v4 }
  0xb1   :  { %5355 = vmatmul.mubr.msk.f32.gmra.mxu1 %vm601_vm7, %v4907_v55  ;;  %v448_v57 = vpop.permute.xlu1 %447 }
  0xb2   :  { %5357 = vmatprep.mubr.msk.f32.mxu1 %vm601_vm7, %v4908_v56  ;;  %v445_v58 = vpop.permute.xlu0 %444  ;;  %vm508_vm1 = vcmp.eq.s32.totalorder %v5850_v1, %v448_v57 }
  0xb3   :  { %vm507_vm15 = vcmp.eq.s32.totalorder %v5850_v1, %v445_v58  ;;  %v4917_v14 = vsel %vm508_vm1, 1.0, %v5593_v4 }
  0xb4   :  { %v4916_v11 = vsel %vm507_vm15, 1.0, %v5593_v4 }
  0xb5   :  { %5358 = vmatmul.mubr.msk.f32.gmra.mxu1 %vm601_vm7, %v4909_v59  ;;  %v454_v61 = vpop.permute.xlu1 %453 }
  0xb6   :  { %5360 = vmatprep.mubr.msk.f32.mxu1 %vm601_vm7, %v4910_v60  ;;  %v451_v62 = vpop.permute.xlu0 %450  ;;  %vm510_vm3 = vcmp.eq.s32.totalorder %v5850_v1, %v454_v61 }
  0xb7   :  { %vm509_vm2 = vcmp.eq.s32.totalorder %v5850_v1, %v451_v62  ;;  %v4919_v18 = vsel %vm510_vm3, 1.0, %v5593_v4  ;;  %vm2473_vm3 = vcmask 1042434  }
  0xb8   :  { %v4918_v15 = vsel %vm509_vm2, 1.0, %v5593_v4  ;;  %vm2472_vm2 = vcmask 1040384  }
  0xb9   :  { %5361 = vmatmul.mubr.msk.f32.gmra.mxu1 %vm601_vm7, %v4911_v63  ;;  %v460_v3 = vpop.permute.xlu1 %459 }
  0xba   :  { %5363 = vmatprep.mubr.msk.f32.mxu1 %vm601_vm7, %v4912_v2  ;;  %v457_v5 = vpop.permute.xlu0 %456  ;;  %vm512_vm5 = vcmp.eq.s32.totalorder %v5850_v1, %v460_v3 }
  0xbb   :  { %vm511_vm4 = vcmp.eq.s32.totalorder %v5850_v1, %v457_v5  ;;  %v4921_v22 = vsel %vm512_vm5, 1.0, %v5593_v4  ;;  %vm2475_vm5 = vcmask 1044484  }
  0xbc   :  { %v4920_v19 = vsel %vm511_vm4, 1.0, %v5593_v4  ;;  %vm2474_vm4 = vmor %vm2472_vm2, %vm2473_vm3 }
  0xbd   :  { %5364 = vmatmul.mubr.msk.f32.gmra.mxu1 %vm601_vm7, %v4913_v6  ;;  %v466_v8 = vpop.permute.xlu1 %465 }
  0xbe   :  { %5366 = vmatprep.mubr.msk.f32.mxu1 %vm601_vm7, %v4914_v7  ;;  %v463_v9 = vpop.permute.xlu0 %462  ;;  %vm514_vm8 = vcmp.eq.s32.totalorder %v5850_v1, %v466_v8 }
  0xbf   :  { %vm513_vm6 = vcmp.eq.s32.totalorder %v5850_v1, %v463_v9  ;;  %v4923_v26 = vsel %vm514_vm8, 1.0, %v5593_v4  ;;  %vm2477_vm8 = vcmask 1046534  }
  0xc0   :  { %v4922_v23 = vsel %vm513_vm6, 1.0, %v5593_v4  ;;  %vm2476_vm6 = vmor %vm2474_vm4, %vm2475_vm5 }
  0xc1   :  { %5367 = vmatmul.mubr.msk.f32.gmra.mxu1 %vm601_vm7, %v4915_v10  ;;  %v472_v12 = vpop.permute.xlu1 %471 }
  0xc2   :  { %5369 = vmatprep.mubr.msk.f32.mxu1 %vm601_vm7, %v4916_v11  ;;  %v469_v13 = vpop.permute.xlu0 %468  ;;  %vm516_vm12 = vcmp.eq.s32.totalorder %v5850_v1, %v472_v12 }
  0xc3   :  { %vm515_vm9 = vcmp.eq.s32.totalorder %v5850_v1, %v469_v13  ;;  %v4925_v29 = vsel %vm516_vm12, 1.0, %v5593_v4  ;;  %vm4813_vm12 = vcmask 1045509  }
  0xc4   :  { %v4924_v28 = vsel %vm515_vm9, 1.0, %v5593_v4  ;;  %vm6053_vm9 = vmor %vm2476_vm6, %vm2477_vm8 }
  0xc5   :  { %5370 = vmatmul.mubr.msk.f32.gmra.mxu1 %vm601_vm7, %v4917_v14  ;;  %v478_v16 = vpop.permute.xlu1 %477 }
  0xc6   :  { %5372 = vmatprep.mubr.msk.f32.mxu1 %vm601_vm7, %v4918_v15  ;;  %v475_v17 = vpop.permute.xlu0 %474  ;;  %vm518_vm14 = vcmp.eq.s32.totalorder %v5850_v1, %v478_v16 }
  0xc7   :  { %vm517_vm13 = vcmp.eq.s32.totalorder %v5850_v1, %v475_v17  ;;  %v4927_v31 = vsel %vm518_vm14, 1.0, %v5593_v4  ;;  %vm4861_vm14 = vcmask 916480  }
  0xc8   :  { %v4926_v30 = vsel %vm517_vm13, 1.0, %v5593_v4  ;;  %vm4818_vm13 = vcmask 1047559  }
  0xc9   :  { %5373 = vmatmul.mubr.msk.f32.gmra.mxu1 %vm601_vm7, %v4919_v18  ;;  %v484_v20 = vpop.permute.xlu1 %483 }
  0xca   :  { %5375 = vmatprep.mubr.msk.f32.mxu1 %vm601_vm7, %v4920_v19  ;;  %v481_v21 = vpop.permute.xlu0 %480  ;;  %vm520_vm1 = vcmp.eq.s32.totalorder %v5850_v1, %v484_v20 }
  0xcb   :  { %vm519_vm15 = vcmp.eq.s32.totalorder %v5850_v1, %v481_v21  ;;  %v4929_v33 = vsel %vm520_vm1, 1.0, %v5593_v4 }
  0xcc   :  { %v4928_v32 = vsel %vm519_vm15, 1.0, %v5593_v4  ;;  %v5017_v4 = vld [vmem:[%s8671_s8 + $0x38] sm:$0xff] }
  0xcd   :  { %5376 = vmatmul.mubr.msk.f32.gmra.mxu1 %vm601_vm7, %v4921_v22  ;;  %v45_v24 = vpop.permute.xlu1 %44  ;;  %5446 = vmatprep.subr.mxu1 %v5017_v4 }
  0xce   :  { %5378 = vmatprep.mubr.msk.f32.mxu1 %vm601_vm7, %v4922_v23  ;;  %v42_v25 = vpop.permute.xlu0 %41  ;;  %vm47_vm10 = vcmp.eq.s32.totalorder %v5850_v1, %v45_v24  ;;  %5447 = vmatpush3.msra.mxu1 %v5017_v4 }
  0xcf   :  { %vm46_vm11 = vcmp.eq.s32.totalorder %v5850_v1, %v42_v25  ;;  %v1605_v1 = vld [vmem:[%s8671_s8 + $0x10] sm:$0xff]  ;;  %5448 = vmatprep.subr.mxu1 %v5016_v37 }
  0xd0   :  { %5299 = vmatprep.mubr.msk.f32.mxu0 %vm46_vm11, %v5594_v27  ;;  %5449 = vmatpush3.msra.mxu1 %v5016_v37  ;;  %vm4808_vm11 = vcmask 1043459  }
  0xd1   :  { %5379 = vmatmul.mubr.msk.f32.gmra.mxu1 %vm601_vm7, %v4923_v26  ;;  %5300 = vmatmul.mubr.msk.f32.vlgmr.msra.gmra.mxu0 %vm47_vm10, %v5594_v27  ;;  %vm4803_vm10 = vcmask 1041409  }
  0xd2   :  { %5381 = vmatprep.mubr.msk.f32.mxu1 %vm601_vm7, %v4924_v28  ;;  %5391 = vmatpush3.msra.mxu0 %v1606_v34 }
  0xd3   :  { %5392 = vmatprep.subr.mxu0 %v1605_v1  ;;  %5450 = vmatprep.subr.mxu1 %v5015_v38 }
  0xd4   :  { %5393 = vmatpush3.msra.mxu0 %v1605_v1  ;;  %5451 = vmatpush3.msra.mxu1 %v5015_v38 }
  0xd5   :  { %5382 = vmatmul.mubr.msk.f32.gmra.mxu1 %vm601_vm7, %v4925_v29  ;;  %5394 = vmatprep.subr.mxu0 %v1604_v35 }
  0xd6   :  { %5384 = vmatprep.mubr.msk.f32.mxu1 %vm601_vm7, %v4926_v30  ;;  %5395 = vmatpush3.msra.mxu0 %v1604_v35 }
  0xd7   :  { %5396 = vmatprep.subr.mxu0 %v1603_v36  ;;  %5452 = vmatprep.subr.mxu1 %v5014_v39 }
  0xd8   :  { %5397 = vmatpush3.msra.mxu0 %v1603_v36  ;;  %5453 = vmatpush3.msra.mxu1 %v5014_v39 }
  0xd9   :  { %5385 = vmatmul.mubr.msk.f32.gmra.mxu1 %vm601_vm7, %v4927_v31  ;;  %5502 = vmatprep.subr.mxu0 %v6029_v40 }
  0xda   :  { %5387 = vmatprep.mubr.msk.f32.mxu1 %vm601_vm7, %v4928_v32 }
  0xdd   :  { %5388 = vmatmul.mubr.msk.f32.gmra.mxu1 %vm601_vm7, %v4929_v33 }
 0x145   :  { %v5312_v41 = vpop.f32.mrf.mxu1 }
 0x146   :  { %4844 = vrot.lane.b32.xlu1 %v5312_v41, %s5595_s5 }
 0x147   :  { %v234_v42 = vpop.f32.mrf.mxu1 }
 0x148   :  { %4842 = vrot.lane.b32.xlu0 %v234_v42, %s5595_s5 }
 0x149   :  { %v6033_v47 = vpop.f32.mrf.mxu1 }
 0x14a   :  { %8851 = vst [vmem:[#allocation5_spill] sm:$0xff] %v6033_v47 }
 0x14b   :  { %v6037_v49 = vpop.f32.mrf.mxu1 }
 0x14c   :  { %8852 = vst [vmem:[#allocation6_spill] sm:$0xff] %v6037_v49 }
 0x159   :  { %v5338_v50 = vpop.f32.mrf.mxu1 }
 0x15a   :  { %v1008_v51 = vcombine.high %v5338_v50, %v5338_v50  ;;  %v6041_v52 = vrot.slane %v5338_v50, %v6035_v48 }
 0x15b   :  { %v776_v0 = vpop.f32.mrf.mxu1 }
 0x15c   :  { %8853 = vst [vmem:[#allocation7_spill] sm:$0xff] %v6041_v52  ;;  %v6045_v53 = vrot.slane %v1008_v51, %v6035_v48  ;;  %v6049_v54 = vcombine.high %v6041_v52, %v6041_v52  ;;  %v8683_v55 = vrot.slane %v6041_v52, 7  ;;  %v991_v56 = vcombine.high %v776_v0, %v776_v0 }
 0x15d   :  { %v998_v58 = vrot.slane %v776_v0, %v6035_v48  ;;  %v5341_v59 = vpop.f32.mrf.mxu1 }
 0x15e   :  { %v1624_v60 = vcombine.low %v6041_v52, %v6049_v54  ;;  %v2492_v61 = vrot.slane %v8683_v55, 2  ;;  %v2493_v62 = vrot.slane %v6049_v54, 7  ;;  %v2496_v63 = vrot.slane %v6045_v53, 7 }
 0x15f   :  { %v3771_v2 = vcombine.low %v6049_v54, %v6045_v53  ;;  %v6067_v3 = vrot.slane %v991_v56, %v6035_v48  ;;  %v6069_v5 = vcombine.high %v998_v58, %v998_v58  ;;  %v4998_v9 = vrot.slane %v998_v58, 9  ;;  %v786_v14 = vpop.f32.mrf.mxu1 }
 0x160   :  { %v6072_v6 = vrot.slane %v1624_v60, %v6035_v48  ;;  %v2494_v7 = vsel %vm6053_vm9, %v2492_v61, %v2493_v62  ;;  %v2495_v8 = vrot.slane %v2493_v62, 2  ;;  %v2498_v10 = vrot.slane %v2496_v63, 2 }
 0x161   :  { %8856 = vst [vmem:[#allocation8_spill] sm:$0xff] %v6067_v3  ;;  %8857 = vst [vmem:[#allocation9_spill] sm:$0xff] %v6069_v5  ;;  %v1607_v11 = vcombine.low %v998_v58, %v6069_v5  ;;  %v2481_v12 = vrot.slane %v6069_v5, 7  ;;  %v8684_v13 = vrot.slane %v6067_v3, 7  ;;  %v1042_v17 = vcombine.high %v5341_v59, %v5341_v59  ;;  %v5344_v31 = vpop.f32.mrf.mxu1 }
 0x162   :  { %v2497_v15 = vsel %vm6053_vm9, %v2495_v8, %v2496_v63  ;;  %v6084_v18 = vrot.slane %v5341_v59, %v6035_v48  ;;  %v6088_v20 = vcombine.high %v6067_v3, %v6067_v3  ;;  %v6113_v28 = vcombine.high %v6045_v53, %v6045_v53 }
 0x163   :  { %v2901_v19 = vcombine.low %v2494_v7, %v2497_v15  ;;  %v6091_v21 = vrot.slane %v1607_v11, %v6035_v48  ;;  %v6095_v22 = vsel %vm6053_vm9, %v4998_v9, %v2481_v12  ;;  %v6097_v23 = vrot.slane %v2481_v12, 2  ;;  %v796_v50 = vpop.f32.mrf.mxu1 }
 0x164   :  { %8858 = vst [vmem:[#allocation10_spill] sm:$0xff] %v6084_v18  ;;  %8859 = vst [vmem:[#allocation11_spill] sm:$0xff] %v6088_v20  ;;  %v6101_v24 = vrot.slane %v8684_v13, 2  ;;  %v6104_v25 = vrot.slane %v1042_v17, %v6035_v48  ;;  %v6108_v26 = vcombine.high %v6084_v18, %v6084_v18  ;;  %v8677_v27 = vrot.slane %v6084_v18, 7 }
 0x165   :  { %v1025_v29 = vcombine.high %v786_v14, %v786_v14  ;;  %v1032_v30 = vrot.slane %v786_v14, %v6035_v48  ;;  %v2499_v42 = vrot.slane %v6113_v28, 7  ;;  %v6158_v59 = vrot.slane %v2901_v19, %v6035_v48  ;;  %v5347_v14 = vpop.f32.mrf.mxu1 }
 0x166   :  { %8860 = vst [vmem:[#allocation12_spill] sm:$0xff] %v6104_v25  ;;  %8861 = vst [vmem:[#allocation13_spill] sm:$0xff] %v6108_v26  ;;  %v6118_v32 = vcombine.high %v6104_v25, %v6104_v25  ;;  %v8679_v33 = vrot.slane %v6108_v26, 7  ;;  %v8676_v34 = vrot.slane %v6104_v25, 7  ;;  %v6127_v4 = vrot.slane %v8677_v27, 2 }
 0x167   :  { %v6130_v36 = vrot.slane %v1025_v29, %v6035_v48  ;;  %v6132_v37 = vcombine.high %v1032_v30, %v1032_v30  ;;  %v2502_v46 = vrot.slane %v1032_v30, 7  ;;  %v2500_v51 = vsel %vm6053_vm9, %v2498_v10, %v2499_v42 }
 0x168   :  { %8862 = vst [vmem:[#allocation14_spill] sm:$0xff] %v6118_v32  ;;  %v6136_v38 = vrot.slane %v8679_v33, 2  ;;  %v6140_v39 = vrot.slane %v8676_v34, 2  ;;  %v2501_v0 = vrot.slane %v2499_v42, 2  ;;  %v3772_v60 = vcombine.low %v6113_v28, %v1032_v30 }
 0x169   :  { %8863 = vst [vmem:[#allocation15_spill] sm:$0xff] %v6130_v36  ;;  %v6148_v44 = vcombine.high %v6130_v36, %v6130_v36  ;;  %v8680_v56 = vrot.slane %v6130_v36, 7  ;;  %v1076_v61 = vcombine.high %v5344_v31, %v5344_v31  ;;  %v6164_v63 = vrot.slane %v3771_v2, %v6035_v48 }
 0x16a   :  { %v2503_v62 = vsel %vm6053_vm9, %v2501_v0, %v2502_v46  ;;  %v6167_v7 = vrot.slane %v5344_v31, %v6035_v48  ;;  %v1059_v8 = vcombine.high %v796_v50, %v796_v50  ;;  %v6170_v10 = vrot.slane %v3772_v60, %v6035_v48 }
 0x16b   :  { %8864 = vst [vmem:[#allocation16_spill] sm:$0xff] %v6148_v44  ;;  %8865 = vst [vmem:[#allocation17_spill] sm:$0xff] %v6164_v63  ;;  %v2902_v9 = vcombine.low %v2500_v51, %v2503_v62  ;;  %v6173_v11 = vrot.slane %v1076_v61, %v6035_v48  ;;  %v6176_v12 = vrot.slane %v796_v50, %v6035_v48  ;;  %v6180_v15 = vrot.slane %v8680_v56, 2 }
 0x16c   :  { %8866 = vst [vmem:[#allocation18_spill] sm:$0xff] %v6167_v7  ;;  %8867 = vst [vmem:[#allocation19_spill] sm:$0xff] %v6170_v10  ;;  %v6184_v2 = vcombine.high %v6167_v7, %v6167_v7  ;;  %v8674_v17 = vrot.slane %v6167_v7, 7  ;;  %v6188_v19 = vrot.slane %v1059_v8, %v6035_v48  ;;  %v1110_v0 = vcombine.high %v5347_v14, %v5347_v14 }
 0x16d   :  { %8868 = vst [vmem:[#allocation20_spill] sm:$0xff] %v6173_v11  ;;  %8869 = vst [vmem:[#allocation21_spill] sm:$0xff] %v6176_v12  ;;  %v6191_v29 = vrot.slane %v2902_v9, %v6035_v48  ;;  %v6197_v31 = vcombine.high %v6173_v11, %v6173_v11  ;;  %v8675_v42 = vrot.slane %v6173_v11, 7  ;;  %v6205_v51 = vcombine.high %v6176_v12, %v6176_v12  ;;  %v806_v9 = vpop.f32.mrf.mxu1 }
 0x16e   :  { %8870 = vst [vmem:[#allocation22_spill] sm:$0xff] %v6184_v2  ;;  %v8678_v50 = vrot.slane %v6184_v2, 7  ;;  %v6211_v61 = vrot.slane %v8674_v17, 2  ;;  %v6219_v8 = vcombine.high %v6188_v19, %v6188_v19  ;;  %v8681_v17 = vrot.slane %v6176_v12, 7 }
 0x16f   :  { %8871 = vst [vmem:[#allocation23_spill] sm:$0xff] %v6197_v31  ;;  %8872 = vst [vmem:[#allocation24_spill] sm:$0xff] %v6205_v51  ;;  %v6215_v62 = vrot.slane %v8675_v42, 2  ;;  %v6237_v33 = vrot.slane %v5347_v14, %v6035_v48  ;;  %v6240_v1 = vrot.slane %v1110_v0, %v6035_v48  ;;  %v1093_v58 = vcombine.high %v806_v9, %v806_v9  ;;  %v5350_v14 = vpop.f32.mrf.mxu1 }
 0x170   :  { %8873 = vst [vmem:[#allocation25_spill] sm:$0xff] %v6219_v8  ;;  %v6223_v30 = vrot.slane %v8678_v50, 2  ;;  %v8682_v34 = vrot.slane %v6219_v8, 7  ;;  %v6244_v54 = vrot.slane %v8681_v17, 2  ;;  %v6251_v56 = vrot.slane %v806_v9, %v6035_v48 }
 0x171   :  { %8874 = vst [vmem:[#allocation26_spill] sm:$0xff] %v6237_v33  ;;  %8875 = vst [vmem:[#allocation27_spill] sm:$0xff] %v6240_v1  ;;  %v1608_v27 = vcombine.low %v6067_v3, %v6088_v20  ;;  %v6257_v0 = vcombine.high %v6237_v33, %v6237_v33  ;;  %v6261_v50 = vcombine.high %v6240_v1, %v6240_v1  ;;  %v8685_v17 = vrot.slane %v6237_v33, 7 }
 0x172   :  { %v6248_v43 = vrot.slane %v8682_v34, 2  ;;  %8876 = vst [vmem:[#allocation28_spill] sm:$0xff] %v6251_v56  ;;  %v8686_v34 = vrot.slane %v6240_v1, 7  ;;  %v6266_v60 = vrot.slane %v1093_v58, %v6035_v48  ;;  %v6270_v9 = vcombine.high %v6251_v56, %v6251_v56 }
 0x173   :  { %8877 = vst [vmem:[#allocation29_spill] sm:$0xff] %v6257_v0  ;;  %8878 = vst [vmem:[#allocation30_spill] sm:$0xff] %v6261_v50  ;;  %v6277_v55 = vrot.slane %v8685_v17, 2  ;;  %v8689_v35 = vrot.slane %v6257_v0, 7  ;;  %v1144_v58 = vcombine.high %v5350_v14, %v5350_v14  ;;  %v816_v17 = vpop.f32.mrf.mxu1  ;;  %v1622_v42 = vrot.slane %v1608_v27, %v6035_v48 }
 0x174   :  { %8879 = vst [vmem:[#allocation31_spill] sm:$0xff] %v6266_v60  ;;  %8880 = vst [vmem:[#allocation32_spill] sm:$0xff] %v6270_v9  ;;  %v6282_v13 = vrot.slane %v8686_v34, 2  ;;  %v6289_v41 = vcombine.high %v6266_v60, %v6266_v60  ;;  %v8884_v34 = vrot.slane %v6251_v56, 7  ;;  %v1151_v63 = vrot.slane %v5350_v14, %v6035_v48 }
 0x175   :  { %8881 = vst [vmem:[#allocation33_spill] sm:$0xff] %v6277_v55  ;;  %v6295_v46 = vrot.slane %v8689_v35, 2  ;;  %v6311_v5 = vrot.slane %v1144_v58, %v6035_v48  ;;  %v1127_v45 = vcombine.high %v816_v17, %v816_v17  ;;  %v6321_v27 = vrot.slane %v816_v17, %v6035_v48  ;;  %v5353_v17 = vpop.f32.mrf.mxu1 }
 0x176   :  { %8882 = vst [vmem:[#allocation34_spill] sm:$0xff] %v6282_v13  ;;  %v6299_v47 = vrot.slane %v8884_v34, 2  ;;  %v8886_v34 = vcombine.low %v6045_v53, %v6113_v28  ;;  %v1623_v13 = vcombine.low %v6091_v21, %v1622_v42  ;;  %v6318_v49 = vcombine.high %v1151_v63, %v1151_v63 }
 0x177   :  { %8883 = vst [vmem:[#allocation35_spill] sm:$0xff] %v6295_v46  ;;  %8885 = vst [vmem:[#allocation36_spill] sm:$0xff] %v6311_v5  ;;  %v5002_v10 = vrot.slane %v1151_v63, 9  ;;  %v6325_v14 = vcombine.high %v6311_v5, %v6311_v5  ;;  %v8692_v58 = vrot.slane %v6311_v5, 7  ;;  %v6330_v53 = vrot.slane %v1127_v45, %v6035_v48 }
 0x178   :  { %v1639_v16 = vrot.slane %v8886_v34, %v6035_v48  ;;  %8887 = vst [vmem:[#allocation37_spill] sm:$0xff] %v6318_v49  ;;  %8888 = vst [vmem:[#allocation38_spill] sm:$0xff] %v6321_v27  ;;  %5398 = vmatprep.mubr.msk.f32.mxu0 %vm161_vm0, %v1623_v13  ;;  %v1743_v21 = vcombine.low %v1151_v63, %v6318_v49  ;;  %v2581_v28 = vrot.slane %v6318_v49, 7 }
 0x179   :  { %8889 = vst [vmem:[#allocation39_spill] sm:$0xff] %v6325_v14  ;;  %8890 = vst [vmem:[#allocation40_spill] sm:$0xff] %v6330_v53  ;;  %v6339_v42 = vcombine.high %v6321_v27, %v6321_v27  ;;  %v6350_v13 = vrot.slane %v8692_v58, 2  ;;  %v6356_v34 = vcombine.high %v6330_v53, %v6330_v53  ;;  %v1178_v55 = vcombine.high %v5353_v17, %v5353_v17 }
 0x17a   :  { %v1640_v35 = vcombine.low %v6072_v6, %v1639_v16  ;;  %v5052_v6 = vld [vmem:[%s8671_s8 + $0x50] sm:$0xff]  ;;  %v8892_v16 = vrot.slane %v6270_v9, 7  ;;  %v6359_v49 = vrot.slane %v1743_v21, %v6035_v48  ;;  %v6372_v63 = vrot.slane %v2581_v28, 2 }
 0x17b   :  { %8891 = vst [vmem:[#allocation41_spill] sm:$0xff] %v6339_v42  ;;  %8894 = vst [vmem:[#allocation43_spill] sm:$0xff] %v6350_v13  ;;  %v8693_v13 = vrot.slane %v6321_v27, 7  ;;  %v8696_v21 = vrot.slane %v6339_v42, 7 }
 0x17c   :  { %v6346_v45 = vrot.slane %v8892_v16, 2  ;;  %5399 = vmatmul.mubr.msk.f32.vlgmr.msra.gmra.mxu0 %vm161_vm0, %v1640_v35  ;;  %8895 = vst [vmem:[#allocation44_spill] sm:$0xff] %v6356_v34  ;;  %8896 = vst [vmem:[#allocation45_spill] sm:$0xff] %v6359_v49  ;;  %v6363_v16 = vsel %vm6053_vm9, %v5002_v10, %v2581_v28  ;;  %v5051_v35 = vld [vmem:[%s8671_s8 + $0x48] sm:$0xff]  ;;  %v8901_v10 = vcombine.low %v6132_v37, %v6130_v36  ;;  %v8907_v49 = vrot.slane %v6088_v20, 7 }
 0x17d   :  { %8897 = vst [vmem:[#allocation46_spill] sm:$0xff] %v6363_v16  ;;  %5503 = vmatpush3.msra.mxu0 %v6029_v40  ;;  %8898 = vst [vmem:[#allocation47_spill] sm:$0xff] %v6372_v63  ;;  %v6380_v58 = vrot.slane %v8693_v13, 2  ;;  %v1642_v16 = vcombine.low %v6148_v44, %v6084_v18  ;;  %v6387_v28 = vrot.slane %v8696_v21, 2  ;;  %v6394_v63 = vrot.slane %v5353_v17, %v6035_v48  ;;  %v826_v13 = vpop.f32.mrf.mxu1 }
 0x17e   :  { %8893 = vst [vmem:[#allocation42_spill] sm:$0xff] %v6346_v45  ;;  %5504 = vmatprep.subr.mxu0 %v5052_v6  ;;  %v1649_v46 = vrot.slane %v8901_v10, %v6035_v48  ;;  %v1658_v40 = vcombine.low %v6108_v26, %v6104_v25  ;;  %v8904_v21 = vcombine.low %v6118_v32, %v6176_v12  ;;  %v8905_v10 = vrot.slane %v6067_v3, 7 }
 0x17f   :  { %8899 = vst [vmem:[#allocation48_spill] sm:$0xff] %v6380_v58  ;;  %5505 = vmatpush3.msra.mxu0 %v5052_v6  ;;  %8900 = vst [vmem:[#allocation49_spill] sm:$0xff] %v6387_v28  ;;  %v1656_v34 = vrot.slane %v1642_v16, %v6035_v48  ;;  %v6400_v6 = vrot.slane %v1178_v55, %v6035_v48  ;;  %v8906_v58 = vrot.slane %v6330_v53, 7 }
 0x180   :  { %8902 = vst [vmem:[#allocation50_spill] sm:$0xff] %v6394_v63  ;;  %5506 = vmatprep.subr.mxu0 %v5051_v35  ;;  %v1673_v28 = vrot.slane %v8904_v21, %v6035_v48  ;;  %v2485_v17 = vsel %vm6053_vm9, %v6097_v23, %v8905_v10  ;;  %v6417_v55 = vcombine.high %v6394_v63, %v6394_v63 }
 0x181   :  { %8903 = vst [vmem:[#allocation51_spill] sm:$0xff] %v6400_v6  ;;  %5507 = vmatpush3.msra.mxu0 %v5051_v35  ;;  %v6413_v45 = vrot.slane %v8906_v58, 2  ;;  %v1666_v60 = vrot.slane %v1658_v40, %v6035_v48  ;;  %v1657_v21 = vcombine.low %v1649_v46, %v1656_v34  ;;  %v2488_v23 = vsel %vm6053_vm9, %v6101_v24, %v8907_v49  ;;  %v5356_v34 = vpop.f32.mrf.mxu1 }
 0x182   :  { %v8908_v58 = vmov %v8907_v49  ;;  %v6431_v10 = vcombine.high %v6400_v6, %v6400_v6  ;;  %v2884_v46 = vcombine.low %v6095_v22, %v2485_v17  ;;  %v8910_v49 = vrot.slane %v6400_v6, 7 }
 0x183   :  { %v2489_v35 = vrot.slane %v8908_v58, 2  ;;  %v1674_v40 = vcombine.low %v1666_v60, %v1673_v28  ;;  %5401 = vmatprep.mubr.msk.f32.mxu0 %vm161_vm0, %v1657_v21  ;;  %v8912_v58 = vrot.slane %v6041_v52, 7  ;;  %v1161_v63 = vcombine.high %v826_v13, %v826_v13 }
 0x184   :  { %8909 = vst [vmem:[#allocation52_spill] sm:$0xff] %v6431_v10  ;;  %v6440_v24 = vrot.slane %v8910_v49, 2  ;;  %v2892_v22 = vrot.slane %v2884_v46, %v6035_v48  ;;  %v6449_v28 = vrot.slane %v826_v13, %v6035_v48  ;;  %v8914_v17 = vcombine.low %v6188_v19, %v6219_v8 }
 0x185   :  { %v2491_v20 = vsel %vm6053_vm9, %v2489_v35, %v8912_v58  ;;  %5402 = vmatmul.mubr.msk.f32.gmra.mxu0 %vm161_vm0, %v1674_v40  ;;  %v6456_v49 = vrot.slane %v1161_v63, %v6035_v48  ;;  %v8916_v35 = vcombine.low %v6167_v7, %v6184_v2  ;;  %v1212_v40 = vcombine.high %v5356_v34, %v5356_v34 }
 0x186   :  { %8911 = vst [vmem:[#allocation53_spill] sm:$0xff] %v6440_v24  ;;  %v2885_v60 = vcombine.low %v2488_v23, %v2491_v20  ;;  %8913 = vst [vmem:[#allocation54_spill] sm:$0xff] %v6449_v28  ;;  %v1683_v21 = vrot.slane %v8914_v17, %v6035_v48  ;;  %v6463_v20 = vrot.slane %v5356_v34, %v6035_v48  ;;  %v8920_v63 = vrot.slane %v6449_v28, 7 }
 0x187   :  { %8915 = vst [vmem:[#allocation55_spill] sm:$0xff] %v6456_v49  ;;  %v1690_v58 = vrot.slane %v8916_v35, %v6035_v48  ;;  %v6468_v23 = vcombine.high %v6449_v28, %v6449_v28  ;;  %v6475_v17 = vcombine.high %v6456_v49, %v6456_v49  ;;  %v8706_v35 = vrot.slane %v6456_v49, 7 }
 0x188   :  { %8917 = vst [vmem:[#allocation56_spill] sm:$0xff] %v6463_v20  ;;  %v2899_v13 = vrot.slane %v2885_v60, %v6035_v48  ;;  %v6479_v34 = vrot.slane %v1212_v40, %v6035_v48  ;;  %v6487_v24 = vrot.slane %v8920_v63, 2  ;;  %v8923_v63 = vcombine.low %v6158_v59, %v6191_v29 }
 0x189   :  { %8918 = vst [vmem:[#allocation57_spill] sm:$0xff] %v6468_v23  ;;  %8919 = vst [vmem:[#allocation58_spill] sm:$0xff] %v6475_v17  ;;  %v1691_v3 = vcombine.low %v1683_v21, %v1690_v58  ;;  %v8707_v46 = vrot.slane %v6468_v23, 7  ;;  %v6491_v6 = vrot.slane %v8706_v35, 2  ;;  %v6496_v21 = vcombine.high %v6463_v20, %v6463_v20 }
 0x18a   :  { %v2900_v16 = vcombine.low %v2892_v22, %v2899_v13  ;;  %v6500_v22 = vcombine.high %v6479_v34, %v6479_v34  ;;  %v8708_v13 = vrot.slane %v6463_v20, 7  ;;  %v8925_v40 = vrot.slane %v6132_v37, 9 }
 0x18b   :  { %5404 = vmatprep.mubr.msk.f32.mxu0 %vm161_vm0, %v1691_v3  ;;  %8921 = vst [vmem:[#allocation59_spill] sm:$0xff] %v6496_v21  ;;  %v6505_v58 = vrot.slane %v8707_v46, 2  ;;  %v8924_v46 = vrot.slane %v6130_v36, 7  ;;  %v8928_v37 = vrot.slane %v6108_v26, 7  ;;  %v8929_v52 = vcombine.low %v6251_v56, %v6270_v9  ;;  %v836_v36 = vpop.f32.mrf.mxu1 }
 0x18c   :  { %8922 = vst [vmem:[#allocation60_spill] sm:$0xff] %v6500_v22  ;;  %5454 = vmatprep.mubr.msk.f32.mxu1 %vm161_vm0, %v2900_v16  ;;  %v6527_v59 = vrot.slane %v8708_v13, 2  ;;  %v1692_v13 = vcombine.low %v6173_v11, %v6197_v31 }
 0x18d   :  { %5455 = vmatmul.mubr.msk.f32.vlgmr.msra.gmra.mxu1 %vm161_vm0, %v8923_v63  ;;  %v2507_v3 = vsel %vm6053_vm9, %v8925_v40, %v8924_v46  ;;  %v8926_v63 = vrot.slane %v6148_v44, 7  ;;  %v2516_v46 = vsel %vm6053_vm9, %v6127_v4, %v8928_v37  ;;  %v1707_v29 = vrot.slane %v8929_v52, %v6035_v48 }
 0x18f   :  { %v2510_v16 = vsel %vm6053_vm9, %v6180_v15, %v8926_v63  ;;  %v8927_v35 = vmov %v8926_v63  ;;  %v8930_v15 = vrot.slane %v6084_v18, 7  ;;  %v8931_v63 = vrot.slane %v6104_v25, 7 }
 0x190   :  { %v2511_v60 = vrot.slane %v8927_v35, 2  ;;  %v2918_v40 = vcombine.low %v2507_v3, %v2510_v16  ;;  %v8932_v3 = vrot.slane %v6118_v32, 7 }
 0x191   :  { %v2519_v4 = vsel %vm6053_vm9, %v6136_v38, %v8931_v63  ;;  %v8935_v63 = vrot.slane %v6176_v12, 7 }
 0x192   :  { %v2513_v35 = vsel %vm6053_vm9, %v2511_v60, %v8930_v15  ;;  %v2522_v16 = vsel %vm6053_vm9, %v6140_v39, %v8932_v3  ;;  %v8933_v52 = vmov %v8932_v3  ;;  %v2926_v18 = vrot.slane %v2918_v40, %v6035_v48 }
 0x193   :  { %v2523_v37 = vrot.slane %v8933_v52, 2  ;;  %v2919_v26 = vcombine.low %v2513_v35, %v2516_v46  ;;  %v1700_v60 = vrot.slane %v1692_v13, %v6035_v48  ;;  %v8934_v15 = vrot.slane %v6205_v51, 7 }
 0x194   :  { %v2935_v39 = vcombine.low %v2519_v4, %v2522_v16  ;;  %v1195_v3 = vcombine.high %v836_v36, %v836_v36  ;;  %v6576_v52 = vrot.slane %v836_v36, %v6035_v48  ;;  %v1710_v35 = vcombine.low %v6257_v0, %v6240_v1  ;;  %v5359_v4 = vpop.f32.mrf.mxu1 }
 0x195   :  { %v2528_v38 = vsel %vm6053_vm9, %v6244_v54, %v8934_v15  ;;  %v2525_v25 = vsel %vm6053_vm9, %v2523_v37, %v8935_v63  ;;  %v2933_v46 = vrot.slane %v2919_v26, %v6035_v48  ;;  %v1708_v40 = vcombine.low %v1700_v60, %v1707_v29 }
 0x196   :  { %8936 = vst [vmem:[#allocation61_spill] sm:$0xff] %v6576_v52  ;;  %v2936_v13 = vcombine.low %v2525_v25, %v2528_v38  ;;  %v8937_v51 = vrot.slane %v6500_v22, 7  ;;  %v2943_v15 = vrot.slane %v2935_v39, %v6035_v48  ;;  %v6587_v37 = vrot.slane %v1195_v3, %v6035_v48 }
 0x197   :  { %v6591_v36 = vcombine.high %v6576_v52, %v6576_v52  ;;  %v2934_v26 = vcombine.low %v2926_v18, %v2933_v46  ;;  %5405 = vmatmul.mubr.msk.f32.gmra.mxu0 %vm161_vm0, %v1708_v40  ;;  %v8714_v29 = vrot.slane %v6576_v52, 7  ;;  %v1724_v46 = vrot.slane %v1710_v35, %v6035_v48 }
 0x198   :  { %v6583_v54 = vrot.slane %v8937_v51, 2  ;;  %8938 = vst [vmem:[#allocation62_spill] sm:$0xff] %v6587_v37  ;;  %v2950_v25 = vrot.slane %v2936_v13, %v6035_v48  ;;  %v8940_v51 = vcombine.low %v6289_v41, %v6237_v33  ;;  %v8716_v63 = vrot.slane %v6587_v37, 7 }
 0x199   :  { %8939 = vst [vmem:[#allocation63_spill] sm:$0xff] %v6591_v36  ;;  %v8715_v38 = vrot.slane %v6591_v36, 7  ;;  %5457 = vmatprep.mubr.msk.f32.mxu1 %vm161_vm0, %v2934_v26  ;;  %v6609_v3 = vcombine.high %v6587_v37, %v6587_v37  ;;  %v1246_v40 = vcombine.high %v5359_v4, %v5359_v4  ;;  %v6614_v13 = vrot.slane %v8714_v29, 2 }
 0x19a   :  { %v1717_v16 = vrot.slane %v8940_v51, %v6035_v48  ;;  %v2951_v39 = vcombine.low %v2943_v15, %v2950_v25  ;;  %v6622_v18 = vrot.slane %v8716_v63, 2  ;;  %v6625_v15 = vrot.slane %v5359_v4, %v6035_v48 }
 0x19b   :  { %8941 = vst [vmem:[#allocation64_spill] sm:$0xff] %v6609_v3  ;;  %v6618_v51 = vrot.slane %v8715_v38, 2  ;;  %v6629_v35 = vrot.slane %v1246_v40, %v6035_v48  ;;  %v8944_v25 = vrot.slane %v6219_v8, 7  ;;  %v8945_v29 = vrot.slane %v6188_v19, 9 }
 0x19c   :  { %8942 = vst [vmem:[#allocation65_spill] sm:$0xff] %v6625_v15  ;;  %5458 = vmatmul.mubr.msk.f32.gmra.mxu1 %vm161_vm0, %v2951_v39  ;;  %v1725_v26 = vcombine.low %v1717_v16, %v1724_v46  ;;  %v8946_v60 = vrot.slane %v6167_v7, 7  ;;  %v6644_v39 = vcombine.high %v6625_v15, %v6625_v15  ;;  %v8948_v46 = vrot.slane %v6184_v2, 7  ;;  %v846_v16 = vpop.f32.mrf.mxu1 }
 0x19d   :  { %8943 = vst [vmem:[#allocation66_spill] sm:$0xff] %v6629_v35  ;;  %v2532_v38 = vsel %vm6053_vm9, %v8945_v29, %v8944_v25  ;;  %v8949_v29 = vrot.slane %v6173_v11, 7  ;;  %v1229_v2 = vcombine.high %v846_v16, %v846_v16  ;;  %v1744_v11 = vcombine.low %v6311_v5, %v6325_v14 }
 0x19e   :  { %v2535_v4 = vsel %vm6053_vm9, %v6248_v43, %v8946_v60  ;;  %8947 = vst [vmem:[#allocation67_spill] sm:$0xff] %v6644_v39  ;;  %v2538_v19 = vsel %vm6053_vm9, %v6211_v61, %v8948_v46  ;;  %5407 = vmatprep.mubr.msk.f32.mxu0 %vm161_vm0, %v1725_v26  ;;  %v6661_v60 = vcombine.high %v6629_v35, %v6629_v35  ;;  %v8719_v46 = vrot.slane %v6644_v39, 7 }
 0x19f   :  { %v2541_v40 = vsel %vm6053_vm9, %v6223_v30, %v8949_v29  ;;  %v2952_v25 = vcombine.low %v2532_v38, %v2535_v4  ;;  %v8950_v29 = vrot.slane %v6625_v15, 7  ;;  %v1727_v4 = vcombine.low %v6339_v42, %v6330_v53 }
 0x1a0   :  { %v2953_v63 = vcombine.low %v2538_v19, %v2541_v40  ;;  %v6679_v19 = vrot.slane %v8719_v46, 2  ;;  %v6683_v30 = vrot.slane %v846_v16, %v6035_v48  ;;  %v6693_v46 = vrot.slane %v1229_v2, %v6035_v48 }
 0x1a1   :  { %v6671_v26 = vrot.slane %v8950_v29, 2  ;;  %v2960_v43 = vrot.slane %v2952_v25, %v6035_v48  ;;  %v8953_v25 = vcombine.low %v6261_v50, %v6321_v27  ;;  %v8956_v8 = vrot.slane %v6197_v31, 7 }
 0x1a2   :  { %v2967_v38 = vrot.slane %v2953_v63, %v6035_v48  ;;  %8951 = vst [vmem:[#allocation68_spill] sm:$0xff] %v6679_v19  ;;  %8952 = vst [vmem:[#allocation69_spill] sm:$0xff] %v6683_v30  ;;  %v1741_v63 = vrot.slane %v1727_v4, %v6035_v48  ;;  %v6697_v40 = vcombine.high %v6683_v30, %v6683_v30  ;;  %v8962_v31 = vrot.slane %v6251_v56, 7 }
 0x1a3   :  { %v1734_v29 = vrot.slane %v8953_v25, %v6035_v48  ;;  %8954 = vst [vmem:[#allocation70_spill] sm:$0xff] %v6693_v46  ;;  %v1758_v4 = vrot.slane %v1744_v11, %v6035_v48  ;;  %v2544_v2 = vsel %vm6053_vm9, %v6215_v62, %v8956_v8  ;;  %v8957_v7 = vmov %v8956_v8  ;;  %v8961_v8 = vld [vmem:[#allocation45_spill] sm:$0xff] }
 0x1a4   :  { %v2968_v61 = vcombine.low %v2960_v43, %v2967_v38  ;;  %8955 = vst [vmem:[#allocation71_spill] sm:$0xff] %v6697_v40  ;;  %v5362_v38 = vpop.f32.mrf.mxu1  ;;  %v2545_v12 = vrot.slane %v8957_v7, 2  ;;  %v6713_v16 = vcombine.high %v6693_v46, %v6693_v46  ;;  %v8959_v11 = vrot.slane %v6270_v9, 7  ;;  %v8965_v9 = vld [vmem:[#allocation42_spill] sm:$0xff] }
 0x1a5   :  { %v1742_v25 = vcombine.low %v1734_v29, %v1741_v63  ;;  %v8960_v62 = vrot.slane %v6683_v30, 7  ;;  %v1759_v63 = vcombine.low %v8961_v8, %v1758_v4  ;;  %v8974_v8 = vld [vmem:[#allocation34_spill] sm:$0xff]  ;;  %v8991_v56 = vrot.slane %v6339_v42, 7 }
 0x1a6   :  { %5460 = vmatprep.mubr.msk.f32.mxu1 %vm161_vm0, %v2968_v61  ;;  %8958 = vst [vmem:[#allocation72_spill] sm:$0xff] %v6713_v16  ;;  %v2550_v29 = vsel %vm6053_vm9, %v6299_v47, %v8959_v11  ;;  %v2547_v43 = vsel %vm6053_vm9, %v2545_v12, %v8962_v31  ;;  %v8963_v61 = vld [vmem:[#allocation31_spill] sm:$0xff]  ;;  %v8966_v47 = vrot.slane %v6697_v40, 7  ;;  %v856_v4 = vpop.f32.mrf.mxu1  ;;  %v8967_v12 = vrot.slane %v6237_v33, 7 }
 0x1a7   :  { %5408 = vmatmul.mubr.msk.f32.gmra.mxu0 %vm161_vm0, %v1742_v25  ;;  %v6726_v7 = vrot.slane %v8960_v62, 2  ;;  %v8964_v32 = vrot.slane %v8963_v61, 7  ;;  %v2969_v62 = vcombine.low %v2544_v2, %v2547_v43  ;;  %v8968_v31 = vrot.slane %v6289_v41, 9  ;;  %v8972_v43 = vld [vmem:[#allocation35_spill] sm:$0xff] }
 0x1a8   :  { %v6740_v25 = vrot.slane %v8966_v47, 2  ;;  %5410 = vmatprep.mubr.msk.f32.mxu0 %vm161_vm0, %v1759_v63  ;;  %v8970_v47 = vld [vmem:[#allocation33_spill] sm:$0xff]  ;;  %v8973_v41 = vrot.slane %v6261_v50, 7  ;;  %v1280_v33 = vcombine.high %v5362_v38, %v5362_v38 }
 0x1a9   :  { %v2553_v44 = vsel %vm6053_vm9, %v8965_v9, %v8964_v32  ;;  %v2557_v32 = vsel %vm6053_vm9, %v8968_v31, %v8967_v12  ;;  %v8969_v9 = vrot.slane %v6257_v0, 7 }
 0x1aa   :  { %v2970_v19 = vcombine.low %v2550_v29, %v2553_v44  ;;  %v8971_v44 = vrot.slane %v6240_v1, 7  ;;  %v2977_v29 = vrot.slane %v2969_v62, %v6035_v48  ;;  %v2566_v12 = vsel %vm6053_vm9, %v8974_v8, %v8973_v41 }
 0x1ab   :  { %v2560_v11 = vsel %vm6053_vm9, %v8970_v47, %v8969_v9  ;;  %v6769_v9 = vrot.slane %v5362_v38, %v6035_v48  ;;  %v1263_v47 = vcombine.high %v856_v4, %v856_v4  ;;  %v8976_v1 = vrot.slane %v6693_v46, 7 }
 0x1ac   :  { %v2563_v2 = vsel %vm6053_vm9, %v8972_v43, %v8971_v44  ;;  %v2984_v63 = vrot.slane %v2970_v19, %v6035_v48  ;;  %v2986_v31 = vcombine.low %v2557_v32, %v2560_v11  ;;  %v6777_v43 = vrot.slane %v856_v4, %v6035_v48 }
 0x1ad   :  { %v2987_v0 = vcombine.low %v2563_v2, %v2566_v12  ;;  %8975 = vst [vmem:[#allocation45_spill] sm:$0xff] %v6769_v9  ;;  %v6773_v44 = vrot.slane %v8976_v1, 2  ;;  %v6781_v11 = vrot.slane %v1280_v33, %v6035_v48  ;;  %v6785_v38 = vcombine.high %v6769_v9, %v6769_v9  ;;  %v5050_v1 = vld [vmem:[%s8671_s8 + $0x40] sm:$0xff] }
 0x1ae   :  { %v2985_v62 = vcombine.low %v2977_v29, %v2984_v63  ;;  %v2994_v19 = vrot.slane %v2986_v31, %v6035_v48  ;;  %8977 = vst [vmem:[#allocation42_spill] sm:$0xff] %v6777_v43  ;;  %v8730_v8 = vrot.slane %v6769_v9, 7  ;;  %v6793_v4 = vrot.slane %v1263_v47, %v6035_v48  ;;  %5508 = vmatprep.subr.mxu0 %v5050_v1 }
 0x1af   :  { %v3001_v61 = vrot.slane %v2987_v0, %v6035_v48  ;;  %8978 = vst [vmem:[#allocation33_spill] sm:$0xff] %v6781_v11  ;;  %8979 = vst [vmem:[#allocation35_spill] sm:$0xff] %v6785_v38  ;;  %v6797_v0 = vcombine.high %v6777_v43, %v6777_v43  ;;  %v8732_v33 = vrot.slane %v6777_v43, 7  ;;  %v8982_v32 = vmov %v8973_v41  ;;  %5509 = vmatpush3.msra.mxu0 %v5050_v1 }
 0x1b0   :  { %5461 = vmatmul.mubr.msk.f32.gmra.mxu1 %vm161_vm0, %v2985_v62  ;;  %8980 = vst [vmem:[#allocation34_spill] sm:$0xff] %v6793_v4  ;;  %v2567_v2 = vrot.slane %v8982_v32, 2  ;;  %v6804_v63 = vcombine.high %v6781_v11, %v6781_v11  ;;  %v8731_v41 = vrot.slane %v6785_v38, 7  ;;  %v6811_v31 = vrot.slane %v8730_v8, 2 }
 0x1b1   :  { %8981 = vst [vmem:[#allocation73_spill] sm:$0xff] %v6797_v0  ;;  %v3002_v29 = vcombine.low %v2994_v19, %v3001_v61  ;;  %v8735_v47 = vrot.slane %v6781_v11, 7  ;;  %v6818_v61 = vcombine.high %v6793_v4, %v6793_v4  ;;  %v6828_v32 = vrot.slane %v8732_v33, 2 }
 0x1b2   :  { %8983 = vst [vmem:[#allocation74_spill] sm:$0xff] %v6804_v63  ;;  %8984 = vst [vmem:[#allocation75_spill] sm:$0xff] %v6811_v31  ;;  %v6823_v19 = vrot.slane %v8731_v41, 2  ;;  %v8738_v8 = vrot.slane %v6797_v0, 7  ;;  %v8990_v33 = vrot.slane %v6321_v27, 7  ;;  %v5365_v63 = vpop.f32.mrf.mxu1  ;;  %v9001_v31 = vld [vmem:[#allocation43_spill] sm:$0xff] }
 0x1b3   :  { %8985 = vst [vmem:[#allocation76_spill] sm:$0xff] %v6818_v61  ;;  %5463 = vmatprep.mubr.msk.f32.mxu1 %vm161_vm0, %v3002_v29  ;;  %8987 = vst [vmem:[#allocation78_spill] sm:$0xff] %v6828_v32  ;;  %v6833_v62 = vrot.slane %v8735_v47, 2  ;;  %v8992_v47 = vld [vmem:[#allocation48_spill] sm:$0xff]  ;;  %v8993_v29 = vrot.slane %v6330_v53, 7  ;;  %v8998_v53 = vrot.slane %v6311_v5, 7  ;;  %v1314_v5 = vcombine.high %v5365_v63, %v5365_v63 }
 0x1b4   :  { %8986 = vst [vmem:[#allocation77_spill] sm:$0xff] %v6823_v19  ;;  %v6841_v1 = vrot.slane %v8738_v8, 2  ;;  %v2569_v50 = vsel %vm6053_vm9, %v2567_v2, %v8990_v33  ;;  %v2572_v12 = vsel %vm6053_vm9, %v8992_v47, %v8991_v56  ;;  %v8995_v8 = vld [vmem:[#allocation44_spill] sm:$0xff]  ;;  %v1761_v2 = vcombine.low %v6456_v49, %v6475_v17 }
 0x1b5   :  { %8988 = vst [vmem:[#allocation79_spill] sm:$0xff] %v6833_v62  ;;  %v8994_v62 = vld [vmem:[#allocation49_spill] sm:$0xff]  ;;  %v8996_v19 = vrot.slane %v8995_v8, 7  ;;  %v3003_v33 = vcombine.low %v2569_v50, %v2572_v12  ;;  %v8997_v56 = vcombine.low %v6449_v28, %v6468_v23  ;;  %v9000_v8 = vrot.slane %v6325_v14, 7 }
 0x1b6   :  { %8989 = vst [vmem:[#allocation80_spill] sm:$0xff] %v6841_v1  ;;  %v2575_v41 = vsel %vm6053_vm9, %v8994_v62, %v8993_v29  ;;  %v8999_v62 = vld [vmem:[#allocation47_spill] sm:$0xff]  ;;  %v6889_v32 = vrot.slane %v5365_v63, %v6035_v48 }
 0x1b7   :  { %v2578_v27 = vsel %vm6053_vm9, %v6413_v45, %v8996_v19  ;;  %v1768_v47 = vrot.slane %v8997_v56, %v6035_v48  ;;  %v2585_v29 = vsel %vm6053_vm9, %v8999_v62, %v8998_v53  ;;  %v2588_v50 = vsel %vm6053_vm9, %v9001_v31, %v9000_v8 }
 0x1b8   :  { %v3004_v42 = vcombine.low %v2575_v41, %v2578_v27  ;;  %v9002_v45 = vmov %v9000_v8  ;;  %v3011_v19 = vrot.slane %v3003_v33, %v6035_v48  ;;  %v1775_v56 = vrot.slane %v1761_v2, %v6035_v48  ;;  %v9003_v27 = vld [vmem:[#allocation46_spill] sm:$0xff]  ;;  %9005 = vst [vmem:[#allocation48_spill] sm:$0xff] %v6889_v32  ;;  %v9006_v8 = vld [vmem:[#allocation51_spill] sm:$0xff] }
 0x1b9   :  { %v2589_v12 = vrot.slane %v9002_v45, 2  ;;  %v3020_v41 = vcombine.low %v9003_v27, %v2585_v29  ;;  %v9004_v53 = vrot.slane %v6449_v28, 7  ;;  %v9007_v31 = vcombine.low %v6417_v55, %v9006_v8  ;;  %v866_v45 = vpop.f32.mrf.mxu1 }
 0x1ba   :  { %v3018_v1 = vrot.slane %v3004_v42, %v6035_v48  ;;  %v1776_v2 = vcombine.low %v1768_v47, %v1775_v56  ;;  %v6897_v42 = vrot.slane %v1314_v5, %v6035_v48  ;;  %v8745_v63 = vrot.slane %v6889_v32, 7 }
 0x1bb   :  { %v2591_v62 = vsel %vm6053_vm9, %v2589_v12, %v9004_v53  ;;  %v1785_v33 = vrot.slane %v9007_v31, %v6035_v48  ;;  %v3028_v29 = vrot.slane %v3020_v41, %v6035_v48  ;;  %v6901_v12 = vcombine.high %v6889_v32, %v6889_v32 }
 0x1bc   :  { %v3021_v14 = vcombine.low %v2588_v50, %v2591_v62  ;;  %9008 = vst [vmem:[#allocation49_spill] sm:$0xff] %v6897_v42  ;;  %v3019_v27 = vcombine.low %v3011_v19, %v3018_v1  ;;  %v9010_v53 = vcombine.low %v6431_v10, %v6576_v52  ;;  %5411 = vmatmul.mubr.msk.f32.gmra.mxu0 %vm161_vm0, %v1776_v2  ;;  %v9011_v19 = vrot.slane %v6793_v4, 7 }
 0x1bd   :  { %9009 = vst [vmem:[#allocation47_spill] sm:$0xff] %v6901_v12  ;;  %v1297_v5 = vcombine.high %v866_v45, %v866_v45  ;;  %v1304_v1 = vrot.slane %v866_v45, %v6035_v48  ;;  %v6921_v62 = vrot.slane %v8745_v63, 2  ;;  %v9015_v28 = vrot.slane %v6897_v42, 7 }
 0x1be   :  { %v1792_v31 = vrot.slane %v9010_v53, %v6035_v48  ;;  %v3035_v47 = vrot.slane %v3021_v14, %v6035_v48  ;;  %v6914_v56 = vrot.slane %v9011_v19, 2  ;;  %5464 = vmatmul.mubr.msk.f32.gmra.mxu1 %vm161_vm0, %v3019_v27  ;;  %v5368_v19 = vpop.f32.mrf.mxu1  ;;  %v1794_v63 = vcombine.low %v6591_v36, %v6587_v37 }
 0x1bf   :  { %9012 = vst [vmem:[#allocation43_spill] sm:$0xff] %v6921_v62  ;;  %v6925_v50 = vrot.slane %v1297_v5, %v6035_v48  ;;  %v6927_v45 = vcombine.high %v1304_v1, %v1304_v1  ;;  %v6931_v27 = vrot.slane %v9015_v28, 2  ;;  %v5006_v41 = vrot.slane %v1304_v1, 9 }
 0x1c0   :  { %v1793_v2 = vcombine.low %v1785_v33, %v1792_v31  ;;  %v3036_v14 = vcombine.low %v3028_v29, %v3035_v47  ;;  %v1795_v33 = vcombine.low %v6609_v3, %v6463_v20 }
 0x1c1   :  { %9013 = vst [vmem:[#allocation46_spill] sm:$0xff] %v6925_v50  ;;  %9014 = vst [vmem:[#allocation81_spill] sm:$0xff] %v6927_v45  ;;  %v6941_v29 = vcombine.high %v6925_v50, %v6925_v50  ;;  %v1879_v31 = vcombine.low %v1304_v1, %v6927_v45  ;;  %v2681_v28 = vrot.slane %v6927_v45, 7  ;;  %v9022_v5 = vrot.slane %v6925_v50, 7 }
 0x1c2   :  { %9016 = vst [vmem:[#allocation82_spill] sm:$0xff] %v6931_v27  ;;  %5413 = vmatprep.mubr.msk.f32.mxu0 %vm161_vm0, %v1793_v2  ;;  %5466 = vmatprep.mubr.msk.f32.mxu1 %vm161_vm0, %v3036_v14  ;;  %v1802_v2 = vrot.slane %v1794_v63, %v6035_v48  ;;  %v1809_v53 = vrot.slane %v1795_v33, %v6035_v48  ;;  %v9018_v14 = vrot.slane %v6901_v12, 7 }
 0x1c3   :  { %9017 = vst [vmem:[#allocation83_spill] sm:$0xff] %v6941_v29  ;;  %v1348_v27 = vcombine.high %v5368_v19, %v5368_v19  ;;  %v6955_v32 = vrot.slane %v1879_v31, %v6035_v48  ;;  %v6959_v1 = vsel %vm6053_vm9, %v5006_v41, %v2681_v28  ;;  %v6961_v47 = vrot.slane %v2681_v28, 2  ;;  %v9031_v31 = vld [vmem:[#allocation50_spill] sm:$0xff] }
 0x1c4   :  { %v6952_v62 = vrot.slane %v9018_v14, 2  ;;  %9020 = vst [vmem:[#allocation85_spill] sm:$0xff] %v6959_v1  ;;  %v6965_v45 = vrot.slane %v9022_v5, 2  ;;  %v1810_v63 = vcombine.low %v1802_v2, %v1809_v53  ;;  %v6968_v33 = vrot.slane %v5368_v19, %v6035_v48 }
 0x1c5   :  { %9021 = vst [vmem:[#allocation86_spill] sm:$0xff] %v6961_v47  ;;  %v6971_v14 = vrot.slane %v1348_v27, %v6035_v48  ;;  %v9027_v28 = vrot.slane %v6456_v49, 7  ;;  %v9028_v19 = vrot.slane %v6475_v17, 7  ;;  %v9034_v49 = vcombine.low %v6683_v30, %v6697_v40 }
 0x1c6   :  { %9019 = vst [vmem:[#allocation84_spill] sm:$0xff] %v6952_v62  ;;  %9023 = vst [vmem:[#allocation87_spill] sm:$0xff] %v6965_v45  ;;  %v9026_v62 = vrot.slane %v6468_v23, 7  ;;  %5414 = vmatmul.mubr.msk.f32.gmra.mxu0 %vm161_vm0, %v1810_v63  ;;  %v6989_v27 = vcombine.high %v6968_v33, %v6968_v33  ;;  %v9032_v23 = vrot.slane %v9031_v31, 7  ;;  %v9033_v63 = vcombine.low %v6479_v34, %v6500_v22 }
 0x1c7   :  { %9024 = vst [vmem:[#allocation88_spill] sm:$0xff] %v6968_v33  ;;  %9025 = vst [vmem:[#allocation89_spill] sm:$0xff] %v6971_v14  ;;  %v2597_v53 = vsel %vm6053_vm9, %v6505_v58, %v9027_v28  ;;  %v2601_v5 = vrot.slane %v9028_v19, 2  ;;  %v6993_v2 = vcombine.high %v6971_v14, %v6971_v14  ;;  %v1826_v1 = vrot.slane %v9034_v49, %v6035_v48 }
 0x1c8   :  { %v2594_v41 = vsel %vm6053_vm9, %v6487_v24, %v9026_v62  ;;  %9029 = vst [vmem:[#allocation90_spill] sm:$0xff] %v6989_v27  ;;  %v8751_v24 = vrot.slane %v6968_v33, 7  ;;  %v1819_v19 = vrot.slane %v9033_v63, %v6035_v48  ;;  %v9036_v31 = vrot.slane %v6971_v14, 7 }
 0x1c9   :  { %9030 = vst [vmem:[#allocation91_spill] sm:$0xff] %v6993_v2  ;;  %v2603_v58 = vsel %vm6053_vm9, %v2601_v5, %v9032_v23  ;;  %v3037_v28 = vcombine.low %v2594_v41, %v2597_v53  ;;  %v9038_v41 = vrot.slane %v6475_v17, 7  ;;  %v9039_v47 = vrot.slane %v9006_v8, 7 }
 0x1ca   :  { %v7011_v45 = vrot.slane %v8751_v24, 2  ;;  %v7016_v23 = vrot.slane %v9036_v31, 2  ;;  %v1827_v24 = vcombine.low %v1819_v19, %v1826_v1  ;;  %v9040_v31 = vrot.slane %v6417_v55, 9 }
 0x1cb   :  { %v2600_v53 = vsel %vm6053_vm9, %v6491_v6, %v9038_v41  ;;  %v3045_v62 = vrot.slane %v3037_v28, %v6035_v48  ;;  %v9042_v6 = vld [vmem:[#allocation53_spill] sm:$0xff]  ;;  %v9044_v28 = vrot.slane %v6591_v36, 7  ;;  %v7049_v19 = vcombine.high %v6897_v42, %v6897_v42 }
 0x1cc   :  { %9035 = vst [vmem:[#allocation92_spill] sm:$0xff] %v7011_v45  ;;  %9037 = vst [vmem:[#allocation93_spill] sm:$0xff] %v7016_v23  ;;  %v3038_v63 = vcombine.low %v2600_v53, %v2603_v58  ;;  %v876_v45 = vpop.f32.mrf.mxu1  ;;  %v2607_v17 = vsel %vm6053_vm9, %v9040_v31, %v9039_v47  ;;  %v9041_v23 = vrot.slane %v6431_v10, 7  ;;  %5416 = vmatprep.mubr.msk.f32.mxu0 %vm161_vm0, %v1827_v24 }
 0x1cd   :  { %v2616_v55 = vsel %vm6053_vm9, %v6614_v13, %v9044_v28  ;;  %9045 = vst [vmem:[#allocation53_spill] sm:$0xff] %v7049_v19  ;;  %v1828_v24 = vcombine.low %v6693_v46, %v6713_v16  ;;  %v8753_v13 = vrot.slane %v7049_v19, 7 }
 0x1ce   :  { %v2610_v41 = vsel %vm6053_vm9, %v9042_v6, %v9041_v23  ;;  %v9043_v49 = vmov %v9041_v23  ;;  %v3052_v1 = vrot.slane %v3038_v63, %v6035_v48  ;;  %v9046_v23 = vrot.slane %v6576_v52, 7 }
 0x1cf   :  { %v2611_v58 = vrot.slane %v9043_v49, 2  ;;  %v3054_v47 = vcombine.low %v2607_v17, %v2610_v41  ;;  %v1331_v49 = vcombine.high %v876_v45, %v876_v45  ;;  %v7056_v63 = vrot.slane %v876_v45, %v6035_v48 }
 0x1d0   :  { %v3053_v31 = vcombine.low %v3045_v62, %v3052_v1  ;;  %v2701_v1 = vrot.slane %v8753_v13, 2 }
 0x1d1   :  { %v2613_v53 = vsel %vm6053_vm9, %v2611_v58, %v9046_v23  ;;  %9047 = vst [vmem:[#allocation94_spill] sm:$0xff] %v7056_v63  ;;  %v3062_v17 = vrot.slane %v3054_v47, %v6035_v48  ;;  %v7063_v41 = vrot.slane %v1331_v49, %v6035_v48  ;;  %v7067_v28 = vcombine.high %v7056_v63, %v7056_v63  ;;  %v5371_v23 = vpop.f32.mrf.mxu1 }
 0x1d2   :  { %v3055_v6 = vcombine.low %v2613_v53, %v2616_v55  ;;  %v2702_v58 = vrot.slane %v7056_v63, 7  ;;  %5467 = vmatmul.mubr.msk.f32.gmra.mxu1 %vm161_vm0, %v3053_v31  ;;  %v1836_v55 = vrot.slane %v1828_v24, %v6035_v48  ;;  %v9049_v47 = vcombine.low %v6625_v15, %v6644_v39 }
 0x1d3   :  { %9048 = vst [vmem:[#allocation95_spill] sm:$0xff] %v7063_v41  ;;  %v9050_v49 = vrot.slane %v6989_v27, 7  ;;  %v7087_v45 = vcombine.high %v7063_v41, %v7063_v41  ;;  %v1382_v52 = vcombine.high %v5371_v23, %v5371_v23  ;;  %v7103_v8 = vrot.slane %v5371_v23, %v6035_v48  ;;  %v886_v31 = vpop.f32.mrf.mxu1 }
 0x1d4   :  { %v3069_v62 = vrot.slane %v3055_v6, %v6035_v48  ;;  %v1843_v53 = vrot.slane %v9049_v47, %v6035_v48  ;;  %v8758_v6 = vrot.slane %v7063_v41, 7  ;;  %v7094_v24 = vsel %vm6053_vm9, %v2701_v1, %v2702_v58 }
 0x1d5   :  { %v7083_v5 = vrot.slane %v9050_v49, 2  ;;  %9051 = vst [vmem:[#allocation96_spill] sm:$0xff] %v7087_v45  ;;  %9052 = vst [vmem:[#allocation97_spill] sm:$0xff] %v7103_v8 }
 0x1d6   :  { %v3070_v13 = vcombine.low %v3062_v17, %v3069_v62  ;;  %v1844_v63 = vcombine.low %v1836_v55, %v1843_v53  ;;  %v7099_v49 = vrot.slane %v8758_v6, 2  ;;  %v9053_v17 = vrot.slane %v6587_v37, 7 }
 0x1d7   :  { %v9054_v62 = vrot.slane %v6609_v3, 7  ;;  %v9056_v53 = vrot.slane %v6496_v21, 7 }
 0x1d8   :  { %5469 = vmatprep.mubr.msk.f32.mxu1 %vm161_vm0, %v3070_v13  ;;  %5417 = vmatmul.mubr.msk.f32.gmra.mxu0 %vm161_vm0, %v1844_v63  ;;  %v2619_v58 = vsel %vm6053_vm9, %v6618_v51, %v9053_v17  ;;  %v7125_v13 = vrot.slane %v1382_v52, %v6035_v48  ;;  %v7129_v51 = vcombine.high %v7103_v8, %v7103_v8  ;;  %v8762_v17 = vrot.slane %v7103_v8, 7 }
 0x1d9   :  { %v2622_v1 = vsel %vm6053_vm9, %v6622_v18, %v9054_v62  ;;  %v9055_v23 = vmov %v9054_v62  ;;  %v2628_v63 = vsel %vm6053_vm9, %v6527_v59, %v9056_v53  ;;  %v9059_v18 = vrot.slane %v6463_v20, 7 }
 0x1da   :  { %v2623_v55 = vrot.slane %v9055_v23, 2  ;;  %9057 = vst [vmem:[#allocation98_spill] sm:$0xff] %v7125_v13  ;;  %9058 = vst [vmem:[#allocation99_spill] sm:$0xff] %v7129_v51  ;;  %v3071_v36 = vcombine.low %v2619_v58, %v2622_v1  ;;  %v1846_v23 = vcombine.low %v6797_v0, %v6793_v4  ;;  %v9060_v59 = vcombine.low %v6661_v60, %v6777_v43 }
 0x1db   :  { %v1365_v53 = vcombine.high %v886_v31, %v886_v31  ;;  %v7144_v47 = vcombine.high %v7125_v13, %v7125_v13  ;;  %v7150_v1 = vrot.slane %v8762_v17, 2  ;;  %v7162_v58 = vrot.slane %v886_v31, %v6035_v48 }
 0x1dc   :  { %v2625_v62 = vsel %vm6053_vm9, %v2623_v55, %v9059_v18  ;;  %v1853_v52 = vrot.slane %v9060_v59, %v6035_v48  ;;  %v8765_v55 = vrot.slane %v7129_v51, 7  ;;  %v8764_v18 = vrot.slane %v7125_v13, 7 }
 0x1dd   :  { %9061 = vst [vmem:[#allocation100_spill] sm:$0xff] %v7144_v47  ;;  %v3072_v6 = vcombine.low %v2625_v62, %v2628_v63  ;;  %v3079_v21 = vrot.slane %v3071_v36, %v6035_v48  ;;  %v1860_v59 = vrot.slane %v1846_v23, %v6035_v48  ;;  %9062 = vst [vmem:[#allocation101_spill] sm:$0xff] %v7162_v58  ;;  %v9063_v62 = vrot.slane %v6500_v22, 7 }
 0x1de   :  { %v7158_v20 = vrot.slane %v8765_v55, 2  ;;  %v7165_v17 = vrot.slane %v1365_v53, %v6035_v48  ;;  %v7169_v3 = vrot.slane %v8764_v18, 2  ;;  %v9064_v23 = vrot.slane %v6479_v34, 9  ;;  %v5374_v18 = vpop.f32.mrf.mxu1 }
 0x1df   :  { %v3086_v36 = vrot.slane %v3072_v6, %v6035_v48  ;;  %v1861_v63 = vcombine.low %v1853_v52, %v1860_v59  ;;  %v7180_v31 = vcombine.high %v7162_v58, %v7162_v58  ;;  %v8766_v6 = vrot.slane %v7162_v58, 7 }
 0x1e0   :  { %v2632_v37 = vsel %vm6053_vm9, %v9064_v23, %v9063_v62  ;;  %v7184_v53 = vcombine.high %v7165_v17, %v7165_v17  ;;  %v9067_v59 = vrot.slane %v6683_v30, 7  ;;  %v9068_v23 = vrot.slane %v6697_v40, 7 }
 0x1e1   :  { %9065 = vst [vmem:[#allocation102_spill] sm:$0xff] %v7180_v31  ;;  %v3087_v52 = vcombine.low %v3079_v21, %v3086_v36  ;;  %5419 = vmatprep.mubr.msk.f32.mxu0 %vm161_vm0, %v1861_v63  ;;  %v7205_v36 = vrot.slane %v8766_v6, 2  ;;  %v1862_v6 = vcombine.low %v6818_v61, %v6769_v9  ;;  %v1416_v30 = vcombine.high %v5374_v18, %v5374_v18 }
 0x1e2   :  { %9066 = vst [vmem:[#allocation103_spill] sm:$0xff] %v7184_v53  ;;  %v2635_v62 = vsel %vm6053_vm9, %v6583_v54, %v9067_v59  ;;  %v2638_v55 = vsel %vm6053_vm9, %v6726_v7, %v9068_v23  ;;  %v8770_v34 = vrot.slane %v7184_v53, 7  ;;  %v9069_v59 = vrot.slane %v6693_v46, 7  ;;  %v896_v46 = vpop.f32.mrf.mxu1 }
 0x1e3   :  { %5470 = vmatmul.mubr.msk.f32.gmra.mxu1 %vm161_vm0, %v3087_v52  ;;  %v3088_v23 = vcombine.low %v2632_v37, %v2635_v62  ;;  %v1863_v52 = vcombine.low %v6785_v38, %v6781_v11  ;;  %v1870_v22 = vrot.slane %v1862_v6, %v6035_v48  ;;  %v7228_v40 = vrot.slane %v5374_v18, %v6035_v48 }
 0x1e4   :  { %v2641_v7 = vsel %vm6053_vm9, %v6740_v25, %v9069_v59  ;;  %v7221_v63 = vrot.slane %v8770_v34, 2  ;;  %v9071_v37 = vrot.slane %v6713_v16, 7  ;;  %v7238_v59 = vrot.slane %v1416_v30, %v6035_v48 }
 0x1e5   :  { %v3089_v21 = vcombine.low %v2638_v55, %v2641_v7  ;;  %v3096_v54 = vrot.slane %v3088_v23, %v6035_v48  ;;  %9070 = vst [vmem:[#allocation104_spill] sm:$0xff] %v7228_v40  ;;  %v1877_v55 = vrot.slane %v1863_v52, %v6035_v48  ;;  %v7244_v18 = vcombine.high %v7228_v40, %v7228_v40  ;;  %v9077_v52 = vld [vmem:[#allocation68_spill] sm:$0xff] }
 0x1e6   :  { %v2644_v25 = vsel %vm6053_vm9, %v6773_v44, %v9071_v37  ;;  %9072 = vst [vmem:[#allocation105_spill] sm:$0xff] %v7238_v59  ;;  %v9073_v7 = vmov %v9071_v37  ;;  %v9075_v34 = vrot.slane %v6644_v39, 7  ;;  %v7259_v16 = vcombine.high %v7238_v59, %v7238_v59 }
 0x1e7   :  { %v3103_v62 = vrot.slane %v3089_v21, %v6035_v48  ;;  %v2645_v23 = vrot.slane %v9073_v7, 2  ;;  %9074 = vst [vmem:[#allocation106_spill] sm:$0xff] %v7244_v18  ;;  %v9076_v21 = vrot.slane %v6629_v35, 7  ;;  %v1878_v7 = vcombine.low %v1870_v22, %v1877_v55 }
 0x1e8   :  { %v2650_v44 = vsel %vm6053_vm9, %v6671_v26, %v9075_v34  ;;  %9078 = vst [vmem:[#allocation68_spill] sm:$0xff] %v7259_v16  ;;  %v8776_v6 = vrot.slane %v7238_v59, 7  ;;  %v9079_v39 = vrot.slane %v7228_v40, 7  ;;  %v8777_v26 = vrot.slane %v7244_v18, 7 }
 0x1e9   :  { %v2653_v30 = vsel %vm6053_vm9, %v9077_v52, %v9076_v21  ;;  %v3104_v37 = vcombine.low %v3096_v54, %v3103_v62  ;;  %v9081_v21 = vrot.slane %v6625_v15, 7  ;;  %5420 = vmatmul.mubr.msk.f32.gmra.mxu0 %vm161_vm0, %v1878_v7  ;;  %v1399_v34 = vcombine.high %v896_v46, %v896_v46  ;;  %v9099_v15 = vld [vmem:[#allocation75_spill] sm:$0xff] }
 0x1ea   :  { %v7264_v10 = vrot.slane %v9079_v39, 2  ;;  %v7277_v54 = vrot.slane %v8776_v6, 2  ;;  %v3106_v55 = vcombine.low %v2650_v44, %v2653_v30  ;;  %v7282_v52 = vrot.slane %v8777_v26, 2  ;;  %v9088_v30 = vld [vmem:[#allocation78_spill] sm:$0xff]  ;;  %v9090_v39 = vld [vmem:[#allocation80_spill] sm:$0xff] }
 0x1eb   :  { %v2647_v22 = vsel %vm6053_vm9, %v2645_v23, %v9081_v21  ;;  %5472 = vmatprep.mubr.msk.f32.mxu1 %vm161_vm0, %v3104_v37  ;;  %v7285_v35 = vrot.slane %v896_v46, %v6035_v48  ;;  %v9085_v23 = vrot.slane %v6777_v43, 7  ;;  %v9086_v37 = vrot.slane %v6661_v60, 9 }
 0x1ec   :  { %9080 = vst [vmem:[#allocation107_spill] sm:$0xff] %v7264_v10  ;;  %9082 = vst [vmem:[#allocation108_spill] sm:$0xff] %v7277_v54  ;;  %v3105_v62 = vcombine.low %v2644_v25, %v2647_v22  ;;  %v3120_v25 = vrot.slane %v3106_v55, %v6035_v48  ;;  %v9087_v44 = vrot.slane %v6797_v0, 7  ;;  %v9089_v46 = vrot.slane %v6793_v4, 7 }
 0x1ed   :  { %9083 = vst [vmem:[#allocation109_spill] sm:$0xff] %v7282_v52  ;;  %9084 = vst [vmem:[#allocation110_spill] sm:$0xff] %v7285_v35  ;;  %v2657_v7 = vsel %vm6053_vm9, %v9086_v37, %v9085_v23  ;;  %v7306_v60 = vrot.slane %v1399_v34, %v6035_v48  ;;  %v8778_v55 = vrot.slane %v7285_v35, 7  ;;  %v1880_v34 = vcombine.low %v6925_v50, %v6941_v29  ;;  %v5377_v23 = vpop.f32.mrf.mxu1 }
 0x1ee   :  { %v3113_v21 = vrot.slane %v3105_v62, %v6035_v48  ;;  %v2660_v22 = vsel %vm6053_vm9, %v9088_v30, %v9087_v44  ;;  %v2663_v6 = vsel %vm6053_vm9, %v9090_v39, %v9089_v46  ;;  %v7310_v62 = vcombine.high %v7285_v35, %v7285_v35 }
 0x1ef   :  { %9091 = vst [vmem:[#allocation78_spill] sm:$0xff] %v7306_v60  ;;  %v9093_v44 = vrot.slane %v6818_v61, 7  ;;  %v3122_v39 = vcombine.low %v2657_v7, %v2660_v22  ;;  %v7324_v46 = vcombine.high %v7306_v60, %v7306_v60  ;;  %v1894_v43 = vrot.slane %v1880_v34, %v6035_v48  ;;  %v9131_v60 = vld [vmem:[#allocation43_spill] sm:$0xff] }
 0x1f0   :  { %9092 = vst [vmem:[#allocation80_spill] sm:$0xff] %v7310_v62  ;;  %v3121_v37 = vcombine.low %v3113_v21, %v3120_v25  ;;  %v7330_v21 = vrot.slane %v8778_v55, 2  ;;  %v8782_v25 = vrot.slane %v7310_v62, 7  ;;  %v1457_v4 = vrot.slane %v5377_v23, %v6035_v48 }
 0x1f1   :  { %v2666_v30 = vsel %vm6053_vm9, %v6914_v56, %v9093_v44  ;;  %v3130_v44 = vrot.slane %v3122_v39, %v6035_v48  ;;  %v1450_v56 = vcombine.high %v5377_v23, %v5377_v23  ;;  %v9095_v39 = vld [vmem:[#allocation48_spill] sm:$0xff]  ;;  %v9097_v26 = vrot.slane %v6818_v61, 7  ;;  %v906_v23 = vpop.f32.mrf.mxu1 }
 0x1f2   :  { %5473 = vmatmul.mubr.msk.f32.gmra.mxu1 %vm161_vm0, %v3121_v37  ;;  %v3123_v22 = vcombine.low %v2663_v6, %v2666_v30  ;;  %v7342_v55 = vrot.slane %v8782_v25, 2  ;;  %v1897_v6 = vcombine.low %v6897_v42, %v7049_v19  ;;  %v1895_v30 = vcombine.low %v6955_v32, %v1894_v43 }
 0x1f3   :  { %v9096_v7 = vcombine.low %v9095_v39, %v6901_v12  ;;  %v2667_v0 = vrot.slane %v9097_v26, 2  ;;  %v9098_v34 = vrot.slane %v6785_v38, 7  ;;  %v7363_v52 = vrot.slane %v1450_v56, %v6035_v48  ;;  %v9105_v56 = vld [vmem:[#allocation74_spill] sm:$0xff] }
 0x1f4   :  { %9094 = vst [vmem:[#allocation111_spill] sm:$0xff] %v7342_v55  ;;  %v3137_v37 = vrot.slane %v3123_v22, %v6035_v48  ;;  %v7365_v43 = vcombine.high %v1457_v4, %v1457_v4  ;;  %v5010_v32 = vrot.slane %v1457_v4, 9  ;;  %5422 = vmatprep.mubr.msk.f32.mxu0 %vm161_vm0, %v1895_v30  ;;  %v9102_v26 = vrot.slane %v6769_v9, 7 }
 0x1f5   :  { %v1904_v25 = vrot.slane %v9096_v7, %v6035_v48  ;;  %v2672_v22 = vsel %vm6053_vm9, %v9099_v15, %v9098_v34  ;;  %9100 = vst [vmem:[#allocation75_spill] sm:$0xff] %v7363_v52  ;;  %v1911_v7 = vrot.slane %v1897_v6, %v6035_v48  ;;  %v9103_v61 = vrot.slane %v6781_v11, 7  ;;  %v9104_v15 = vld [vmem:[#allocation77_spill] sm:$0xff]  ;;  %v9107_v34 = vld [vmem:[#allocation79_spill] sm:$0xff] }
 0x1f6   :  { %v3138_v54 = vcombine.low %v3130_v44, %v3137_v37  ;;  %9101 = vst [vmem:[#allocation112_spill] sm:$0xff] %v7365_v43  ;;  %v2669_v38 = vsel %vm6053_vm9, %v2667_v0, %v9102_v26  ;;  %v9106_v37 = vrot.slane %v9105_v56, 7  ;;  %v7386_v6 = vcombine.high %v7363_v52, %v7363_v52  ;;  %v5380_v56 = vpop.f32.mrf.mxu1 }
 0x1f7   :  { %v2675_v44 = vsel %vm6053_vm9, %v9104_v15, %v9103_v61  ;;  %v2015_v0 = vcombine.low %v1457_v4, %v7365_v43  ;;  %v2781_v30 = vrot.slane %v7365_v43, 7  ;;  %v8788_v26 = vrot.slane %v7363_v52, 7 }
 0x1f8   :  { %v2678_v10 = vsel %vm6053_vm9, %v9107_v34, %v9106_v37  ;;  %5475 = vmatprep.mubr.msk.f32.mxu1 %vm161_vm0, %v3138_v54  ;;  %9108 = vst [vmem:[#allocation77_spill] sm:$0xff] %v7386_v6  ;;  %v1912_v15 = vcombine.low %v1904_v25, %v1911_v7  ;;  %v3139_v9 = vcombine.low %v2669_v38, %v2672_v22 }
 0x1f9   :  { %v3140_v11 = vcombine.low %v2675_v44, %v2678_v10  ;;  %v7394_v37 = vrot.slane %v2015_v0, %v6035_v48  ;;  %v7398_v54 = vsel %vm6053_vm9, %v5010_v32, %v2781_v30  ;;  %v7400_v34 = vrot.slane %v2781_v30, 2 }
 0x1fa   :  { %9109 = vst [vmem:[#allocation79_spill] sm:$0xff] %v7398_v54  ;;  %v7404_v4 = vrot.slane %v8788_v26, 2  ;;  %5423 = vmatmul.mubr.msk.f32.gmra.mxu0 %vm161_vm0, %v1912_v15  ;;  %v3147_v10 = vrot.slane %v3139_v9, %v6035_v48  ;;  %v1433_v25 = vcombine.high %v906_v23, %v906_v23  ;;  %v7411_v22 = vrot.slane %v906_v23, %v6035_v48 }
 0x1fb   :  { %9110 = vst [vmem:[#allocation113_spill] sm:$0xff] %v7400_v34  ;;  %v3154_v38 = vrot.slane %v3140_v11, %v6035_v48  ;;  %v1914_v32 = vcombine.low %v7087_v45, %v6968_v33  ;;  %v9113_v7 = vcombine.low %v7067_v28, %v7063_v41  ;;  %v1484_v0 = vcombine.high %v5380_v56, %v5380_v56 }
 0x1fc   :  { %9111 = vst [vmem:[#allocation114_spill] sm:$0xff] %v7404_v4  ;;  %9112 = vst [vmem:[#allocation115_spill] sm:$0xff] %v7411_v22  ;;  %v7420_v15 = vrot.slane %v1433_v25, %v6035_v48  ;;  %v7423_v9 = vrot.slane %v5380_v56, %v6035_v48  ;;  %v1930_v11 = vcombine.low %v6989_v27, %v6971_v14  ;;  %v916_v4 = vpop.f32.mrf.mxu1 }
 0x1fd   :  { %v1921_v44 = vrot.slane %v9113_v7, %v6035_v48  ;;  %v3155_v30 = vcombine.low %v3147_v10, %v3154_v38  ;;  %v7429_v23 = vcombine.high %v7411_v22, %v7411_v22  ;;  %v8790_v7 = vrot.slane %v7411_v22, 7 }
 0x1fe   :  { %9114 = vst [vmem:[#allocation116_spill] sm:$0xff] %v7420_v15  ;;  %9115 = vst [vmem:[#allocation117_spill] sm:$0xff] %v7423_v9  ;;  %v1928_v10 = vrot.slane %v1914_v32, %v6035_v48  ;;  %v7438_v56 = vcombine.high %v7420_v15, %v7420_v15  ;;  %v8791_v38 = vrot.slane %v7420_v15, 7  ;;  %v7442_v25 = vrot.slane %v1484_v0, %v6035_v48  ;;  %v9127_v0 = vld [vmem:[#allocation87_spill] sm:$0xff] }
 0x1ff   :  { %9116 = vst [vmem:[#allocation118_spill] sm:$0xff] %v7429_v23  ;;  %5476 = vmatmul.mubr.msk.f32.gmra.mxu1 %vm161_vm0, %v3155_v30  ;;  %v7446_v55 = vcombine.high %v7423_v9, %v7423_v9  ;;  %v7450_v26 = vrot.slane %v8790_v7, 2  ;;  %v8792_v32 = vrot.slane %v7429_v23, 7  ;;  %v9122_v7 = vcombine.low %v6993_v2, %v7162_v58 }
 0x200   :  { %9117 = vst [vmem:[#allocation119_spill] sm:$0xff] %v7438_v56  ;;  %v1929_v61 = vcombine.low %v1921_v44, %v1928_v10  ;;  %v7457_v43 = vrot.slane %v8791_v38, 2  ;;  %v7462_v54 = vcombine.high %v7442_v25, %v7442_v25  ;;  %v8802_v30 = vrot.slane %v7442_v25, 7  ;;  %v9124_v56 = vld [vmem:[#allocation86_spill] sm:$0xff] }
 0x201   :  { %9118 = vst [vmem:[#allocation120_spill] sm:$0xff] %v7446_v55  ;;  %9119 = vst [vmem:[#allocation121_spill] sm:$0xff] %v7450_v26  ;;  %v7468_v34 = vrot.slane %v8792_v32, 2  ;;  %v1938_v38 = vrot.slane %v1930_v11, %v6035_v48  ;;  %v9123_v32 = vrot.slane %v6925_v50, 7  ;;  %v9126_v44 = vrot.slane %v6941_v29, 7 }
 0x202   :  { %9120 = vst [vmem:[#allocation122_spill] sm:$0xff] %v7457_v43  ;;  %5425 = vmatprep.mubr.msk.f32.mxu0 %vm161_vm0, %v1929_v61  ;;  %v1945_v43 = vrot.slane %v9122_v7, %v6035_v48  ;;  %v7487_v10 = vrot.slane %v8802_v30, 2  ;;  %v9129_v7 = vld [vmem:[#allocation85_spill] sm:$0xff]  ;;  %v9130_v26 = vrot.slane %v6901_v12, 7  ;;  %v9133_v30 = vld [vmem:[#allocation84_spill] sm:$0xff] }
 0x203   :  { %9121 = vst [vmem:[#allocation123_spill] sm:$0xff] %v7468_v34  ;;  %v2685_v61 = vsel %vm6053_vm9, %v9124_v56, %v9123_v32  ;;  %v2688_v11 = vsel %vm6053_vm9, %v9127_v0, %v9126_v44  ;;  %v9128_v9 = vmov %v9126_v44  ;;  %v9132_v32 = vrot.slane %v6897_v42, 7  ;;  %v9135_v44 = vld [vmem:[#allocation82_spill] sm:$0xff] }
 0x204   :  { %9125 = vst [vmem:[#allocation86_spill] sm:$0xff] %v7487_v10  ;;  %v2689_v55 = vrot.slane %v9128_v9, 2  ;;  %v3156_v34 = vcombine.low %v9129_v7, %v2685_v61  ;;  %v1946_v50 = vcombine.low %v1938_v38, %v1945_v43  ;;  %v2694_v56 = vsel %vm6053_vm9, %v9131_v60, %v9130_v26  ;;  %v5383_v61 = vpop.f32.mrf.mxu1 }
 0x205   :  { %v2697_v10 = vsel %vm6053_vm9, %v9133_v30, %v9132_v32  ;;  %v9134_v0 = vrot.slane %v7049_v19, 7  ;;  %v9136_v43 = vrot.slane %v9095_v39, 7  ;;  %v1467_v32 = vcombine.high %v916_v4, %v916_v4 }
 0x206   :  { %v3164_v60 = vrot.slane %v3156_v34, %v6035_v48  ;;  %v3173_v26 = vcombine.low %v2694_v56, %v2697_v10  ;;  %5426 = vmatmul.mubr.msk.f32.gmra.mxu0 %vm161_vm0, %v1946_v50  ;;  %v7520_v19 = vrot.slane %v916_v4, %v6035_v48  ;;  %v1518_v50 = vcombine.high %v5383_v61, %v5383_v61 }
 0x207   :  { %v2700_v9 = vsel %vm6053_vm9, %v9135_v44, %v9134_v0  ;;  %v2691_v38 = vsel %vm6053_vm9, %v2689_v55, %v9136_v43  ;;  %v9138_v0 = vcombine.low %v7165_v17, %v7184_v53  ;;  %v7534_v4 = vrot.slane %v1467_v32, %v6035_v48 }
 0x208   :  { %v3174_v7 = vcombine.low %v2700_v9, %v7094_v24  ;;  %v3157_v30 = vcombine.low %v2688_v11, %v2691_v38  ;;  %9137 = vst [vmem:[#allocation87_spill] sm:$0xff] %v7520_v19  ;;  %v3181_v12 = vrot.slane %v3173_v26, %v6035_v48  ;;  %v9139_v24 = vcombine.low %v7103_v8, %v7129_v51 }
 0x209   :  { %v1955_v44 = vrot.slane %v9138_v0, %v6035_v48  ;;  %v7538_v11 = vcombine.high %v7520_v19, %v7520_v19  ;;  %v8807_v56 = vrot.slane %v7520_v19, 7  ;;  %v7544_v26 = vrot.slane %v5383_v61, %v6035_v48 }
 0x20a   :  { %v3188_v55 = vrot.slane %v3174_v7, %v6035_v48  ;;  %v1962_v34 = vrot.slane %v9139_v24, %v6035_v48  ;;  %v3171_v10 = vrot.slane %v3157_v30, %v6035_v48  ;;  %v7548_v30 = vcombine.high %v7534_v4, %v7534_v4 }
 0x20b   :  { %v7554_v0 = vrot.slane %v8807_v56, 2  ;;  %v7560_v61 = vrot.slane %v1518_v50, %v6035_v48  ;;  %v8808_v24 = vrot.slane %v7544_v26, 7  ;;  %v9142_v50 = vrot.slane %v7087_v45, 7 }
 0x20c   :  { %v3189_v9 = vcombine.low %v3181_v12, %v3188_v55  ;;  %v1963_v38 = vcombine.low %v1955_v44, %v1962_v34  ;;  %v3172_v7 = vcombine.low %v3164_v60, %v3171_v10  ;;  %v8805_v12 = vrot.slane %v7538_v11, 7 }
 0x20d   :  { %v8806_v55 = vrot.slane %v7534_v4, 7  ;;  %v7564_v60 = vcombine.high %v7544_v26, %v7544_v26  ;;  %v9140_v34 = vrot.slane %v7063_v41, 7  ;;  %v9141_v10 = vrot.slane %v7067_v28, 9  ;;  %v926_v41 = vpop.f32.mrf.mxu1 }
 0x20e   :  { %5428 = vmatprep.mubr.msk.f32.mxu0 %vm161_vm0, %v1963_v38  ;;  %5478 = vmatprep.mubr.msk.f32.mxu1 %vm161_vm0, %v3172_v7  ;;  %v2710_v43 = vsel %vm6053_vm9, %v7099_v49, %v9142_v50  ;;  %v7583_v7 = vrot.slane %v8805_v12, 2  ;;  %v7591_v28 = vcombine.high %v7560_v61, %v7560_v61  ;;  %v2711_v12 = vrot.slane %v9142_v50, 2 }
 0x20f   :  { %v2707_v38 = vsel %vm6053_vm9, %v9141_v10, %v9140_v34  ;;  %5479 = vmatmul.mubr.msk.f32.gmra.mxu1 %vm161_vm0, %v3189_v9  ;;  %v7587_v44 = vrot.slane %v8806_v55, 2  ;;  %v7596_v10 = vrot.slane %v8808_v24, 2  ;;  %v9143_v32 = vrot.slane %v6989_v27, 7  ;;  %v9144_v34 = vld [vmem:[#allocation92_spill] sm:$0xff] }
 0x210   :  { %v3190_v42 = vcombine.low %v2707_v38, %v2710_v43  ;;  %v9145_v49 = vrot.slane %v6968_v33, 7  ;;  %v1964_v50 = vcombine.low %v7125_v13, %v7144_v47  ;;  %v9146_v55 = vcombine.low %v7285_v35, %v7310_v62  ;;  %v9150_v33 = vld [vmem:[#allocation93_spill] sm:$0xff] }
 0x211   :  { %v2716_v24 = vsel %vm6053_vm9, %v9144_v34, %v9143_v32  ;;  %v9147_v27 = vrot.slane %v6971_v14, 7  ;;  %v9148_v32 = vrot.slane %v7591_v28, 7 }
 0x212   :  { %v2713_v9 = vsel %vm6053_vm9, %v2711_v12, %v9145_v49  ;;  %v1979_v56 = vrot.slane %v9146_v55, %v6035_v48  ;;  %v3198_v12 = vrot.slane %v3190_v42, %v6035_v48  ;;  %v9149_v49 = vrot.slane %v6993_v2, 7 }
 0x213   :  { %v2719_v43 = vsel %vm6053_vm9, %v7083_v5, %v9147_v27  ;;  %v7628_v38 = vrot.slane %v9148_v32, 2  ;;  %v3191_v34 = vcombine.low %v2713_v9, %v2716_v24  ;;  %v1972_v55 = vrot.slane %v1964_v50, %v6035_v48  ;;  %v5386_v50 = vpop.f32.mrf.mxu1 }
 0x214   :  { %v2722_v45 = vsel %vm6053_vm9, %v9150_v33, %v9149_v49  ;;  %v9151_v14 = vmov %v9149_v49  ;;  %v9152_v27 = vrot.slane %v7180_v31, 7  ;;  %v1501_v9 = vcombine.high %v926_v41, %v926_v41 }
 0x215   :  { %v2723_v29 = vrot.slane %v9151_v14, 2  ;;  %v3207_v24 = vcombine.low %v2719_v43, %v2722_v45  ;;  %v3205_v42 = vrot.slane %v3191_v34, %v6035_v48  ;;  %v7646_v32 = vrot.slane %v926_v41, %v6035_v48 }
 0x216   :  { %v2728_v5 = vsel %vm6053_vm9, %v7205_v36, %v9152_v27  ;;  %v1982_v33 = vcombine.low %v7244_v18, %v7238_v59  ;;  %v1980_v49 = vcombine.low %v1972_v55, %v1979_v56  ;;  %v9153_v14 = vrot.slane %v7162_v58, 7 }
 0x217   :  { %v3215_v2 = vrot.slane %v3207_v24, %v6035_v48  ;;  %v9154_v45 = vcombine.low %v7324_v46, %v7228_v40  ;;  %v3206_v43 = vcombine.low %v3198_v12, %v3205_v42  ;;  %v7660_v34 = vrot.slane %v1501_v9, %v6035_v48 }
 0x218   :  { %v2725_v31 = vsel %vm6053_vm9, %v2723_v29, %v9153_v14  ;;  %v7664_v56 = vcombine.high %v7646_v32, %v7646_v32  ;;  %5429 = vmatmul.mubr.msk.f32.gmra.mxu0 %vm161_vm0, %v1980_v49  ;;  %v8818_v55 = vrot.slane %v7646_v32, 7  ;;  %v1996_v27 = vrot.slane %v1982_v33, %v6035_v48 }
 0x219   :  { %v1989_v36 = vrot.slane %v9154_v45, %v6035_v48  ;;  %v3208_v41 = vcombine.low %v2725_v31, %v2728_v5  ;;  %v1552_v24 = vcombine.high %v5386_v50, %v5386_v50  ;;  %5481 = vmatprep.mubr.msk.f32.mxu1 %vm161_vm0, %v3206_v43  ;;  %v7675_v12 = vcombine.high %v7660_v34, %v7660_v34 }
 0x21a   :  { %v8820_v5 = vrot.slane %v7664_v56, 7  ;;  %v8819_v42 = vrot.slane %v7660_v34, 7  ;;  %v7681_v9 = vrot.slane %v8818_v55, 2  ;;  %v7686_v14 = vrot.slane %v5386_v50, %v6035_v48 }
 0x21b   :  { %v3222_v31 = vrot.slane %v3208_v41, %v6035_v48  ;;  %v1997_v49 = vcombine.low %v1989_v36, %v1996_v27  ;;  %v7699_v55 = vrot.slane %v1552_v24, %v6035_v48  ;;  %v9155_v36 = vrot.slane %v7184_v53, 7 }
 0x21c   :  { %v7690_v43 = vrot.slane %v8820_v5, 2  ;;  %v7694_v41 = vrot.slane %v8819_v42, 2  ;;  %v7703_v50 = vcombine.high %v7686_v14, %v7686_v14  ;;  %v9156_v27 = vrot.slane %v7165_v17, 9 }
 0x21d   :  { %v3223_v45 = vcombine.low %v3215_v2, %v3222_v31  ;;  %5431 = vmatprep.mubr.msk.f32.mxu0 %vm161_vm0, %v1997_v49  ;;  %v8822_v2 = vrot.slane %v7686_v14, 7  ;;  %v9157_v49 = vrot.slane %v7103_v8, 7  ;;  %v9158_v33 = vrot.slane %v7129_v51, 7 }
 0x21e   :  { %v2732_v31 = vsel %vm6053_vm9, %v9156_v27, %v9155_v36  ;;  %v9159_v29 = vrot.slane %v7125_v13, 7  ;;  %v7732_v36 = vcombine.high %v7699_v55, %v7699_v55 }
 0x21f   :  { %5482 = vmatmul.mubr.msk.f32.gmra.mxu1 %vm161_vm0, %v3223_v45  ;;  %v2735_v24 = vsel %vm6053_vm9, %v7221_v63, %v9157_v49  ;;  %v2738_v42 = vsel %vm6053_vm9, %v7150_v1, %v9158_v33  ;;  %v1999_v45 = vcombine.low %v7429_v23, %v7420_v15  ;;  %v7738_v27 = vrot.slane %v8822_v2, 2  ;;  %v936_v33 = vpop.f32.mrf.mxu1 }
 0x220   :  { %v2741_v17 = vsel %vm6053_vm9, %v7158_v20, %v9159_v29  ;;  %v8826_v1 = vrot.slane %v7703_v50, 7  ;;  %v3224_v29 = vcombine.low %v2732_v31, %v2735_v24  ;;  %v9160_v2 = vcombine.low %v7259_v16, %v7411_v22 }
 0x221   :  { %v3225_v5 = vcombine.low %v2738_v42, %v2741_v17  ;;  %v2013_v13 = vrot.slane %v1999_v45, %v6035_v48  ;;  %v1535_v20 = vcombine.high %v936_v33, %v936_v33  ;;  %v7757_v42 = vrot.slane %v936_v33, %v6035_v48 }
 0x222   :  { %v7746_v58 = vrot.slane %v8826_v1, 2  ;;  %v2006_v51 = vrot.slane %v9160_v2, %v6035_v48  ;;  %v3232_v49 = vrot.slane %v3224_v29, %v6035_v48  ;;  %v2016_v24 = vcombine.low %v7363_v52, %v7386_v6 }
 0x223   :  { %v3239_v53 = vrot.slane %v3225_v5, %v6035_v48  ;;  %v9161_v17 = vrot.slane %v7144_v47, 7  ;;  %v7769_v5 = vrot.slane %v1535_v20, %v6035_v48  ;;  %v7773_v33 = vcombine.high %v7757_v42, %v7757_v42 }
 0x224   :  { %v2014_v31 = vcombine.low %v2006_v51, %v2013_v13  ;;  %v8829_v13 = vrot.slane %v7757_v42, 7  ;;  %v5389_v51 = vpop.f32.mrf.mxu1 }
 0x225   :  { %v2744_v2 = vsel %vm6053_vm9, %v7169_v3, %v9161_v17  ;;  %v9162_v45 = vmov %v9161_v17  ;;  %v3240_v29 = vcombine.low %v3232_v49, %v3239_v53  ;;  %v2030_v3 = vrot.slane %v2016_v24, %v6035_v48 }
 0x226   :  { %v2745_v63 = vrot.slane %v9162_v45, 2  ;;  %5432 = vmatmul.mubr.msk.f32.gmra.mxu0 %vm161_vm0, %v2014_v31  ;;  %v9163_v17 = vrot.slane %v7285_v35, 7  ;;  %v9164_v49 = vrot.slane %v7310_v62, 7  ;;  %v7792_v31 = vcombine.high %v7769_v5, %v7769_v5 }
 0x227   :  { %5484 = vmatprep.mubr.msk.f32.mxu1 %vm161_vm0, %v3240_v29  ;;  %v7798_v45 = vrot.slane %v8829_v13, 2  ;;  %v2031_v1 = vcombine.low %v7394_v37, %v2030_v3  ;;  %v9167_v29 = vld [vmem:[#allocation111_spill] sm:$0xff]  ;;  %v9168_v35 = vrot.slane %v7228_v40, 7  ;;  %v946_v3 = vpop.f32.mrf.mxu1  ;;  %v1586_v13 = vcombine.high %v5389_v51, %v5389_v51 }
 0x228   :  { %v2747_v53 = vsel %vm6053_vm9, %v2745_v63, %v9163_v17  ;;  %v2750_v20 = vsel %vm6053_vm9, %v7330_v21, %v9164_v49  ;;  %v8833_v63 = vrot.slane %v7773_v33, 7  ;;  %v9165_v21 = vld [vmem:[#allocation78_spill] sm:$0xff]  ;;  %v9169_v17 = vrot.slane %v7324_v46, 9 }
 0x229   :  { %v9166_v49 = vrot.slane %v9165_v21, 7  ;;  %v3241_v39 = vcombine.low %v2744_v2, %v2747_v53  ;;  %v9170_v21 = vrot.slane %v7769_v5, 7  ;;  %5434 = vmatprep.mubr.msk.f32.mxu0 %vm161_vm0, %v2031_v1  ;;  %v9171_v53 = vrot.slane %v7244_v18, 7 }
 0x22a   :  { %v7810_v24 = vrot.slane %v8833_v63, 2  ;;  %v2757_v37 = vsel %vm6053_vm9, %v9169_v17, %v9168_v35  ;;  %v9173_v46 = vrot.slane %v7238_v59, 7  ;;  %v7842_v18 = vrot.slane %v5389_v51, %v6035_v48 }
 0x22b   :  { %v2753_v8 = vsel %vm6053_vm9, %v9167_v29, %v9166_v49  ;;  %v7821_v47 = vrot.slane %v9170_v21, 2  ;;  %v3249_v2 = vrot.slane %v3241_v39, %v6035_v48  ;;  %v9172_v49 = vld [vmem:[#allocation107_spill] sm:$0xff]  ;;  %v9175_v21 = vrot.slane %v7259_v16, 7  ;;  %v9176_v29 = vld [vmem:[#allocation108_spill] sm:$0xff]  ;;  %v9185_v16 = vld [vmem:[#allocation121_spill] sm:$0xff] }
 0x22c   :  { %v3242_v62 = vcombine.low %v2750_v20, %v2753_v8  ;;  %v2760_v8 = vsel %vm6053_vm9, %v9172_v49, %v9171_v53  ;;  %v9174_v20 = vld [vmem:[#allocation109_spill] sm:$0xff]  ;;  %v1569_v53 = vcombine.high %v946_v3, %v946_v3  ;;  %v7845_v49 = vrot.slane %v946_v3, %v6035_v48 }
 0x22d   :  { %v2763_v35 = vsel %vm6053_vm9, %v9174_v20, %v9173_v46  ;;  %v2766_v39 = vsel %vm6053_vm9, %v9176_v29, %v9175_v21  ;;  %v3258_v1 = vcombine.low %v2757_v37, %v2760_v8  ;;  %v9177_v20 = vmov %v9175_v21 }
 0x22e   :  { %v3256_v17 = vrot.slane %v3242_v62, %v6035_v48  ;;  %v3259_v63 = vcombine.low %v2763_v35, %v2766_v39  ;;  %v7849_v62 = vrot.slane %v1586_v13, %v6035_v48  ;;  %v2767_v59 = vrot.slane %v9177_v20, 2 }
 0x22f   :  { %v3266_v46 = vrot.slane %v3258_v1, %v6035_v48  ;;  %v7856_v8 = vcombine.high %v7842_v18, %v7842_v18  ;;  %v8838_v51 = vrot.slane %v7842_v18, 7  ;;  %v7860_v3 = vrot.slane %v1569_v53, %v6035_v48 }
 0x230   :  { %v3257_v40 = vcombine.low %v3249_v2, %v3256_v17  ;;  %v3273_v37 = vrot.slane %v3259_v63, %v6035_v48  ;;  %v7865_v13 = vcombine.high %v7849_v62, %v7849_v62  ;;  %v8837_v2 = vrot.slane %v7849_v62, 7 }
 0x231   :  { %v7870_v63 = vcombine.high %v7845_v49, %v7845_v49  ;;  %v7876_v21 = vrot.slane %v8838_v51, 2  ;;  %v7888_v53 = vcombine.high %v7860_v3, %v7860_v3  ;;  %v9183_v35 = vrot.slane %v7411_v22, 7  ;;  %v9190_v22 = vld [vmem:[#allocation123_spill] sm:$0xff] }
 0x232   :  { %5485 = vmatmul.mubr.msk.f32.gmra.mxu1 %vm161_vm0, %v3257_v40  ;;  %9178 = vst [vmem:[#allocation85_spill] sm:$0xff] %v7865_v13  ;;  %v3274_v17 = vcombine.low %v3266_v46, %v3273_v37  ;;  %v8839_v40 = vrot.slane %v7856_v8, 7  ;;  %v7883_v39 = vrot.slane %v8837_v2, 2  ;;  %v8841_v46 = vrot.slane %v7845_v49, 7  ;;  %v9193_v13 = vld [vmem:[#allocation122_spill] sm:$0xff] }
 0x233   :  { %9179 = vst [vmem:[#allocation43_spill] sm:$0xff] %v7876_v21  ;;  %v8846_v37 = vrot.slane %v7870_v63, 7  ;;  %v9189_v51 = vrot.slane %v7420_v15, 7  ;;  %v9195_v21 = vrot.slane %v7363_v52, 7 }
 0x234   :  { %9180 = vst [vmem:[#allocation84_spill] sm:$0xff] %v7883_v39  ;;  %5487 = vmatprep.mubr.msk.f32.mxu1 %vm161_vm0, %v3274_v17  ;;  %v7894_v20 = vrot.slane %v8839_v40, 2  ;;  %v7902_v1 = vrot.slane %v8841_v46, 2  ;;  %v2769_v17 = vsel %vm6053_vm9, %v2767_v59, %v9183_v35  ;;  %v9184_v40 = vrot.slane %v7429_v23, 7  ;;  %v9191_v35 = vld [vmem:[#allocation119_spill] sm:$0xff] }
 0x235   :  { %v7916_v2 = vrot.slane %v8846_v37, 2  ;;  %v9187_v46 = vrot.slane %v7860_v3, 7  ;;  %v2775_v59 = vsel %vm6053_vm9, %v9190_v22, %v9189_v51  ;;  %v9192_v23 = vrot.slane %v9191_v35, 7  ;;  %v9198_v35 = vld [vmem:[#allocation114_spill] sm:$0xff] }
 0x236   :  { %9181 = vst [vmem:[#allocation82_spill] sm:$0xff] %v7894_v20  ;;  %9182 = vst [vmem:[#allocation92_spill] sm:$0xff] %v7902_v1  ;;  %v2772_v29 = vsel %vm6053_vm9, %v9185_v16, %v9184_v40  ;;  %v2033_v37 = vcombine.low %v7534_v4, %v7548_v30  ;;  %v9197_v51 = vrot.slane %v7386_v6, 7  ;;  %v9203_v1 = vrot.slane %v7520_v19, 7 }
 0x237   :  { %9186 = vst [vmem:[#allocation93_spill] sm:$0xff] %v7916_v2  ;;  %v7920_v39 = vrot.slane %v9187_v46, 2  ;;  %v2778_v16 = vsel %vm6053_vm9, %v9193_v13, %v9192_v23  ;;  %v3275_v40 = vcombine.low %v2769_v17, %v2772_v29  ;;  %v9194_v46 = vcombine.low %v7520_v19, %v7538_v11  ;;  %v9200_v17 = vld [vmem:[#allocation120_spill] sm:$0xff] }
 0x238   :  { %v3276_v20 = vcombine.low %v2775_v59, %v2778_v16  ;;  %v2788_v23 = vsel %vm6053_vm9, %v9198_v35, %v9197_v51  ;;  %v9199_v13 = vmov %v9197_v51  ;;  %v9201_v59 = vcombine.low %v9200_v17, %v7442_v25 }
 0x239   :  { %9188 = vst [vmem:[#allocation111_spill] sm:$0xff] %v7920_v39  ;;  %v2040_v15 = vrot.slane %v9194_v46, %v6035_v48  ;;  %v9196_v39 = vld [vmem:[#allocation113_spill] sm:$0xff]  ;;  %v2789_v29 = vrot.slane %v9199_v13, 2  ;;  %v3283_v46 = vrot.slane %v3275_v40, %v6035_v48  ;;  %v9204_v51 = vcombine.low %v7462_v54, %v7646_v32 }
 0x23a   :  { %v2785_v22 = vsel %vm6053_vm9, %v9196_v39, %v9195_v21  ;;  %v2057_v16 = vrot.slane %v9201_v59, %v6035_v48  ;;  %v3290_v52 = vrot.slane %v3276_v20, %v6035_v48  ;;  %v2047_v21 = vrot.slane %v2033_v37, %v6035_v48  ;;  %v9202_v39 = vld [vmem:[#allocation79_spill] sm:$0xff] }
 0x23b   :  { %v3292_v2 = vcombine.low %v9202_v39, %v2785_v22  ;;  %v2791_v35 = vsel %vm6053_vm9, %v2789_v29, %v9203_v1  ;;  %v2064_v13 = vrot.slane %v9204_v51, %v6035_v48  ;;  %v2066_v59 = vcombine.low %v7664_v56, %v7660_v34 }
 0x23c   :  { %v2067_v20 = vcombine.low %v7675_v12, %v7544_v26  ;;  %v3291_v40 = vcombine.low %v3283_v46, %v3290_v52  ;;  %v2048_v37 = vcombine.low %v2040_v15, %v2047_v21  ;;  %v3293_v6 = vcombine.low %v2788_v23, %v2791_v35 }
 0x23d   :  { %v3300_v22 = vrot.slane %v3292_v2, %v6035_v48  ;;  %v2065_v39 = vcombine.low %v2057_v16, %v2064_v13  ;;  %v2074_v19 = vrot.slane %v2066_v59, %v6035_v48  ;;  %v9205_v29 = vrot.slane %v7538_v11, 7 }
 0x23e   :  { %v2081_v1 = vrot.slane %v2067_v20, %v6035_v48  ;;  %5488 = vmatmul.mubr.msk.f32.gmra.mxu1 %vm161_vm0, %v3291_v40  ;;  %5435 = vmatmul.mubr.msk.f32.gmra.mxu0 %vm161_vm0, %v2048_v37  ;;  %v3307_v52 = vrot.slane %v3293_v6, %v6035_v48  ;;  %v9206_v15 = vrot.slane %v7534_v4, 7  ;;  %v9207_v23 = vrot.slane %v7548_v30, 7  ;;  %v9211_v40 = vld [vmem:[#allocation117_spill] sm:$0xff] }
 0x23f   :  { %v2794_v51 = vsel %vm6053_vm9, %v7554_v0, %v9205_v29  ;;  %5437 = vmatprep.mubr.msk.f32.mxu0 %vm161_vm0, %v2065_v39  ;;  %v9209_v6 = vcombine.low %v7560_v61, %v7591_v28  ;;  %v9213_v39 = vrot.slane %v7442_v25, 7  ;;  %v9215_v29 = vrot.slane %v7462_v54, 7 }
 0x240   :  { %v2797_v2 = vsel %vm6053_vm9, %v7583_v7, %v9206_v15  ;;  %v2800_v16 = vsel %vm6053_vm9, %v7587_v44, %v9207_v23  ;;  %v9208_v0 = vmov %v9207_v23  ;;  %v2082_v21 = vcombine.low %v2074_v19, %v2081_v1 }
 0x241   :  { %v2801_v46 = vrot.slane %v9208_v0, 2  ;;  %v3309_v35 = vcombine.low %v2794_v51, %v2797_v2  ;;  %v2091_v13 = vrot.slane %v9209_v6, %v6035_v48  ;;  %v9210_v7 = vcombine.low %v7757_v42, %v7773_v33  ;;  %v9216_v51 = vld [vmem:[#allocation86_spill] sm:$0xff] }
 0x242   :  { %v3308_v20 = vcombine.low %v3300_v22, %v3307_v52  ;;  %v9212_v44 = vrot.slane %v9211_v40, 7  ;;  %v9214_v19 = vrot.slane %v9200_v17, 9  ;;  %v2810_v15 = vsel %vm6053_vm9, %v9216_v51, %v9215_v29  ;;  %5438 = vmatmul.mubr.msk.f32.gmra.mxu0 %vm161_vm0, %v2082_v21 }
 0x243   :  { %v2098_v59 = vrot.slane %v9210_v7, %v6035_v48  ;;  %v3317_v22 = vrot.slane %v3309_v35, %v6035_v48  ;;  %v9217_v23 = vmov %v9215_v29  ;;  %v9218_v17 = vrot.slane %v7664_v56, 7 }
 0x244   :  { %v2803_v37 = vsel %vm6053_vm9, %v2801_v46, %v9212_v44  ;;  %v2807_v1 = vsel %vm6053_vm9, %v9214_v19, %v9213_v39  ;;  %v2811_v0 = vrot.slane %v9217_v23, 2  ;;  %5490 = vmatprep.mubr.msk.f32.mxu1 %vm161_vm0, %v3308_v20  ;;  %v9219_v35 = vrot.slane %v7675_v12, 7 }
 0x245   :  { %v3310_v2 = vcombine.low %v2800_v16, %v2803_v37  ;;  %v2099_v52 = vcombine.low %v2091_v13, %v2098_v59  ;;  %v2816_v46 = vsel %vm6053_vm9, %v7681_v9, %v9218_v17  ;;  %v3326_v6 = vcombine.low %v2807_v1, %v2810_v15 }
 0x246   :  { %v2100_v16 = vcombine.low %v7769_v5, %v7792_v31  ;;  %v2823_v13 = vrot.slane %v9219_v35, 2  ;;  %v9220_v59 = vrot.slane %v7646_v32, 7  ;;  %v9221_v9 = vcombine.low %v7686_v14, %v7703_v50 }
 0x247   :  { %v3324_v7 = vrot.slane %v3310_v2, %v6035_v48  ;;  %5440 = vmatprep.mubr.msk.f32.mxu0 %vm161_vm0, %v2099_v52  ;;  %v9222_v44 = vrot.slane %v7660_v34, 7  ;;  %v3334_v19 = vrot.slane %v3326_v6, %v6035_v48  ;;  %v9223_v29 = vmov %v9219_v35 }
 0x248   :  { %v2813_v21 = vsel %vm6053_vm9, %v2811_v0, %v9220_v59  ;;  %v2115_v20 = vrot.slane %v9221_v9, %v6035_v48  ;;  %v2108_v1 = vrot.slane %v2100_v16, %v6035_v48  ;;  %v2822_v51 = vsel %vm6053_vm9, %v7694_v41, %v9223_v29 }
 0x249   :  { %v2819_v37 = vsel %vm6053_vm9, %v7690_v43, %v9222_v44  ;;  %v3327_v39 = vcombine.low %v2813_v21, %v2816_v46  ;;  %v3325_v15 = vcombine.low %v3317_v22, %v3324_v7  ;;  %v9224_v2 = vrot.slane %v7544_v26, 7 }
 0x24a   :  { %v9225_v23 = vrot.slane %v7564_v60, 7  ;;  %v3343_v0 = vcombine.low %v2819_v37, %v2822_v51  ;;  %v2116_v46 = vcombine.low %v2108_v1, %v2115_v20  ;;  %v2118_v41 = vcombine.low %v7870_v63, %v7860_v3 }
 0x24b   :  { %v2825_v52 = vsel %vm6053_vm9, %v2823_v13, %v9224_v2  ;;  %v3341_v17 = vrot.slane %v3327_v39, %v6035_v48  ;;  %5491 = vmatmul.mubr.msk.f32.gmra.mxu1 %vm161_vm0, %v3325_v15  ;;  %v9226_v16 = vcombine.low %v7732_v36, %v7845_v49  ;;  %v9227_v13 = vrot.slane %v7591_v28, 7 }
 0x24c   :  { %v2828_v43 = vsel %vm6053_vm9, %v7596_v10, %v9225_v23  ;;  %v3351_v22 = vrot.slane %v3343_v0, %v6035_v48  ;;  %v9228_v10 = vrot.slane %v7560_v61, 9  ;;  %v9229_v59 = vrot.slane %v7757_v42, 7  ;;  %5441 = vmatmul.mubr.msk.f32.gmra.mxu0 %vm161_vm0, %v2116_v46 }
 0x24d   :  { %v3344_v6 = vcombine.low %v2825_v52, %v2828_v43  ;;  %v2125_v35 = vrot.slane %v9226_v16, %v6035_v48  ;;  %v3342_v9 = vcombine.low %v3334_v19, %v3341_v17  ;;  %v2132_v44 = vrot.slane %v2118_v41, %v6035_v48 }
 0x24e   :  { %v2832_v7 = vsel %vm6053_vm9, %v9228_v10, %v9227_v13  ;;  %v2835_v21 = vsel %vm6053_vm9, %v7628_v38, %v9229_v59  ;;  %v9230_v37 = vrot.slane %v7773_v33, 7  ;;  %v9231_v39 = vrot.slane %v7769_v5, 7 }
 0x24f   :  { %v3358_v20 = vrot.slane %v3344_v6, %v6035_v48  ;;  %v3360_v38 = vcombine.low %v2832_v7, %v2835_v21  ;;  %v2134_v19 = vcombine.low %v7888_v53, %v7842_v18  ;;  %v2135_v29 = vcombine.low %v7856_v8, %v7849_v62  ;;  %5493 = vmatprep.mubr.msk.f32.mxu1 %vm161_vm0, %v3342_v9  ;;  %v9238_v21 = vld [vmem:[#allocation7_spill] sm:$0xff] }
 0x250   :  { %v2838_v61 = vsel %vm6053_vm9, %v7798_v45, %v9230_v37  ;;  %v2841_v1 = vsel %vm6053_vm9, %v7810_v24, %v9231_v39  ;;  %v2133_v15 = vcombine.low %v2125_v35, %v2132_v44  ;;  %v9232_v45 = vrot.slane %v7792_v31, 7  ;;  %v9239_v9 = vld [vmem:[#allocation11_spill] sm:$0xff]  ;;  %v9240_v37 = vld [vmem:[#allocation9_spill] sm:$0xff] }
 0x251   :  { %v3359_v51 = vcombine.low %v3351_v22, %v3358_v20  ;;  %v3361_v2 = vcombine.low %v2838_v61, %v2841_v1  ;;  %v3368_v24 = vrot.slane %v3360_v38, %v6035_v48  ;;  %v2142_v23 = vrot.slane %v2134_v19, %v6035_v48  ;;  %v9241_v61 = vld [vmem:[#allocation8_spill] sm:$0xff] }
 0x252   :  { %v2844_v52 = vsel %vm6053_vm9, %v7821_v47, %v9232_v45  ;;  %v2149_v43 = vrot.slane %v2135_v29, %v6035_v48  ;;  %v9233_v0 = vmov %v9232_v45  ;;  %5443 = vmatprep.mubr.msk.f32.mxu0 %vm161_vm0, %v2133_v15  ;;  %v9234_v6 = vrot.slane %v7703_v50, 7 }
 0x253   :  { %v2845_v17 = vrot.slane %v9233_v0, 2  ;;  %5494 = vmatmul.mubr.msk.f32.gmra.mxu1 %vm161_vm0, %v3359_v51  ;;  %v3375_v46 = vrot.slane %v3361_v2, %v6035_v48  ;;  %v9235_v41 = vrot.slane %v7699_v55, 7  ;;  %v9236_v16 = vrot.slane %v7888_v53, 7  ;;  %v9246_v2 = vld [vmem:[#allocation92_spill] sm:$0xff]  ;;  %v9250_v0 = vld [vmem:[#allocation111_spill] sm:$0xff] }
 0x254   :  { %v2850_v47 = vsel %vm6053_vm9, %v7738_v27, %v9234_v6  ;;  %v2150_v13 = vcombine.low %v2142_v23, %v2149_v43  ;;  %v9237_v10 = vrot.slane %v7686_v14, 7  ;;  %v3755_v20 = vcombine.low %v9239_v9, %v9238_v21 }
 0x255   :  { %v2853_v22 = vsel %vm6053_vm9, %v7746_v58, %v9235_v41  ;;  %v2867_v35 = vrot.slane %v9236_v16, 2  ;;  %v3376_v27 = vcombine.low %v3368_v24, %v3375_v46  ;;  %v9242_v39 = vcombine.low %v9240_v37, %v9241_v61  ;;  %v9248_v24 = vld [vmem:[#allocation93_spill] sm:$0xff] }
 0x256   :  { %v2847_v7 = vsel %vm6053_vm9, %v2845_v17, %v9237_v10  ;;  %v3378_v59 = vcombine.low %v2850_v47, %v2853_v22  ;;  %v9243_v1 = vrot.slane %v7845_v49, 7  ;;  %v9244_v38 = vrot.slane %v7732_v36, 9  ;;  %5444 = vmatmul.mubr.msk.f32.gmra.mxu0 %vm161_vm0, %v2150_v13  ;;  %v9253_v13 = vld [vmem:[#allocation43_spill] sm:$0xff] }
 0x257   :  { %v3377_v44 = vcombine.low %v2844_v52, %v2847_v7  ;;  %v3762_v58 = vrot.slane %v9242_v39, %v6035_v48  ;;  %v3769_v51 = vrot.slane %v3755_v20, %v6035_v48  ;;  %v9245_v15 = vrot.slane %v7870_v63, 7  ;;  %5496 = vmatprep.mubr.msk.f32.mxu1 %vm161_vm0, %v3376_v27  ;;  %v9256_v27 = vld [vmem:[#allocation85_spill] sm:$0xff] }
 0x258   :  { %v2857_v19 = vsel %vm6053_vm9, %v9244_v38, %v9243_v1  ;;  %v3392_v29 = vrot.slane %v3378_v59, %v6035_v48  ;;  %v9247_v52 = vrot.slane %v7860_v3, 7  ;;  %v9249_v43 = vmov %v9236_v16  ;;  %v9255_v59 = vld [vmem:[#allocation82_spill] sm:$0xff]  ;;  %v9259_v1 = vld [vmem:[#allocation16_spill] sm:$0xff]  ;;  %v9260_v38 = vld [vmem:[#allocation15_spill] sm:$0xff] }
 0x259   :  { %v2860_v45 = vsel %vm6053_vm9, %v9246_v2, %v9245_v15  ;;  %v3385_v23 = vrot.slane %v3377_v44, %v6035_v48  ;;  %v2866_v17 = vsel %vm6053_vm9, %v9250_v0, %v9249_v43  ;;  %v9251_v6 = vrot.slane %v7842_v18, 7  ;;  %v9269_v0 = vld [vmem:[#allocation21_spill] sm:$0xff] }
 0x25a   :  { %v2863_v36 = vsel %vm6053_vm9, %v9248_v24, %v9247_v52  ;;  %v3394_v46 = vcombine.low %v2857_v19, %v2860_v45  ;;  %v3770_v41 = vcombine.low %v3762_v58, %v3769_v51  ;;  %v9252_v16 = vrot.slane %v7856_v8, 7  ;;  %v9261_v51 = vld [vmem:[#allocation10_spill] sm:$0xff]  ;;  %v9264_v45 = vld [vmem:[#allocation17_spill] sm:$0xff]  ;;  %v9265_v52 = vld [vmem:[#allocation19_spill] sm:$0xff] }
 0x25b   :  { %v2869_v47 = vsel %vm6053_vm9, %v2867_v35, %v9251_v6  ;;  %v3395_v22 = vcombine.low %v2863_v36, %v2866_v17  ;;  %v9254_v7 = vrot.slane %v7849_v62, 7  ;;  %v3393_v9 = vcombine.low %v3385_v23, %v3392_v29  ;;  %v9258_v35 = vld [vmem:[#allocation84_spill] sm:$0xff]  ;;  %v9262_v29 = vld [vmem:[#allocation13_spill] sm:$0xff]  ;;  %v9267_v36 = vld [vmem:[#allocation14_spill] sm:$0xff] }
 0x25c   :  { %v2872_v10 = vsel %vm6053_vm9, %v9253_v13, %v9252_v16  ;;  %v3402_v20 = vrot.slane %v3394_v46, %v6035_v48  ;;  %v9257_v44 = vrot.slane %v9256_v27, 7  ;;  %5510 = vmatprep.mubr.msk.f32.mxu0 %vm161_vm0, %v3770_v41  ;;  %v3788_v19 = vcombine.low %v9260_v38, %v9259_v1  ;;  %v9268_v23 = vld [vmem:[#allocation12_spill] sm:$0xff]  ;;  %v9272_v16 = vld [vmem:[#allocation18_spill] sm:$0xff]  ;;  %v9273_v13 = vld [vmem:[#allocation25_spill] sm:$0xff] }
 0x25d   :  { %v2875_v21 = vsel %vm6053_vm9, %v9255_v59, %v9254_v7  ;;  %v3411_v61 = vcombine.low %v2869_v47, %v2872_v10  ;;  %v3409_v39 = vrot.slane %v3395_v22, %v6035_v48  ;;  %v9263_v15 = vcombine.low %v9261_v51, %v9262_v29  ;;  %5497 = vmatmul.mubr.msk.f32.gmra.mxu1 %vm161_vm0, %v3393_v9  ;;  %v9270_v17 = vld [vmem:[#allocation24_spill] sm:$0xff]  ;;  %v9282_v29 = vld [vmem:[#allocation30_spill] sm:$0xff] }
 0x25e   :  { %v2878_v37 = vsel %vm6053_vm9, %v9258_v35, %v9257_v44  ;;  %v9266_v57 = vcombine.low %v9264_v45, %v9265_v52  ;;  %v3805_v43 = vcombine.low %v9268_v23, %v9267_v36  ;;  %v9271_v46 = vcombine.low %v9269_v0, %v9270_v17  ;;  %v9274_v59 = vld [vmem:[#allocation20_spill] sm:$0xff]  ;;  %v9276_v44 = vld [vmem:[#allocation23_spill] sm:$0xff] }
 0x25f   :  { %v3412_v58 = vcombine.low %v2875_v21, %v2878_v37  ;;  %v3803_v2 = vrot.slane %v9263_v15, %v6035_v48  ;;  %v3419_v24 = vrot.slane %v3411_v61, %v6035_v48  ;;  %v3410_v47 = vcombine.low %v3402_v20, %v3409_v39  ;;  %v9275_v21 = vld [vmem:[#allocation22_spill] sm:$0xff]  ;;  %v9277_v35 = vld [vmem:[#allocation28_spill] sm:$0xff]  ;;  %v9280_v20 = vld [vmem:[#allocation31_spill] sm:$0xff] }
 0x260   :  { %5511 = vmatmul.mubr.msk.f32.vlgmr.msra.gmra.mxu0 %vm161_vm0, %v9266_v57  ;;  %v3820_v6 = vrot.slane %v9271_v46, %v6035_v48  ;;  %v3796_v22 = vrot.slane %v3788_v19, %v6035_v48  ;;  %v3822_v10 = vcombine.low %v9273_v13, %v9272_v16  ;;  %v3813_v7 = vrot.slane %v3805_v43, %v6035_v48  ;;  %v9279_v1 = vld [vmem:[#allocation32_spill] sm:$0xff]  ;;  %v9283_v15 = vld [vmem:[#allocation27_spill] sm:$0xff] }
 0x261   :  { %v3426_v41 = vrot.slane %v3412_v58, %v6035_v48  ;;  %v3823_v9 = vcombine.low %v9275_v21, %v9274_v59  ;;  %v9278_v37 = vcombine.low %v9276_v44, %v9277_v35  ;;  %v9281_v39 = vcombine.low %v9279_v1, %v9280_v20  ;;  %5499 = vmatprep.mubr.msk.f32.mxu1 %vm161_vm0, %v3410_v47  ;;  %v9284_v43 = vld [vmem:[#allocation44_spill] sm:$0xff]  ;;  %v9295_v35 = vld [vmem:[#allocation50_spill] sm:$0xff] }
 0x262   :  { %v3804_v19 = vcombine.low %v3796_v22, %v3803_v2  ;;  %v3830_v51 = vrot.slane %v3822_v10, %v6035_v48  ;;  %v3857_v45 = vcombine.low %v9283_v15, %v9282_v29  ;;  %v3821_v52 = vcombine.low %v3813_v7, %v3820_v6  ;;  %v9285_v0 = vld [vmem:[#allocation40_spill] sm:$0xff]  ;;  %v9290_v22 = vld [vmem:[#allocation54_spill] sm:$0xff]  ;;  %v9293_v7 = vld [vmem:[#allocation29_spill] sm:$0xff] }
 0x263   :  { %v3847_v61 = vrot.slane %v9278_v37, %v6035_v48  ;;  %v3854_v58 = vrot.slane %v9281_v39, %v6035_v48  ;;  %v3427_v38 = vcombine.low %v3419_v24, %v3426_v41  ;;  %v3837_v57 = vrot.slane %v3823_v9, %v6035_v48  ;;  %v9286_v24 = vld [vmem:[#allocation37_spill] sm:$0xff]  ;;  %v9287_v46 = vld [vmem:[#allocation36_spill] sm:$0xff]  ;;  %v9289_v41 = vld [vmem:[#allocation39_spill] sm:$0xff] }
 0x264   :  { %5513 = vmatprep.mubr.msk.f32.mxu0 %vm161_vm0, %v3804_v19  ;;  %v3871_v23 = vrot.slane %v3857_v45, %v6035_v48  ;;  %v3874_v17 = vcombine.low %v9285_v0, %v9284_v43  ;;  %v9288_v47 = vcombine.low %v9286_v24, %v9287_v46  ;;  %v9291_v16 = vcombine.low %v9289_v41, %v9290_v22  ;;  %v9292_v10 = vld [vmem:[#allocation26_spill] sm:$0xff]  ;;  %v9298_v39 = vld [vmem:[#allocation41_spill] sm:$0xff]  ;;  %v9300_v19 = vld [vmem:[#allocation55_spill] sm:$0xff] }
 0x265   :  { %v3855_v36 = vcombine.low %v3847_v61, %v3854_v58  ;;  %5500 = vmatmul.mubr.msk.f32.gmra.mxu1 %vm161_vm0, %v3427_v38  ;;  %5514 = vmatmul.mubr.msk.f32.gmra.mxu0 %vm161_vm0, %v3821_v52  ;;  %v3838_v2 = vcombine.low %v3830_v51, %v3837_v57  ;;  %v9294_v59 = vcombine.low %v9292_v10, %v9293_v7  ;;  %v9296_v37 = vld [vmem:[#allocation58_spill] sm:$0xff]  ;;  %v9301_v51 = vld [vmem:[#allocation57_spill] sm:$0xff]  ;;  %v9302_v15 = vld [vmem:[#allocation52_spill] sm:$0xff] }
 0x266   :  { %v3898_v6 = vrot.slane %v9288_v47, %v6035_v48  ;;  %v3905_v13 = vrot.slane %v9291_v16, %v6035_v48  ;;  %v3888_v9 = vrot.slane %v3874_v17, %v6035_v48  ;;  %v3908_v61 = vcombine.low %v9296_v37, %v9295_v35  ;;  %v9297_v20 = vld [vmem:[#allocation38_spill] sm:$0xff]  ;;  %v9303_v45 = vld [vmem:[#allocation51_spill] sm:$0xff]  ;;  %v9304_v0 = vld [vmem:[#allocation64_spill] sm:$0xff] }
 0x267   :  { %v3864_v21 = vrot.slane %v9294_v59, %v6035_v48  ;;  %5516 = vmatprep.mubr.msk.f32.mxu0 %vm161_vm0, %v3838_v2  ;;  %v9299_v58 = vcombine.low %v9297_v20, %v9298_v39  ;;  %v3907_v29 = vcombine.low %v9301_v51, %v9300_v19  ;;  %v3924_v52 = vcombine.low %v9303_v45, %v9302_v15  ;;  %v9307_v2 = vld [vmem:[#allocation63_spill] sm:$0xff]  ;;  %v9309_v47 = vld [vmem:[#allocation70_spill] sm:$0xff]  ;;  %v9311_v7 = vld [vmem:[#allocation65_spill] sm:$0xff] }
 0x268   :  { %v3906_v44 = vcombine.low %v3898_v6, %v3905_v13  ;;  %v3922_v43 = vrot.slane %v3908_v61, %v6035_v48  ;;  %v9310_v6 = vld [vmem:[#allocation71_spill] sm:$0xff]  ;;  %v9312_v59 = vld [vmem:[#allocation72_spill] sm:$0xff]  ;;  %v9314_v61 = vld [vmem:[#allocation34_spill] sm:$0xff] }
 0x269   :  { %v3872_v1 = vcombine.low %v3864_v21, %v3871_v23  ;;  %5517 = vmatmul.mubr.msk.f32.gmra.mxu0 %vm161_vm0, %v3855_v36  ;;  %v3881_v38 = vrot.slane %v9299_v58, %v6035_v48  ;;  %v9305_v23 = vld [vmem:[#allocation62_spill] sm:$0xff]  ;;  %v9306_v36 = vld [vmem:[#allocation61_spill] sm:$0xff]  ;;  %v3959_v41 = vcombine.low %v9310_v6, %v9309_v47  ;;  %v3915_v22 = vrot.slane %v3907_v29, %v6035_v48  ;;  %v9313_v37 = vld [vmem:[#allocation76_spill] sm:$0xff] }
 0x26a   :  { %v3941_v17 = vcombine.low %v9305_v23, %v9304_v0  ;;  %v9308_v24 = vcombine.low %v9306_v36, %v9307_v2  ;;  %v3932_v16 = vrot.slane %v3924_v52, %v6035_v48  ;;  %v3975_v21 = vcombine.low %v9312_v59, %v9311_v7  ;;  %v9315_v20 = vld [vmem:[#allocation56_spill] sm:$0xff]  ;;  %v9316_v39 = vld [vmem:[#allocation59_spill] sm:$0xff]  ;;  %v9319_v19 = vld [vmem:[#allocation69_spill] sm:$0xff] }
 0x26b   :  { %5519 = vmatprep.mubr.msk.f32.mxu0 %vm161_vm0, %v3872_v1  ;;  %v3889_v57 = vcombine.low %v3881_v38, %v3888_v9  ;;  %v3923_v13 = vcombine.low %v3915_v22, %v3922_v43  ;;  %v3973_v35 = vrot.slane %v3959_v41, %v6035_v48  ;;  %v3993_v1 = vcombine.low %v9314_v61, %v9313_v37  ;;  %v9318_v38 = vld [vmem:[#allocation60_spill] sm:$0xff]  ;;  %v9322_v45 = vld [vmem:[#allocation110_spill] sm:$0xff]  ;;  %v9330_v41 = vld [vmem:[#allocation83_spill] sm:$0xff] }
 0x26c   :  { %v3939_v46 = vrot.slane %v9308_v24, %v6035_v48  ;;  %v3949_v10 = vrot.slane %v3941_v17, %v6035_v48  ;;  %v9320_v51 = vcombine.low %v9318_v38, %v9319_v19  ;;  %v9321_v15 = vld [vmem:[#allocation100_spill] sm:$0xff]  ;;  %v9325_v0 = vld [vmem:[#allocation78_spill] sm:$0xff]  ;;  %v3983_v2 = vrot.slane %v3975_v21, %v6035_v48  ;;  %v9331_v59 = vld [vmem:[#allocation67_spill] sm:$0xff] }
 0x26d   :  { %5520 = vmatmul.mubr.msk.f32.gmra.mxu0 %vm161_vm0, %v3889_v57  ;;  %v9323_v52 = vcombine.low %v9321_v15, %v9322_v45  ;;  %v9324_v43 = vld [vmem:[#allocation80_spill] sm:$0xff]  ;;  %v9327_v24 = vld [vmem:[#allocation74_spill] sm:$0xff]  ;;  %v9335_v61 = vld [vmem:[#allocation75_spill] sm:$0xff] }
 0x26e   :  { %5522 = vmatprep.mubr.msk.f32.mxu0 %vm161_vm0, %v3906_v44  ;;  %v3940_v9 = vcombine.low %v3932_v16, %v3939_v46  ;;  %v9317_v44 = vcombine.low %v9315_v20, %v9316_v39  ;;  %v3966_v29 = vrot.slane %v9320_v51, %v6035_v48  ;;  %v9326_v23 = vcombine.low %v9324_v43, %v9325_v0  ;;  %v9328_v46 = vld [vmem:[#allocation33_spill] sm:$0xff]  ;;  %v9329_v6 = vld [vmem:[#allocation48_spill] sm:$0xff]  ;;  %v9340_v38 = vld [vmem:[#allocation42_spill] sm:$0xff] }
 0x26f   :  { %v8286_v57 = vrot.slane %v9323_v52, %v6035_v48  ;;  %v4010_v47 = vcombine.low %v9328_v46, %v9327_v24  ;;  %v4027_v22 = vcombine.low %v9330_v41, %v9329_v6  ;;  %v9334_v21 = vld [vmem:[#allocation112_spill] sm:$0xff]  ;;  %v9341_v19 = vld [vmem:[#allocation73_spill] sm:$0xff]  ;;  %v9346_v24 = vld [vmem:[#allocation35_spill] sm:$0xff] }
 0x270   :  { %v3956_v58 = vrot.slane %v9317_v44, %v6035_v48  ;;  %v8292_v17 = vrot.slane %v9326_v23, %v6035_v48  ;;  %v3974_v16 = vcombine.low %v3966_v29, %v3973_v35  ;;  %v9336_v20 = vcombine.low %v9334_v21, %v9335_v61  ;;  %v9337_v35 = vld [vmem:[#allocation77_spill] sm:$0xff]  ;;  %v9338_v44 = vld [vmem:[#allocation87_spill] sm:$0xff]  ;;  %v9343_v0 = vld [vmem:[#allocation96_spill] sm:$0xff] }
 0x271   :  { %5523 = vmatmul.mubr.msk.f32.gmra.mxu0 %vm161_vm0, %v3923_v13  ;;  %v4007_v13 = vrot.slane %v3993_v1, %v6035_v48  ;;  %v9339_v1 = vcombine.low %v9337_v35, %v9338_v44  ;;  %v9342_v51 = vcombine.low %v9340_v38, %v9341_v19  ;;  %v4024_v45 = vrot.slane %v4010_v47, %v6035_v48  ;;  %v9344_v23 = vld [vmem:[#allocation95_spill] sm:$0xff]  ;;  %v9349_v41 = vld [vmem:[#allocation46_spill] sm:$0xff] }
 0x272   :  { %5525 = vmatprep.mubr.msk.f32.mxu0 %vm161_vm0, %v3940_v9  ;;  %v3957_v36 = vcombine.low %v3949_v10, %v3956_v58  ;;  %v4127_v7 = vcombine.low %v8286_v57, %v8292_v17  ;;  %v9332_v9 = vld [vmem:[#allocation66_spill] sm:$0xff]  ;;  %v8311_v39 = vrot.slane %v9336_v20, %v6035_v48  ;;  %v4041_v52 = vrot.slane %v4027_v22, %v6035_v48  ;;  %v9351_v22 = vld [vmem:[#allocation49_spill] sm:$0xff] }
 0x273   :  { %v9333_v10 = vcombine.low %v9331_v59, %v9332_v9  ;;  %v8317_v58 = vrot.slane %v9339_v1, %v6035_v48  ;;  %v4000_v29 = vrot.slane %v9342_v51, %v6035_v48  ;;  %v4060_v17 = vcombine.low %v9344_v23, %v9343_v0  ;;  %v9352_v59 = vld [vmem:[#allocation47_spill] sm:$0xff]  ;;  %v9356_v1 = vld [vmem:[#allocation97_spill] sm:$0xff]  ;;  %v9365_v23 = vld [vmem:[#allocation98_spill] sm:$0xff] }
 0x274   :  { %v4043_v9 = vcombine.low %v9352_v59, %v9351_v22  ;;  %v4282_v35 = vcombine.low %v7849_v62, %v9256_v27  ;;  %v9358_v19 = vcombine.low %v7845_v49, %v7870_v63  ;;  %v9361_v27 = vcombine.low %v7842_v18, %v7856_v8  ;;  %v9362_v49 = vld [vmem:[#allocation88_spill] sm:$0xff]  ;;  %v9363_v63 = vld [vmem:[#allocation90_spill] sm:$0xff]  ;;  %v9371_v59 = vld [vmem:[#allocation105_spill] sm:$0xff] }
 0x275   :  { %5526 = vmatmul.mubr.msk.f32.gmra.mxu0 %vm161_vm0, %v3957_v36  ;;  %v3990_v37 = vrot.slane %v9333_v10, %v6035_v48  ;;  %v4178_v57 = vcombine.low %v8311_v39, %v8317_v58  ;;  %v4008_v43 = vcombine.low %v4000_v29, %v4007_v13  ;;  %v9345_v36 = vld [vmem:[#allocation45_spill] sm:$0xff]  ;;  %v4265_v13 = vcombine.low %v7860_v3, %v7888_v53  ;;  %v9357_v58 = vld [vmem:[#allocation103_spill] sm:$0xff]  ;;  %v9370_v22 = vld [vmem:[#allocation68_spill] sm:$0xff] }
 0x276   :  { %5528 = vmatprep.mubr.msk.f32.mxu0 %vm161_vm0, %v3974_v16  ;;  %v9347_v46 = vcombine.low %v9345_v36, %v9346_v24  ;;  %v9353_v10 = vld [vmem:[#allocation53_spill] sm:$0xff]  ;;  %v4068_v44 = vrot.slane %v4060_v17, %v6035_v48  ;;  %v4094_v38 = vcombine.low %v9357_v58, %v9356_v1  ;;  %v8357_v3 = vrot.slane %v9358_v19, %v6035_v48  ;;  %v9359_v29 = vld [vmem:[#allocation91_spill] sm:$0xff]  ;;  %v9375_v1 = vld [vmem:[#allocation106_spill] sm:$0xff] }
 0x277   :  { %v3991_v15 = vcombine.low %v3983_v2, %v3990_v37  ;;  %v9348_v2 = vld [vmem:[#allocation81_spill] sm:$0xff]  ;;  %v9354_v37 = vld [vmem:[#allocation94_spill] sm:$0xff]  ;;  %v4279_v53 = vrot.slane %v4265_v13, %v6035_v48  ;;  %v4051_v51 = vrot.slane %v4043_v9, %v6035_v48  ;;  %v9366_v17 = vld [vmem:[#allocation99_spill] sm:$0xff]  ;;  %v4129_v9 = vcombine.low %v9371_v59, %v9370_v22 }
 0x278   :  { %v4017_v6 = vrot.slane %v9347_v46, %v6035_v48  ;;  %v9350_v47 = vcombine.low %v9348_v2, %v9349_v41  ;;  %v9355_v21 = vcombine.low %v9353_v10, %v9354_v37  ;;  %v4095_v36 = vcombine.low %v9366_v17, %v9365_v23  ;;  %v9368_v2 = vld [vmem:[#allocation102_spill] sm:$0xff] }
 0x279   :  { %5529 = vmatmul.mubr.msk.f32.gmra.mxu0 %vm161_vm0, %v3991_v15  ;;  %v9360_v15 = vld [vmem:[#allocation89_spill] sm:$0xff]  ;;  %v4280_v24 = vcombine.low %v8357_v3, %v4279_v53  ;;  %v4180_v3 = vcombine.low %v7548_v30, %v9211_v40  ;;  %v4213_v30 = vcombine.low %v7660_v34, %v7675_v12  ;;  %v9380_v40 = vcombine.low %v7646_v32, %v7664_v56 }
 0x27a   :  { %v4034_v16 = vrot.slane %v9350_v47, %v6035_v48  ;;  %5531 = vmatprep.mubr.msk.f32.mxu0 %vm161_vm0, %v4008_v43  ;;  %v4058_v61 = vrot.slane %v9355_v21, %v6035_v48  ;;  %v4025_v20 = vcombine.low %v4017_v6, %v4024_v45  ;;  %v4077_v62 = vcombine.low %v9360_v15, %v9359_v29  ;;  %v9367_v6 = vld [vmem:[#allocation101_spill] sm:$0xff]  ;;  %v9372_v21 = vld [vmem:[#allocation119_spill] sm:$0xff]  ;;  %v9378_v29 = vld [vmem:[#allocation118_spill] sm:$0xff] }
 0x27b   :  { %v4289_v45 = vrot.slane %v9361_v27, %v6035_v48  ;;  %v9364_v43 = vcombine.low %v9362_v49, %v9363_v63  ;;  %v9369_v18 = vcombine.low %v9367_v6, %v9368_v2  ;;  %v4109_v10 = vrot.slane %v4095_v36, %v6035_v48 }
 0x27c   :  { %v4042_v39 = vcombine.low %v4034_v16, %v4041_v52  ;;  %v4296_v52 = vrot.slane %v4282_v35, %v6035_v48  ;;  %v4059_v46 = vcombine.low %v4051_v51, %v4058_v61  ;;  %v4102_v16 = vrot.slane %v4094_v38, %v6035_v48  ;;  %v9373_v61 = vld [vmem:[#allocation116_spill] sm:$0xff]  ;;  %v9377_v51 = vld [vmem:[#allocation115_spill] sm:$0xff] }
 0x27d   :  { %5532 = vmatmul.mubr.msk.f32.gmra.mxu0 %vm161_vm0, %v4025_v20  ;;  %v4075_v0 = vrot.slane %v9364_v43, %v6035_v48  ;;  %v4092_v8 = vrot.slane %v9369_v18, %v6035_v48  ;;  %v4085_v13 = vrot.slane %v4077_v62, %v6035_v48  ;;  %v4146_v20 = vcombine.low %v9373_v61, %v9372_v21 }
 0x27e   :  { %5534 = vmatprep.mubr.msk.f32.mxu0 %vm161_vm0, %v4042_v39  ;;  %v4297_v41 = vcombine.low %v4289_v45, %v4296_v52  ;;  %v4110_v39 = vcombine.low %v4102_v16, %v4109_v10  ;;  %v4143_v35 = vrot.slane %v4129_v9, %v6035_v48  ;;  %v9379_v15 = vcombine.low %v9377_v51, %v9378_v29  ;;  %v5456_v16 = vpop.f32.mrf.mxu1 }
 0x27f   :  { %v4076_v47 = vcombine.low %v4068_v44, %v4075_v0  ;;  %v4093_v37 = vcombine.low %v4085_v13, %v4092_v8  ;;  %v9374_v44 = vld [vmem:[#allocation104_spill] sm:$0xff]  ;;  %v4160_v19 = vrot.slane %v4146_v20, %v6035_v48  ;;  %v4179_v27 = vcombine.low %v7538_v11, %v7534_v4 }
 0x280   :  { %v9376_v58 = vcombine.low %v9374_v44, %v9375_v1  ;;  %v4153_v62 = vrot.slane %v9379_v15, %v6035_v48  ;;  %v4196_v45 = vcombine.low %v7442_v25, %v7462_v54  ;;  %v4194_v49 = vrot.slane %v4180_v3, %v6035_v48  ;;  %v3558_v59 = vpop.f32.mrf.mxu1 }
 0x281   :  { %5535 = vmatmul.mubr.msk.f32.gmra.mxu0 %vm161_vm0, %v4059_v46  ;;  %v4231_v63 = vcombine.low %v7773_v33, %v7769_v5  ;;  %v4187_v4 = vrot.slane %v4179_v27, %v6035_v48  ;;  %v4221_v11 = vrot.slane %v4213_v30, %v6035_v48  ;;  %v4247_v34 = vcombine.low %v7792_v31, %v7686_v14 }
 0x282   :  { %5537 = vmatprep.mubr.msk.f32.mxu0 %vm161_vm0, %v4076_v47  ;;  %v4136_v38 = vrot.slane %v9376_v58, %v6035_v48  ;;  %v4161_v52 = vcombine.low %v4153_v62, %v4160_v19  ;;  %v4204_v54 = vrot.slane %v4196_v45, %v6035_v48  ;;  %v9381_v56 = vcombine.low %v7544_v26, %v7564_v60  ;;  %v8447_v60 = vpop.f32.mrf.mxu0  ;;  %v5459_v13 = vpop.f32.mrf.mxu1 }
 0x283   :  { %v4195_v25 = vcombine.low %v4187_v4, %v4194_v49  ;;  %v4245_v32 = vrot.slane %v4231_v63, %v6035_v48  ;;  %v9382_v33 = vcombine.low %v7591_v28, %v7757_v42  ;;  %v4255_v14 = vrot.slane %v4247_v34, %v6035_v48  ;;  %9384 = vst [vmem:[#allocation107_spill] sm:$0xff] %v8447_v60 }
 0x284   :  { %v4144_v53 = vcombine.low %v4136_v38, %v4143_v35  ;;  %v4228_v5 = vrot.slane %v9381_v56, %v6035_v48  ;;  %v9383_v0 = vcombine.low %v7703_v50, %v7699_v55  ;;  %v8449_v28 = vpop.f32.mrf.mxu0 }
 0x285   :  { %5538 = vmatmul.mubr.msk.f32.gmra.mxu0 %vm161_vm0, %v4093_v37  ;;  %9385 = vst [vmem:[#allocation109_spill] sm:$0xff] %v8449_v28  ;;  %v3568_v37 = vpop.f32.mrf.mxu1 }
 0x286   :  { %5540 = vmatprep.mubr.msk.f32.mxu0 %vm161_vm0, %v4110_v39  ;;  %v4229_v43 = vcombine.low %v4221_v11, %v4228_v5  ;;  %v4262_v23 = vrot.slane %v9383_v0, %v6035_v48  ;;  %v5400_v42 = vpop.f32.mrf.mxu0 }
 0x287   :  { %v5462_v61 = vpop.f32.mrf.mxu1  ;;  %v3718_v11 = vadd.f32 %v5456_v16, %v5400_v42 }
 0x288   :  { %v4263_v26 = vcombine.low %v4255_v14, %v4262_v23  ;;  %v2281_v17 = vpop.f32.mrf.mxu0 }
 0x289   :  { %5541 = vmatmul.mubr.msk.f32.gmra.mxu0 %vm161_vm0, %v4127_v7  ;;  %v4211_v7 = vrot.slane %v9380_v40, %v6035_v48  ;;  %v3578_v39 = vpop.f32.mrf.mxu1 }
 0x28a   :  { %5543 = vmatprep.mubr.msk.f32.mxu0 %vm161_vm0, %v4144_v53  ;;  %v5403_v36 = vpop.f32.mrf.mxu0 }
 0x28b   :  { %v4212_v12 = vcombine.low %v4204_v54, %v4211_v7  ;;  %v5465_v44 = vpop.f32.mrf.mxu1 }
 0x28c   :  { %v2291_v46 = vpop.f32.mrf.mxu0 }
 0x28d   :  { %5544 = vmatmul.mubr.msk.f32.gmra.mxu0 %vm161_vm0, %v4161_v52  ;;  %v3588_v58 = vpop.f32.mrf.mxu1 }
 0x28e   :  { %5546 = vmatprep.mubr.msk.f32.mxu0 %vm161_vm0, %v4178_v57  ;;  %v4238_v57 = vrot.slane %v9382_v33, %v6035_v48  ;;  %v5406_v6 = vpop.f32.mrf.mxu0 }
 0x290   :  { %v4246_v31 = vcombine.low %v4238_v57, %v4245_v32  ;;  %v8451_v55 = vpop.f32.mrf.mxu0  ;;  %v3717_v32 = vadd.f32 %v3558_v59, %v2281_v17 }
 0x291   :  { %5547 = vmatmul.mubr.msk.f32.gmra.mxu0 %vm161_vm0, %v4195_v25 }
 0x292   :  { %5549 = vmatprep.mubr.msk.f32.mxu0 %vm161_vm0, %v4212_v12  ;;  %v8453_v48 = vpop.f32.mrf.mxu0  ;;  %v5468_v38 = vpop.f32.mrf.mxu1 }
 0x294   :  { %v8455_v50 = vpop.f32.mrf.mxu0  ;;  %v3598_v3 = vpop.f32.mrf.mxu1 }
 0x295   :  { %5550 = vmatmul.mubr.msk.f32.gmra.mxu0 %vm161_vm0, %v4229_v43  ;;  %v3720_v43 = vadd.f32 %v5459_v13, %v5403_v36 }
 0x296   :  { %5552 = vmatprep.mubr.msk.f32.mxu0 %vm161_vm0, %v4246_v31  ;;  %v8457_v2 = vpop.f32.mrf.mxu0 }
 0x299   :  { %5553 = vmatmul.mubr.msk.f32.gmra.mxu0 %vm161_vm0, %v4263_v26  ;;  %v3719_v26 = vadd.f32 %v3568_v37, %v2291_v46 }
 0x29a   :  { %5555 = vmatprep.mubr.msk.f32.mxu0 %vm161_vm0, %v4280_v24  ;;  %v8459_v24 = vpop.f32.mrf.mxu0 }
 0x29c   :  { %v8461_v18 = vpop.f32.mrf.mxu0 }
 0x29d   :  { %5556 = vmatmul.mubr.msk.f32.gmra.mxu0 %vm161_vm0, %v4297_v41 }
 0x29e   :  { %v8463_v8 = vpop.f32.mrf.mxu0 }
 0x2a0   :  { %v8465_v41 = vpop.f32.mrf.mxu0 }
 0x2a2   :  { %v8467_v47 = vpop.f32.mrf.mxu0 }
 0x2a3   :  { %v8487_v51 = vpop.f32.mrf.mxu1 }
 0x2a5   :  { %v8493_v62 = vpop.f32.mrf.mxu1 }
 0x2a9   :  { %v8469_v22 = vpop.f32.mrf.mxu0 }
 0x2ab   :  { %v8471_v9 = vpop.f32.mrf.mxu0 }
 0x2b2   :  { %v8499_v52 = vpop.f32.mrf.mxu1 }
 0x2b4   :  { %v8503_v30 = vpop.f32.mrf.mxu1 }
 0x2ba   :  { %v8473_v10 = vpop.f32.mrf.mxu0 }
 0x2bc   :  { %v8475_v21 = vpop.f32.mrf.mxu0 }
 0x2bf   :  { %v8509_v63 = vpop.f32.mrf.mxu1 }
 0x2c1   :  { %v8513_v54 = vpop.f32.mrf.mxu1 }
 0x2c6   :  { %v8477_v20 = vpop.f32.mrf.mxu0 }
 0x2c8   :  { %v8479_v35 = vpop.f32.mrf.mxu0 }
 0x2cf   :  { %v8517_v34 = vpop.f32.mrf.mxu1 }
 0x2d1   :  { %v8519_v57 = vpop.f32.mrf.mxu1 }
 0x2d8   :  { %v8481_v1 = vpop.f32.mrf.mxu0 }
 0x2da   :  { %v8483_v19 = vpop.f32.mrf.mxu0 }
 0x2df   :  { %v8523_v28 = vpop.f32.mrf.mxu1 }
 0x2e6   :  { %v8485_v53 = vpop.f32.mrf.mxu0 }
 0x2e8   :  { %v8489_v29 = vpop.f32.mrf.mxu0 }
 0x2fe   :  { %v8491_v15 = vpop.f32.mrf.mxu0 }
 0x300   :  { %v8495_v27 = vpop.f32.mrf.mxu0 }
 0x302   :  { %v8497_v45 = vpop.f32.mrf.mxu0 }
 0x304   :  { %v8501_v49 = vpop.f32.mrf.mxu0 }
 0x30c   :  { %v8505_v40 = vpop.f32.mrf.mxu0 }
 0x30e   :  { %v8507_v7 = vpop.f32.mrf.mxu0 }
 0x316   :  { %v8511_v4 = vpop.f32.mrf.mxu0 }
 0x318   :  { %v8515_v25 = vpop.f32.mrf.mxu0 }
 0x319   :  { %9386 = vst [vmem:[#allocation108_spill] sm:$0xff] %v8515_v25  ;;  %v3722_v25 = vadd.f32 %v5462_v61, %v5406_v6  ;;  %v3723_v6 = vadd.f32 %v3588_v58, %v8455_v50 }
 0x320   :  { %v5512_v12 = vpop.f32.mrf.mxu0 }
 0x321   :  { %v4588_v56 = vadd.f32 %v5512_v12, %v3718_v11  ;;  %v3721_v12 = vadd.f32 %v3578_v39, %v8451_v55 }
 0x322   :  { %v4428_v5 = vpop.f32.mrf.mxu0 }
 0x323   :  { %v4587_v33 = vadd.f32 %v4428_v5, %v3717_v32  ;;  %v4620_v14 = vsel %vm161_vm0, %v4588_v56, -inf  ;;  %v8528_v56 = vpop.f32.mrf.mxu1 }
 0x325   :  { %v4619_v31 = vsel %vm161_vm0, %v4587_v33, -inf  ;;  %v5515_v23 = vpop.f32.mrf.mxu0  ;;  %v3724_v33 = vadd.f32 %v5465_v44, %v8453_v48  ;;  %v3725_v48 = vadd.f32 %v3598_v3, %v8459_v24  ;;  %v3727_v24 = vadd.f32 %v8493_v62, %v8463_v8 }
 0x326   :  { %v4621_v0 = vmax.f32 %v4619_v31, %v4620_v14  ;;  %v4590_v60 = vadd.f32 %v5515_v23, %v3720_v43  ;;  %v3730_v3 = vadd.f32 %v8499_v52, %v8465_v41 }
 0x327   :  { %v4438_v16 = vpop.f32.mrf.mxu0 }
 0x328   :  { %v4622_v42 = vrot.slane %v4621_v0, 4  ;;  %v4589_v17 = vadd.f32 %v4438_v16, %v3719_v26  ;;  %v4629_v36 = vsel %vm161_vm0, %v4590_v60, -inf }
 0x329   :  { %v5518_v11 = vpop.f32.mrf.mxu0 }
 0x32a   :  { %v4623_v59 = vmax.f32 %v4621_v0, %v4622_v42  ;;  %v4628_v13 = vsel %vm161_vm0, %v4589_v17, -inf  ;;  %v4592_v32 = vadd.f32 %v5518_v11, %v3722_v25  ;;  %v8534_v0 = vpop.f32.mrf.mxu1  ;;  %v3726_v42 = vadd.f32 %v5468_v38, %v8457_v2 }
 0x32b   :  { %v4630_v46 = vmax.f32 %v4628_v13, %v4629_v36  ;;  %v4448_v37 = vpop.f32.mrf.mxu0  ;;  %v3728_v2 = vadd.f32 %v8487_v51, %v8461_v18  ;;  %v8555_v18 = vld [vmem:[%s8672_s9] ss:$0 sm:$0xff]  ;;  %s5597_s9 = smov 64  }
 0x32c   :  { %v4624_v5 = vrot.slane %v4623_v59, 2  ;;  %v4591_v43 = vadd.f32 %v4448_v37, %v3721_v12  ;;  %v4638_v55 = vsel %vm161_vm0, %v4592_v32, -inf  ;;  %v8540_v36 = vpop.f32.mrf.mxu1 }
 0x32d   :  { %v4631_v61 = vrot.slane %v4630_v46, 4  ;;  %v5521_v14 = vpop.f32.mrf.mxu0 }
 0x32e   :  { %v4625_v31 = vmax.f32 %v4623_v59, %v4624_v5  ;;  %v4637_v60 = vsel %vm161_vm0, %v4591_v43, -inf  ;;  %v4594_v39 = vadd.f32 %v5521_v14, %v3724_v33 }
 0x32f   :  { %v4632_v25 = vmax.f32 %v4630_v46, %v4631_v61  ;;  %v4639_v23 = vmax.f32 %v4637_v60, %v4638_v55  ;;  %v4458_v26 = vpop.f32.mrf.mxu0 }
 0x330   :  { %v4593_v16 = vadd.f32 %v4458_v26, %v3723_v6  ;;  %v4626_v17 = vrot.slane %v4625_v31, 1  ;;  %v4647_v59 = vsel %vm161_vm0, %v4594_v39, -inf  ;;  %v8550_v39 = vpop.f32.mrf.mxu1 }
 0x331   :  { %v4633_v44 = vrot.slane %v4632_v25, 2  ;;  %v4640_v50 = vrot.slane %v4639_v23, 4  ;;  %v5524_v58 = vpop.f32.mrf.mxu0 }
 0x332   :  { %v4646_v11 = vsel %vm161_vm0, %v4593_v16, -inf  ;;  %v4596_v12 = vadd.f32 %v5524_v58, %v3726_v42  ;;  %v4627_v61 = vmax.f32 %v4625_v31, %v4626_v17  ;;  %v3729_v31 = vadd.f32 %v8503_v30, %v8467_v47 }
 0x333   :  { %v4634_v13 = vmax.f32 %v4632_v25, %v4633_v44  ;;  %v4641_v32 = vmax.f32 %v4639_v23, %v4640_v50  ;;  %v4648_v5 = vmax.f32 %v4646_v11, %v4647_v59  ;;  %v4468_v46 = vpop.f32.mrf.mxu0  ;;  %v3732_v25 = vadd.f32 %v8509_v63, %v8469_v22  ;;  %v8565_v11 = vpop.f32.mrf.mxu1 }
 0x334   :  { %v4595_v38 = vadd.f32 %v4468_v46, %v3725_v48  ;;  %v4656_v14 = vsel %vm161_vm0, %v4596_v12, -inf  ;;  %v4770_v50 = vadd.f32 %v8555_v18, %v4627_v61 }
 0x335   :  { %v4635_v37 = vrot.slane %v4634_v13, 1  ;;  %v4642_v33 = vrot.slane %v4641_v32, 2  ;;  %v4649_v43 = vrot.slane %v4648_v5, 4  ;;  %v5527_v6 = vpop.f32.mrf.mxu0 }
 0x336   :  { %v4655_v55 = vsel %vm161_vm0, %v4595_v38, -inf  ;;  %v4598_v60 = vadd.f32 %v5527_v6, %v3728_v2  ;;  %v8571_v2 = vpop.f32.mrf.mxu1 }
 0x337   :  { %v4636_v8 = vmax.f32 %v4634_v13, %v4635_v37  ;;  %v4643_v51 = vmax.f32 %v4641_v32, %v4642_v33  ;;  %v4650_v41 = vmax.f32 %v4648_v5, %v4649_v43  ;;  %v4657_v62 = vmax.f32 %v4655_v55, %v4656_v14  ;;  %v4478_v52 = vpop.f32.mrf.mxu0 }
 0x338   :  { %v4597_v23 = vadd.f32 %v4478_v52, %v3727_v24  ;;  %v4665_v58 = vsel %vm161_vm0, %v4598_v60, -inf  ;;  %v3731_v13 = vadd.f32 %v8513_v54, %v8471_v9  ;;  %v3734_v32 = vadd.f32 %v8517_v34, %v8473_v10 }
 0x339   :  { %v4771_v26 = vadd.f32 %v8555_v18, %v4636_v8  ;;  %v4644_v42 = vrot.slane %v4643_v51, 1  ;;  %v4651_v16 = vrot.slane %v4650_v41, 2  ;;  %v4658_v48 = vrot.slane %v4657_v62, 4  ;;  %v5530_v44 = vpop.f32.mrf.mxu0 }
 0x33a   :  { %v4664_v17 = vsel %vm161_vm0, %v4597_v23, -inf  ;;  %v4600_v59 = vadd.f32 %v5530_v44, %v3730_v3  ;;  %v3733_v60 = vadd.f32 %v8519_v57, %v8475_v21 }
 0x33b   :  { %v4802_v47 = vrot.slane %v4771_v26, 7  ;;  %v4645_v30 = vmax.f32 %v4643_v51, %v4644_v42  ;;  %v4652_v22 = vmax.f32 %v4650_v41, %v4651_v16  ;;  %v4659_v63 = vmax.f32 %v4657_v62, %v4658_v48  ;;  %v4488_v12 = vpop.f32.mrf.mxu0  ;;  %v8579_v41 = vpop.f32.mrf.mxu1 }
 0x33c   :  { %v4666_v5 = vmax.f32 %v4664_v17, %v4665_v58  ;;  %v4599_v46 = vadd.f32 %v4488_v12, %v3729_v31  ;;  %v4674_v6 = vsel %vm161_vm0, %v4600_v59, -inf  ;;  %v3736_v17 = vadd.f32 %v8523_v28, %v8477_v20 }
 0x33d   :  { %v4772_v24 = vadd.f32 %v8555_v18, %v4645_v30  ;;  %v4653_v38 = vrot.slane %v4652_v22, 1  ;;  %v4660_v3 = vrot.slane %v4659_v63, 2  ;;  %v5533_v37 = vpop.f32.mrf.mxu0  ;;  %v4804_v33 = vsel %vm4803_vm10, %v4802_v47, %v4770_v50 }
 0x33e   :  { %v4667_v43 = vrot.slane %v4666_v5, 4  ;;  %v4673_v61 = vsel %vm161_vm0, %v4599_v46, -inf  ;;  %v4602_v9 = vadd.f32 %v5533_v37, %v3732_v25  ;;  %v3735_v59 = vadd.f32 %v8528_v56, %v8479_v35 }
 0x33f   :  { %v4805_v54 = vrot.slane %v4772_v24, 6  ;;  %v4654_v14 = vmax.f32 %v4652_v22, %v4653_v38  ;;  %v4661_v10 = vmax.f32 %v4659_v63, %v4660_v3  ;;  %v4675_v34 = vmax.f32 %v4673_v61, %v4674_v6  ;;  %v4498_v55 = vpop.f32.mrf.mxu0  ;;  %v8589_v22 = vpop.f32.mrf.mxu1 }
 0x340   :  { %v4668_v8 = vmax.f32 %v4666_v5, %v4667_v43  ;;  %v4601_v51 = vadd.f32 %v4498_v55, %v3731_v13  ;;  %v4683_v42 = vsel %vm161_vm0, %v4602_v9, -inf  ;;  %v3737_v43 = vadd.f32 %v8540_v36, %v8483_v19 }
 0x341   :  { %v4773_v62 = vadd.f32 %v8555_v18, %v4654_v14  ;;  %v4662_v52 = vrot.slane %v4661_v10, 1  ;;  %v4676_v31 = vrot.slane %v4675_v34, 4  ;;  %v5536_v23 = vpop.f32.mrf.mxu0  ;;  %v4806_v25 = vsel %vm2473_vm3, %v4805_v54, %v4804_v33  ;;  %v3688_v9 = vpop.f32.mrf.mxu1 }
 0x342   :  { %v4669_v26 = vrot.slane %v4668_v8, 2  ;;  %v4682_v16 = vsel %vm161_vm0, %v4601_v51, -inf  ;;  %v4604_v48 = vadd.f32 %v5536_v23, %v3734_v32  ;;  %v3738_v33 = vadd.f32 %v8534_v0, %v8481_v1 }
 0x343   :  { %v4807_v44 = vrot.slane %v4773_v62, 5  ;;  %v4663_v21 = vmax.f32 %v4661_v10, %v4662_v52  ;;  %v4677_v57 = vmax.f32 %v4675_v34, %v4676_v31  ;;  %v4684_v50 = vmax.f32 %v4682_v16, %v4683_v42  ;;  %v4508_v58 = vpop.f32.mrf.mxu0  ;;  %v5498_v42 = vpop.f32.mrf.mxu1 }
 0x344   :  { %v4670_v47 = vmax.f32 %v4668_v8, %v4669_v26  ;;  %v4603_v30 = vadd.f32 %v4508_v58, %v3733_v60  ;;  %v4692_v24 = vsel %vm161_vm0, %v4604_v48, -inf  ;;  %v3740_v31 = vadd.f32 %v8550_v39, %v8485_v53 }
 0x345   :  { %v4774_v63 = vadd.f32 %v8555_v18, %v4663_v21  ;;  %v4678_v12 = vrot.slane %v4677_v57, 2  ;;  %v4685_v13 = vrot.slane %v4684_v50, 4  ;;  %v5539_v32 = vpop.f32.mrf.mxu0  ;;  %v4809_v5 = vsel %vm4808_vm11, %v4807_v44, %v4806_v25 }
 0x346   :  { %v4671_v46 = vrot.slane %v4670_v47, 1  ;;  %v4691_v38 = vsel %vm161_vm0, %v4603_v30, -inf  ;;  %v4606_v28 = vadd.f32 %v5539_v32, %v3736_v17  ;;  %v3739_v23 = vadd.f32 %v8565_v11, %v8489_v29  ;;  %v3698_v32 = vpop.f32.mrf.mxu1 }
 0x347   :  { %v4810_v20 = vrot.slane %v4774_v63, 4  ;;  %v4679_v3 = vmax.f32 %v4677_v57, %v4678_v12  ;;  %v4686_v35 = vmax.f32 %v4684_v50, %v4685_v13  ;;  %v4693_v56 = vmax.f32 %v4691_v38, %v4692_v24  ;;  %v4518_v37 = vpop.f32.mrf.mxu0 }
 0x348   :  { %v4672_v6 = vmax.f32 %v4670_v47, %v4671_v46  ;;  %v4605_v61 = vadd.f32 %v4518_v37, %v3735_v59  ;;  %v4701_v60 = vsel %vm161_vm0, %v4606_v28, -inf  ;;  %v3742_v30 = vadd.f32 %v8571_v2, %v8491_v15 }
 0x349   :  { %v4680_v54 = vrot.slane %v4679_v3, 1  ;;  %v4687_v14 = vrot.slane %v4686_v35, 2  ;;  %v4694_v10 = vrot.slane %v4693_v56, 4  ;;  %v5542_v34 = vpop.f32.mrf.mxu0  ;;  %v4811_v55 = vsel %vm2475_vm5, %v4810_v20, %v4809_v5 }
 0x34a   :  { %v4700_v8 = vsel %vm161_vm0, %v4605_v61, -inf  ;;  %v4608_v51 = vadd.f32 %v5542_v34, %v3738_v33  ;;  %v4775_v62 = vadd.f32 %v8555_v18, %v4672_v6  ;;  %v3741_v63 = vadd.f32 %v8579_v41, %v8495_v27  ;;  %v5501_v61 = vpop.f32.mrf.mxu1 }
 0x34b   :  { %v4681_v1 = vmax.f32 %v4679_v3, %v4680_v54  ;;  %v4688_v0 = vmax.f32 %v4686_v35, %v4687_v14  ;;  %v4695_v52 = vmax.f32 %v4693_v56, %v4694_v10  ;;  %v4702_v19 = vmax.f32 %v4700_v8, %v4701_v60  ;;  %v4528_v36 = vpop.f32.mrf.mxu0 }
 0x34c   :  { %v4607_v25 = vadd.f32 %v4528_v36, %v3737_v43  ;;  %v4812_v26 = vrot.slane %v4775_v62, 3  ;;  %v4710_v50 = vsel %vm161_vm0, %v4608_v51, -inf  ;;  %v3744_v41 = vadd.f32 %v8589_v22, %v8497_v45  ;;  %v3708_v36 = vpop.f32.mrf.mxu1 }
 0x34d   :  { %v4689_v16 = vrot.slane %v4688_v0, 1  ;;  %v4696_v48 = vrot.slane %v4695_v52, 2  ;;  %v4703_v44 = vrot.slane %v4702_v19, 4  ;;  %v5545_v21 = vpop.f32.mrf.mxu0  ;;  %v4776_v57 = vadd.f32 %v8555_v18, %v4681_v1 }
 0x34e   :  { %v4709_v58 = vsel %vm161_vm0, %v4607_v25, -inf  ;;  %v4610_v17 = vadd.f32 %v5545_v21, %v3740_v31  ;;  %v4814_v59 = vsel %vm4813_vm12, %v4812_v26, %v4811_v55  ;;  %v3743_v33 = vadd.f32 %v3688_v9, %v8501_v49 }
 0x34f   :  { %v4697_v53 = vmax.f32 %v4695_v52, %v4696_v48  ;;  %v4704_v39 = vmax.f32 %v4702_v19, %v4703_v44  ;;  %v4711_v47 = vmax.f32 %v4709_v58, %v4710_v50  ;;  %v4538_v29 = vpop.f32.mrf.mxu0  ;;  %v4690_v11 = vmax.f32 %v4688_v0, %v4689_v16 }
 0x350   :  { %v4609_v12 = vadd.f32 %v4538_v29, %v3739_v23  ;;  %v4815_v13 = vrot.slane %v4776_v57, 2  ;;  %v4719_v20 = vsel %vm161_vm0, %v4610_v17, -inf  ;;  %v3746_v9 = vadd.f32 %v5498_v42, %v8505_v40 }
 0x351   :  { %v4698_v5 = vrot.slane %v4697_v53, 1  ;;  %v4705_v46 = vrot.slane %v4704_v39, 2  ;;  %v4712_v24 = vrot.slane %v4711_v47, 4  ;;  %v5548_v38 = vpop.f32.mrf.mxu0  ;;  %v4777_v28 = vadd.f32 %v8555_v18, %v4690_v11 }
 0x352   :  { %v4718_v3 = vsel %vm161_vm0, %v4609_v12, -inf  ;;  %v4612_v35 = vadd.f32 %v5548_v38, %v3742_v30  ;;  %v4816_v56 = vsel %vm2477_vm8, %v4815_v13, %v4814_v59  ;;  %v3745_v52 = vadd.f32 %v3698_v32, %v8507_v7  ;;  %v9387_v7 = vld [vmem:[#allocation6_spill] sm:$0xff] }
 0x353   :  { %v4706_v15 = vmax.f32 %v4704_v39, %v4705_v46  ;;  %v4713_v2 = vmax.f32 %v4711_v47, %v4712_v24  ;;  %v4720_v37 = vmax.f32 %v4718_v3, %v4719_v20  ;;  %v4548_v27 = vpop.f32.mrf.mxu0  ;;  %v4817_v6 = vrot.slane %v4777_v28, 1 }
 0x354   :  { %v4611_v43 = vadd.f32 %v4548_v27, %v3741_v63  ;;  %v4699_v54 = vmax.f32 %v4697_v53, %v4698_v5  ;;  %v4728_v60 = vsel %vm161_vm0, %v4612_v35, -inf  ;;  %v3748_v59 = vadd.f32 %v5501_v61, %v8511_v4  ;;  %v9388_v53 = vld [vmem:[#allocation108_spill] sm:$0xff] }
 0x355   :  { %v4707_v14 = vrot.slane %v4706_v15, 1  ;;  %v4714_v10 = vrot.slane %v4713_v2, 2  ;;  %v4721_v34 = vrot.slane %v4720_v37, 4  ;;  %v5551_v55 = vpop.f32.mrf.mxu0  ;;  %v4819_v62 = vsel %vm4818_vm13, %v4817_v6, %v4816_v56 }
 0x356   :  { %v4727_v8 = vsel %vm161_vm0, %v4611_v43, -inf  ;;  %v4614_v51 = vadd.f32 %v5551_v55, %v3744_v41  ;;  %4834 = vrot.lane.b32.xlu0 %v4819_v62, %s5597_s9  ;;  %v4778_v48 = vadd.f32 %v8555_v18, %v4699_v54  ;;  %v3747_v39 = vadd.f32 %v3708_v36, %v9388_v53 }
 0x357   :  { %v4708_v1 = vmax.f32 %v4706_v15, %v4707_v14  ;;  %v4715_v0 = vmax.f32 %v4713_v2, %v4714_v10  ;;  %v4722_v45 = vmax.f32 %v4720_v37, %v4721_v34  ;;  %v4729_v22 = vmax.f32 %v4727_v8, %v4728_v60  ;;  %v4558_v49 = vpop.f32.mrf.mxu0 }
 0x358   :  { %v4613_v19 = vadd.f32 %v4558_v49, %v3743_v33  ;;  %v4737_v44 = vsel %vm161_vm0, %v4614_v51, -inf }
 0x359   :  { %v4779_v31 = vadd.f32 %v8555_v18, %v4708_v1  ;;  %v4716_v23 = vrot.slane %v4715_v0, 1  ;;  %v4723_v25 = vrot.slane %v4722_v45, 2  ;;  %v4730_v26 = vrot.slane %v4729_v22, 4  ;;  %v5554_v16 = vpop.f32.mrf.mxu0 }
 0x35a   :  { %v4736_v21 = vsel %vm161_vm0, %v4613_v19, -inf  ;;  %v4616_v57 = vadd.f32 %v5554_v16, %v3746_v9  ;;  %4850 = vrot.lane.b32.xlu0 %v9387_v7, %s5598_s14  ;;  %v9390_v7 = vld [vmem:[#allocation109_spill] sm:$0xff] }
 0x35b   :  { %v4820_v50 = vrot.slane %v4779_v31, 7  ;;  %v4717_v58 = vmax.f32 %v4715_v0, %v4716_v23  ;;  %v4724_v40 = vmax.f32 %v4722_v45, %v4723_v25  ;;  %v4731_v42 = vmax.f32 %v4729_v22, %v4730_v26  ;;  %v4568_v17 = vpop.f32.mrf.mxu0 }
 0x35c   :  { %v4738_v47 = vmax.f32 %v4736_v21, %v4737_v44  ;;  %v4615_v29 = vadd.f32 %v4568_v17, %v3745_v52  ;;  %v4746_v5 = vsel %vm161_vm0, %v4616_v57, -inf }
 0x35d   :  { %v4780_v11 = vadd.f32 %v8555_v18, %v4717_v58  ;;  %v4725_v30 = vrot.slane %v4724_v40, 1  ;;  %v4732_v63 = vrot.slane %v4731_v42, 2  ;;  %v5557_v12 = vpop.f32.mrf.mxu0  ;;  %v4821_v13 = vsel %vm4803_vm10, %v4820_v50, %v4778_v48  ;;  %v9389_v58 = vld [vmem:[#allocation5_spill] sm:$0xff] }
 0x35e   :  { %v4739_v32 = vrot.slane %v4738_v47, 4  ;;  %v4745_v46 = vsel %vm161_vm0, %v4615_v29, -inf  ;;  %v4618_v24 = vadd.f32 %v5557_v12, %v3748_v59  ;;  %v9391_v29 = vld [vmem:[#allocation107_spill] sm:$0xff] }
 0x35f   :  { %v4822_v38 = vrot.slane %v4780_v11, 6  ;;  %v4726_v28 = vmax.f32 %v4724_v40, %v4725_v30  ;;  %v4733_v4 = vmax.f32 %v4731_v42, %v4732_v63  ;;  %v4747_v20 = vmax.f32 %v4745_v46, %v4746_v5  ;;  %v4578_v3 = vpop.f32.mrf.mxu0  ;;  %v4843_v40 = vpop.permute.xlu0 %4842 }
 0x360   :  { %v4740_v35 = vmax.f32 %v4738_v47, %v4739_v32  ;;  %v4617_v56 = vadd.f32 %v4578_v3, %v3747_v39  ;;  %v4755_v33 = vsel %vm161_vm0, %v4618_v24, -inf  ;;  %v4845_v39 = vpop.permute.xlu1 %4844 }
 0x361   :  { %v4781_v15 = vadd.f32 %v8555_v18, %v4726_v28  ;;  %v4734_v2 = vrot.slane %v4733_v4, 1  ;;  %v4748_v37 = vrot.slane %v4747_v20, 4  ;;  %v4823_v27 = vsel %vm2473_vm3, %v4822_v38, %v4821_v13 }
 0x362   :  { %v4741_v41 = vrot.slane %v4740_v35, 2  ;;  %v4754_v43 = vsel %vm161_vm0, %v4617_v56, -inf  ;;  %vm4858_vm0 = vcmask 785408  }
 0x363   :  { %v4824_v6 = vrot.slane %v4781_v15, 5  ;;  %v4735_v61 = vmax.f32 %v4733_v4, %v4734_v2  ;;  %v4749_v54 = vmax.f32 %v4747_v20, %v4748_v37  ;;  %v4756_v14 = vmax.f32 %v4754_v43, %v4755_v33 }
 0x364   :  { %v4742_v10 = vmax.f32 %v4740_v35, %v4741_v41 }
 0x365   :  { %v4782_v34 = vadd.f32 %v8555_v18, %v4735_v61  ;;  %v4750_v55 = vrot.slane %v4749_v54, 2  ;;  %v4757_v60 = vrot.slane %v4756_v14, 4  ;;  %v4825_v8 = vsel %vm4808_vm11, %v4824_v6, %v4823_v27 }
 0x366   :  { %v4743_v51 = vrot.slane %v4742_v10, 1 }
 0x367   :  { %v4826_v62 = vrot.slane %v4782_v34, 4  ;;  %v4751_v1 = vmax.f32 %v4749_v54, %v4750_v55  ;;  %v4758_v0 = vmax.f32 %v4756_v14, %v4757_v60 }
 0x368   :  { %v4744_v45 = vmax.f32 %v4742_v10, %v4743_v51 }
 0x369   :  { %v4752_v22 = vrot.slane %v4751_v1, 1  ;;  %v4759_v49 = vrot.slane %v4758_v0, 2  ;;  %v4827_v9 = vsel %vm2475_vm5, %v4826_v62, %v4825_v8 }
 0x36a   :  { %v4783_v52 = vadd.f32 %v8555_v18, %v4744_v45 }
 0x36b   :  { %v4753_v19 = vmax.f32 %v4751_v1, %v4752_v22  ;;  %v4760_v36 = vmax.f32 %v4758_v0, %v4759_v49 }
 0x36c   :  { %v4828_v31 = vrot.slane %v4783_v52, 3 }
 0x36d   :  { %v4761_v23 = vrot.slane %v4760_v36, 1  ;;  %v4784_v25 = vadd.f32 %v8555_v18, %v4753_v19 }
 0x36e   :  { %v4829_v26 = vsel %vm4813_vm12, %v4828_v31, %v4827_v9 }
 0x36f   :  { %v4762_v16 = vmax.f32 %v4760_v36, %v4761_v23  ;;  %v4830_v48 = vrot.slane %v4784_v25, 2 }
 0x371   :  { %v4785_v44 = vadd.f32 %v8555_v18, %v4762_v16  ;;  %v4831_v21 = vsel %vm2477_vm8, %v4830_v48, %v4829_v26 }
 0x373   :  { %v4832_v57 = vrot.slane %v4785_v44, 1 }
 0x375   :  { %v4833_v50 = vsel %vm4818_vm13, %v4832_v57, %v4831_v21 }
 0x376   :  { %4836 = vrot.lane.b32.xlu1 %v4833_v50, %s5597_s9 }
 0x37a   :  { %4852 = vrot.lane.b32.xlu1 %v9389_v58, %s5598_s14 }
 0x3c8   :  { %v4835_v42 = vpop.permute.xlu0 %4834 }
 0x3c9   :  { %v4856_v17 = vsel %vm601_vm7, %v9390_v7, %v4835_v42 }
 0x3ca   :  { %v4859_v59 = vsel %vm4858_vm0, %v4856_v17, %v4843_v40 }
 0x3cc   :  { %v4851_v53 = vpop.permute.xlu0 %4850 }
 0x3cd   :  { %v4862_v18 = vsel %vm4861_vm14, %v4859_v59, %v4851_v53 }
 0x3ce   :  { %4864 = vst [vmem:[#allocation2] sm:$0xff] %v4862_v18 }
 0x3e8   :  { %v4837_v47 = vpop.permute.xlu1 %4836 }
 0x3e9   :  { %v4857_v11 = vsel %vm601_vm7, %v9391_v29, %v4837_v47 }
 0x3ea   :  { %v4860_v30 = vsel %vm4858_vm0, %v4857_v11, %v4845_v39 }
 0x3ec   :  { %v4853_v63 = vpop.permute.xlu1 %4852 }
 0x3ed   :  { %v4863_v12 = vsel %vm4861_vm14, %v4860_v30, %v4853_v63 }
 0x3ee   :  { %4865 = vst [vmem:[#allocation2 + $0x8] sm:$0xff] %v4863_v12 }
 0x3ef   :  { %5581 = shalt.err (!%p5578_p4)
}
 0x3f0   :  { %s5600_s17 = smov 128   ;;  %s5601_s18 = smov 8  }
 0x3f1   :  { %4877 = dma.vmem_to_hbm [thread:$0]  %s4872_s7, 256, %s8673_s10, [#allocation3], %s5600_s17, %s5600_s17, %s5601_s18  }
 0x3f2   :  { %5590 = dma.done.wait [#allocation3], 256  }
 0x3f3   :  { %5591 = vsyncadd [#allocation3], 4294967040 }
 0x3f4   :  { %4881 = vsyncpa [#allocation3], 1 }

</bundles_post_ra>
